<compile_context>
chip_gen: v7x
topology: tpu7x:2x2x1
jax: 0.10.0
libtpu: 0.0.40
codegen_flags: <defaults>
</compile_context>

<pallas_src>
import jax
import jax.numpy as jnp
from jax.experimental import pallas as pl
from jax.experimental.pallas import tpu as pltpu

# ----------------------------- model config (small, synthetic) -----------------------------
VOCAB = 100
HIDDEN = 32
NUM_HEADS = 4
HEAD_DIM = HIDDEN // NUM_HEADS
NUM_LAYERS = 2
INTERMEDIATE = 64
MAX_POS = 8
TYPE_VOCAB = 2
SEQ = 8
BATCH = 2
NUM_TOWERS = 3
OUT1, OUT2, OUT3, OUT4 = 2, 2, 2, 2  # the four head output sizes
NOUT = OUT1 + OUT2 + OUT3 + OUT4
BS = BATCH * SEQ


# ----------------------------- fully fused BERT-regressor kernel -----------------------------
def _bert_regressor_kernel(
    ids_ref, segs_ref, mask_ref,
    wemb_ref, pemb_ref, temb_ref, embln_ref,
    wqkv_ref, bqkv_ref, wo_ref, bo_ref, ln1_ref,
    wi_ref, bi_ref, w2_ref, b2_ref, ln2_ref,
    whead_ref, bhead_ref,
    o_ref,
):
    t = pl.program_id(0)
    H, D, NH = HIDDEN, HEAD_DIM, NUM_HEADS

    def layernorm(x, gb):
        g = gb[0:1, :]
        b = gb[1:2, :]
        mean = jnp.mean(x, axis=-1, keepdims=True)
        var = jnp.mean((x - mean) ** 2, axis=-1, keepdims=True)
        return (x - mean) * jax.lax.rsqrt(var + 1e-12) * g + b

    # ---------------- embedding lookup (in-kernel) ----------------
    # One-hot matmuls against the VMEM-resident tables (vocab is tiny here).
    # TODO(synk): at real vocab sizes replace with scalar-prefetch indices + dynamic
    # row loads / DMA gather instead of a (BS, VOCAB) one-hot.
    vocab_iota = jax.lax.broadcasted_iota(jnp.int32, (BS, VOCAB), 1)
    type_iota = jax.lax.broadcasted_iota(jnp.int32, (BS, TYPE_VOCAB), 1)
    onehot_w = jnp.where(ids_ref[...] == vocab_iota, 1.0, 0.0)     # (BS, VOCAB)
    onehot_t = jnp.where(segs_ref[...] == type_iota, 1.0, 0.0)     # (BS, TYPE_VOCAB)
    pos = jnp.concatenate([pemb_ref[...]] * BATCH, axis=0)         # (BS, H)
    x = (
        jnp.dot(onehot_w, wemb_ref[...], preferred_element_type=jnp.float32)
        + jnp.dot(onehot_t, temb_ref[...], preferred_element_type=jnp.float32)
        + pos
    )
    x = layernorm(x, embln_ref[...])

    # additive attention bias built in-kernel from the int (B, S) padding mask
    bias = ((1.0 - mask_ref[...].astype(jnp.float32)) * -1e9)[:, None, :]  # (B, 1, S)
    scale = 1.0 / (float(D) ** 0.5)

    # ---------------- transformer layers (static unroll) ----------------
    for l in range(NUM_LAYERS):
        # fused QKV projection; everything below stays in vregs (no VMEM scratch)
        qkv = jnp.dot(x, wqkv_ref[l], preferred_element_type=jnp.float32) + bqkv_ref[l]

        # per-head attention on values; 3-D einsums (single batch dim) hit the MXU.
        # TODO(synk): collapse to one 'bqhd,bkhd->bhqk' einsum once multi-batch-dim
        # dot_general lowering is confirmed at these shapes.
        ctx_heads = []
        for h in range(NH):
            q = qkv[:, h * D:(h + 1) * D].reshape(BATCH, SEQ, D)
            k = qkv[:, H + h * D:H + (h + 1) * D].reshape(BATCH, SEQ, D)
            v = qkv[:, 2 * H + h * D:2 * H + (h + 1) * D].reshape(BATCH, SEQ, D)
            s = jnp.einsum("bqd,bkd->bqk", q, k,
                           preferred_element_type=jnp.float32) * scale + bias
            m = jnp.max(s, axis=-1, keepdims=True)
            p = jnp.exp(s - m)
            p = p * pl.reciprocal(jnp.sum(p, axis=-1, keepdims=True), approx=True)
            ctx_heads.append(
                jnp.einsum("bqk,bkd->bqd", p, v, preferred_element_type=jnp.float32))
        ctx = jnp.concatenate(ctx_heads, axis=-1).reshape(BS, H)

        attn = jnp.dot(ctx, wo_ref[l], preferred_element_type=jnp.float32) + bo_ref[l]
        x = layernorm(x + attn, ln1_ref[l])

        hdn = jnp.dot(x, wi_ref[l], preferred_element_type=jnp.float32) + bi_ref[l]
        # TODO(synk): HF BERT's default activation is exact (erf) GELU; the tanh
        # approximation differs at the ~1e-3 level.
        hdn = 0.5 * hdn * (1.0 + jnp.tanh(
            0.7978845608028654 * (hdn + 0.044715 * hdn * hdn * hdn)))
        ffn = jnp.dot(hdn, w2_ref[l], preferred_element_type=jnp.float32) + b2_ref[l]
        x = layernorm(x + ffn, ln2_ref[l])

    # ---------------- CLS pooling + fused regression heads ----------------
    cls = x.reshape(BATCH, SEQ, H)[:, 0, :]                        # (B, H), single slice

    @pl.when(t == 0)
    def _init():
        o_ref[...] = jnp.broadcast_to(bhead_ref[...], (BATCH, NOUT))

    # accumulate this tower's head contribution into the shared output block
    o_ref[...] += jnp.dot(cls, whead_ref[...], preferred_element_type=jnp.float32)


def pallas_bert_regressor(packed, ids, segs, masks):
    T, L, H, I = NUM_TOWERS, NUM_LAYERS, HIDDEN, INTERMEDIATE

    def t3(t):
        return (t, 0, 0)

    def t4(t):
        return (t, 0, 0, 0)

    def z2(t):
        return (0, 0)

    return pl.pallas_call(
        _bert_regressor_kernel,
        out_shape=jax.ShapeDtypeStruct((BATCH, NOUT), jnp.float32),
        grid=(T,),
        in_specs=[
            pl.BlockSpec((None, BS, 1), t3),              # token ids (column layout)
            pl.BlockSpec((None, BS, 1), t3),              # segment ids (column layout)
            pl.BlockSpec((None, BATCH, SEQ), t3),         # attention mask (int)
            pl.BlockSpec((None, VOCAB, H), t3),           # word embedding table
            pl.BlockSpec((None, SEQ, H), t3),             # position embeddings (first SEQ rows)
            pl.BlockSpec((None, TYPE_VOCAB, H), t3),      # token-type embedding table
            pl.BlockSpec((None, 2, H), t3),               # embedding LN (gamma, beta)
            pl.BlockSpec((None, L, H, 3 * H), t4),        # fused QKV weight
            pl.BlockSpec((None, L, 1, 3 * H), t4),        # fused QKV bias
            pl.BlockSpec((None, L, H, H), t4),            # attention output weight
            pl.BlockSpec((None, L, 1, H), t4),            # attention output bias
            pl.BlockSpec((None, L, 2, H), t4),            # LN1 (gamma, beta)
            pl.BlockSpec((None, L, H, I), t4),            # FFN intermediate weight
            pl.BlockSpec((None, L, 1, I), t4),            # FFN intermediate bias
            pl.BlockSpec((None, L, I, H), t4),            # FFN output weight
            pl.BlockSpec((None, L, 1, H), t4),            # FFN output bias
            pl.BlockSpec((None, L, 2, H), t4),            # LN2 (gamma, beta)
            pl.BlockSpec((None, H, NOUT), t3),            # fused per-tower head weight
            pl.BlockSpec((1, NOUT), z2),                  # fused head bias
        ],
        out_specs=pl.BlockSpec((BATCH, NOUT), z2),        # accumulated across towers
        compiler_params=pltpu.CompilerParams(
            dimension_semantics=("arbitrary",)),          # output accumulates over tower axis
    )(ids, segs, masks,
      packed["word_emb"], packed["pos_emb"], packed["type_emb"], packed["emb_ln"],
      packed["wqkv"], packed["bqkv"], packed["wo"], packed["bo"], packed["ln1"],
      packed["wi"], packed["bi"], packed["w2"], packed["b2"], packed["ln2"],
      packed["w_head"], packed["b_head"])


# ----------------------------- parameter init (deterministic, synthetic) -----------------------------
def _dense_init(key, fan_in, fan_out):
    return (
        jax.random.normal(key, (fan_in, fan_out), jnp.float32) * 0.02,
        jnp.zeros((fan_out,), jnp.float32),
    )


def init_bert_params(key):
    keys = jax.random.split(key, 4 + NUM_LAYERS)
    params = {
        "word_emb": jax.random.normal(keys[0], (VOCAB, HIDDEN), jnp.float32) * 0.02,
        "pos_emb": jax.random.normal(keys[1], (MAX_POS, HIDDEN), jnp.float32) * 0.02,
        "type_emb": jax.random.normal(keys[2], (TYPE_VOCAB, HIDDEN), jnp.float32) * 0.02,
        "emb_ln_g": jnp.ones((HIDDEN,), jnp.float32),
        "emb_ln_b": jnp.zeros((HIDDEN,), jnp.float32),
        "layers": [],
    }
    for li in range(NUM_LAYERS):
        ks = jax.random.split(keys[4 + li], 6)
        wq, bq = _dense_init(ks[0], HIDDEN, HIDDEN)
        wk, bk = _dense_init(ks[1], HIDDEN, HIDDEN)
        wv, bv = _dense_init(ks[2], HIDDEN, HIDDEN)
        wo, bo = _dense_init(ks[3], HIDDEN, HIDDEN)
        wi, bi = _dense_init(ks[4], HIDDEN, INTERMEDIATE)
        w2, b2 = _dense_init(ks[5], INTERMEDIATE, HIDDEN)
        params["layers"].append(
            {
                "wq": wq, "bq": bq, "wk": wk, "bk": bk, "wv": wv, "bv": bv,
                "wo": wo, "bo": bo,
                "ln1_g": jnp.ones((HIDDEN,), jnp.float32),
                "ln1_b": jnp.zeros((HIDDEN,), jnp.float32),
                "wi": wi, "bi": bi, "w2": w2, "b2": b2,
                "ln2_g": jnp.ones((HIDDEN,), jnp.float32),
                "ln2_b": jnp.zeros((HIDDEN,), jnp.float32),
            }
        )
    return params


def init_regressor_params(key):
    k1, k2, k3, k4, kb1, kb2, kb3 = jax.random.split(key, 7)
    w1, b1 = _dense_init(k1, HIDDEN, OUT1)
    w2, b2 = _dense_init(k2, 2 * HIDDEN, OUT2)
    w3, b3 = _dense_init(k3, 2 * HIDDEN, OUT3)
    w4, b4 = _dense_init(k4, HIDDEN, OUT4)
    return {
        "bert1": init_bert_params(kb1),
        "bert2": init_bert_params(kb2),
        "bert3": init_bert_params(kb3),
        "w1": w1, "b1": b1, "w2": w2, "b2": b2,
        "w3": w3, "b3": b3, "w4": w4, "b4": b4,
    }


def pack_params(params):
    """Stack the three towers' weights on a leading axis and fuse QKV / head weights.

    Done once at init (outside the jitted forward) so the hot path has no reshuffling.
    """
    towers = [params["bert1"], params["bert2"], params["bert3"]]

    def stack(fn):
        return jnp.stack([fn(t) for t in towers])

    packed = {
        "word_emb": stack(lambda p: p["word_emb"]),
        "pos_emb": stack(lambda p: p["pos_emb"][:SEQ]),
        "type_emb": stack(lambda p: p["type_emb"]),
        "emb_ln": stack(lambda p: jnp.stack([p["emb_ln_g"], p["emb_ln_b"]])),
        "wqkv": stack(lambda p: jnp.stack(
            [jnp.concatenate([l["wq"], l["wk"], l["wv"]], axis=1) for l in p["layers"]])),
        "bqkv": stack(lambda p: jnp.stack(
            [jnp.concatenate([l["bq"], l["bk"], l["bv"]])[None, :] for l in p["layers"]])),
        "wo": stack(lambda p: jnp.stack([l["wo"] for l in p["layers"]])),
        "bo": stack(lambda p: jnp.stack([l["bo"][None, :] for l in p["layers"]])),
        "ln1": stack(lambda p: jnp.stack(
            [jnp.stack([l["ln1_g"], l["ln1_b"]]) for l in p["layers"]])),
        "wi": stack(lambda p: jnp.stack([l["wi"] for l in p["layers"]])),
        "bi": stack(lambda p: jnp.stack([l["bi"][None, :] for l in p["layers"]])),
        "w2": stack(lambda p: jnp.stack([l["w2"] for l in p["layers"]])),
        "b2": stack(lambda p: jnp.stack([l["b2"][None, :] for l in p["layers"]])),
        "ln2": stack(lambda p: jnp.stack(
            [jnp.stack([l["ln2_g"], l["ln2_b"]]) for l in p["layers"]])),
    }

    # Fused regression heads: one (H, 8) weight per tower such that
    #   out = cls1 @ W[0] + cls2 @ W[1] + cls3 @ W[2] + b  ==  concat([o1, o2, o3, o4])
    H = HIDDEN
    w_head = jnp.zeros((NUM_TOWERS, H, NOUT), jnp.float32)
    c0, c1, c2, c3 = 0, OUT1, OUT1 + OUT2, OUT1 + OUT2 + OUT3
    w_head = w_head.at[0, :, c0:c1].set(params["w1"])          # o1 <- cls1
    w_head = w_head.at[0, :, c1:c2].set(params["w2"][:H])      # o2 <- [cls1 | cls2]
    w_head = w_head.at[1, :, c1:c2].set(params["w2"][H:])
    w_head = w_head.at[1, :, c2:c3].set(params["w3"][:H])      # o3 <- [cls2 | cls3]
    w_head = w_head.at[2, :, c2:c3].set(params["w3"][H:])
    w_head = w_head.at[2, :, c3:].set(params["w4"])            # o4 <- cls3
    b_head = jnp.concatenate(
        [params["b1"], params["b2"], params["b3"], params["b4"]])[None, :]
    packed["w_head"] = w_head
    packed["b_head"] = b_head
    return packed


# ----------------------------- BERTRegressor forward -----------------------------
@jax.jit
def bert_regressor_forward(
    packed,
    input_word_ids1, input_masks1, input_segments1,
    input_word_ids2, input_masks2, input_segments2,
    input_word_ids3, input_masks3, input_segments3,
):
    # Reshape ids/segments to a (BS, 1) column layout on the host side (free in XLA)
    # so the in-kernel one-hot compare needs no lane->sublane relayout.
    ids = jnp.stack([input_word_ids1, input_word_ids2, input_word_ids3]) \
        .astype(jnp.int32).reshape(NUM_TOWERS, BS, 1)
    segs = jnp.stack([input_segments1, input_segments2, input_segments3]) \
        .astype(jnp.int32).reshape(NUM_TOWERS, BS, 1)
    masks = jnp.stack([input_masks1, input_masks2, input_masks3]).astype(jnp.int32)

    # dropout_layer{1..4} are identity in eval mode (inference semantics)
    # One fused kernel: embeddings, 3 BERT towers, CLS pooling, 4 regression heads.
    return pallas_bert_regressor(packed, ids, segs, masks)      # (B, 8)


# ----------------------------- main -----------------------------
if __name__ == "__main__":
    root = jax.random.PRNGKey(0)
    kp, ki = jax.random.split(root)
    params = init_regressor_params(kp)
    packed = pack_params(params)

    def make_inputs(key):
        k1, k2 = jax.random.split(key)
        ids = jax.random.randint(k1, (BATCH, SEQ), 0, VOCAB, dtype=jnp.int32)
        mask = jnp.ones((BATCH, SEQ), jnp.int32).at[:, SEQ - 2:].set(0)  # some padding
        seg = jnp.zeros((BATCH, SEQ), jnp.int32).at[:, SEQ // 2:].set(1)
        return ids, mask, seg

    k1, k2, k3 = jax.random.split(ki, 3)
    ids1, m1, s1 = make_inputs(k1)
    ids2, m2, s2 = make_inputs(k2)
    ids3, m3, s3 = make_inputs(k3)

    out = bert_regressor_forward(
        packed, ids1, m1, s1, ids2, m2, s2, ids3, m3, s3
    )
    out = jax.block_until_ready(out)
    assert out.shape == (BATCH, NOUT)
    assert bool(jnp.all(jnp.isfinite(out)))
    print("KERNEL_OK")
</pallas_src>

<mosaic_0001>
module attributes {stable_mosaic.version = 11 : i64} {
  func.func @_bert_regressor_kernel(%arg0: i32, %arg1: memref<1x16x1xi32, #tpu.memory_space<vmem>>, %arg2: memref<1x16x1xi32, #tpu.memory_space<vmem>>, %arg3: memref<1x2x8xi32, #tpu.memory_space<vmem>>, %arg4: memref<1x100x32xf32, #tpu.memory_space<vmem>>, %arg5: memref<1x8x32xf32, #tpu.memory_space<vmem>>, %arg6: memref<1x2x32xf32, #tpu.memory_space<vmem>>, %arg7: memref<1x2x32xf32, #tpu.memory_space<vmem>>, %arg8: memref<1x2x32x96xf32, #tpu.memory_space<vmem>>, %arg9: memref<1x2x1x96xf32, #tpu.memory_space<vmem>>, %arg10: memref<1x2x32x32xf32, #tpu.memory_space<vmem>>, %arg11: memref<1x2x1x32xf32, #tpu.memory_space<vmem>>, %arg12: memref<1x2x2x32xf32, #tpu.memory_space<vmem>>, %arg13: memref<1x2x32x64xf32, #tpu.memory_space<vmem>>, %arg14: memref<1x2x1x64xf32, #tpu.memory_space<vmem>>, %arg15: memref<1x2x64x32xf32, #tpu.memory_space<vmem>>, %arg16: memref<1x2x1x32xf32, #tpu.memory_space<vmem>>, %arg17: memref<1x2x2x32xf32, #tpu.memory_space<vmem>>, %arg18: memref<1x32x8xf32, #tpu.memory_space<vmem>>, %arg19: memref<1x8xf32, #tpu.memory_space<vmem>>, %arg20: memref<2x8xf32, #tpu.memory_space<vmem>>) attributes {dimension_semantics = [#tpu.dimension_semantics<arbitrary>], iteration_bounds = array<i64: 3>, scalar_prefetch = 0 : i64, scratch_operands = 0 : i64, tpu.core_type = #tpu.core_type<tc>, window_params = [{transform_indices = @transform_0, window_bounds = array<i64: 1, 16, 1>}, {transform_indices = @transform_1, window_bounds = array<i64: 1, 16, 1>}, {transform_indices = @transform_2, window_bounds = array<i64: 1, 2, 8>}, {transform_indices = @transform_3, window_bounds = array<i64: 1, 100, 32>}, {transform_indices = @transform_4, window_bounds = array<i64: 1, 8, 32>}, {transform_indices = @transform_5, window_bounds = array<i64: 1, 2, 32>}, {transform_indices = @transform_6, window_bounds = array<i64: 1, 2, 32>}, {transform_indices = @transform_7, window_bounds = array<i64: 1, 2, 32, 96>}, {transform_indices = @transform_8, window_bounds = array<i64: 1, 2, 1, 96>}, {transform_indices = @transform_9, window_bounds = array<i64: 1, 2, 32, 32>}, {transform_indices = @transform_10, window_bounds = array<i64: 1, 2, 1, 32>}, {transform_indices = @transform_11, window_bounds = array<i64: 1, 2, 2, 32>}, {transform_indices = @transform_12, window_bounds = array<i64: 1, 2, 32, 64>}, {transform_indices = @transform_13, window_bounds = array<i64: 1, 2, 1, 64>}, {transform_indices = @transform_14, window_bounds = array<i64: 1, 2, 64, 32>}, {transform_indices = @transform_15, window_bounds = array<i64: 1, 2, 1, 32>}, {transform_indices = @transform_16, window_bounds = array<i64: 1, 2, 2, 32>}, {transform_indices = @transform_17, window_bounds = array<i64: 1, 32, 8>}, {pipeline_mode = #tpu.pipeline_mode<synchronous>, transform_indices = @transform_18, window_bounds = array<i64: 1, 8>}, {pipeline_mode = #tpu.pipeline_mode<synchronous>, transform_indices = @transform_19, window_bounds = array<i64: 2, 8>}]} {
    %0 = tpu.iota {dimensions = array<i32: 1>} : vector<16x100xi32>
    %1 = tpu.iota {dimensions = array<i32: 1>} : vector<16x2xi32>
    %c0 = arith.constant 0 : index
    %c0_0 = arith.constant 0 : index
    %c0_1 = arith.constant 0 : index
    %2 = vector.load %arg1[%c0, %c0_0, %c0_1] : memref<1x16x1xi32, #tpu.memory_space<vmem>>, vector<1x16x1xi32>
    %3 = vector.shape_cast %2 : vector<1x16x1xi32> to vector<16x1xi32>
    %4 = vector.broadcast %3 : vector<16x1xi32> to vector<16x100xi32>
    %5 = arith.cmpi eq, %4, %0 : vector<16x100xi32>
    %cst = arith.constant 1.000000e+00 : f32
    %cst_2 = arith.constant 0.000000e+00 : f32
    %6 = vector.broadcast %cst : f32 to vector<16x100xf32>
    %7 = vector.broadcast %cst_2 : f32 to vector<16x100xf32>
    %8 = arith.select %5, %6, %7 : vector<16x100xi1>, vector<16x100xf32>
    %c0_3 = arith.constant 0 : index
    %c0_4 = arith.constant 0 : index
    %c0_5 = arith.constant 0 : index
    %9 = vector.load %arg2[%c0_3, %c0_4, %c0_5] : memref<1x16x1xi32, #tpu.memory_space<vmem>>, vector<1x16x1xi32>
    %10 = vector.shape_cast %9 : vector<1x16x1xi32> to vector<16x1xi32>
    %11 = vector.broadcast %10 : vector<16x1xi32> to vector<16x2xi32>
    %12 = arith.cmpi eq, %11, %1 : vector<16x2xi32>
    %cst_6 = arith.constant 1.000000e+00 : f32
    %cst_7 = arith.constant 0.000000e+00 : f32
    %13 = vector.broadcast %cst_6 : f32 to vector<16x2xf32>
    %14 = vector.broadcast %cst_7 : f32 to vector<16x2xf32>
    %15 = arith.select %12, %13, %14 : vector<16x2xi1>, vector<16x2xf32>
    %c0_8 = arith.constant 0 : index
    %c0_9 = arith.constant 0 : index
    %c0_10 = arith.constant 0 : index
    %16 = vector.load %arg5[%c0_8, %c0_9, %c0_10] : memref<1x8x32xf32, #tpu.memory_space<vmem>>, vector<1x8x32xf32>
    %17 = vector.shape_cast %16 : vector<1x8x32xf32> to vector<8x32xf32>
    %18 = tpu.concatenate %17, %17 in 0 : vector<8x32xf32>, vector<8x32xf32> -> vector<16x32xf32>
    %c0_11 = arith.constant 0 : index
    %c0_12 = arith.constant 0 : index
    %c0_13 = arith.constant 0 : index
    %19 = vector.load %arg4[%c0_11, %c0_12, %c0_13] : memref<1x100x32xf32, #tpu.memory_space<vmem>>, vector<1x100x32xf32>
    %20 = vector.shape_cast %19 : vector<1x100x32xf32> to vector<100x32xf32>
    %cst_14 = arith.constant dense<0.000000e+00> : vector<16x32xf32>
    %21 = tpu.matmul %8, %20, %cst_14 {dimension_numbers = #tpu.dot_dimension_numbers<[1], [0], [0], [1], [0, 0, 1, 1], [], []>} : vector<16x100xf32>, vector<100x32xf32>, vector<16x32xf32> -> vector<16x32xf32>
    %c0_15 = arith.constant 0 : index
    %c0_16 = arith.constant 0 : index
    %c0_17 = arith.constant 0 : index
    %22 = vector.load %arg6[%c0_15, %c0_16, %c0_17] : memref<1x2x32xf32, #tpu.memory_space<vmem>>, vector<1x2x32xf32>
    %23 = vector.shape_cast %22 : vector<1x2x32xf32> to vector<2x32xf32>
    %cst_18 = arith.constant dense<0.000000e+00> : vector<16x32xf32>
    %24 = tpu.matmul %15, %23, %cst_18 {dimension_numbers = #tpu.dot_dimension_numbers<[1], [0], [0], [1], [0, 0, 1, 1], [], []>} : vector<16x2xf32>, vector<2x32xf32>, vector<16x32xf32> -> vector<16x32xf32>
    %25 = arith.addf %21, %24 : vector<16x32xf32>
    %26 = arith.addf %25, %18 : vector<16x32xf32>
    %c0_19 = arith.constant 0 : index
    %c0_20 = arith.constant 0 : index
    %c0_21 = arith.constant 0 : index
    %27 = vector.load %arg7[%c0_19, %c0_20, %c0_21] : memref<1x2x32xf32, #tpu.memory_space<vmem>>, vector<1x2x32xf32>
    %28 = vector.shape_cast %27 : vector<1x2x32xf32> to vector<2x32xf32>
    %29 = vector.extract_strided_slice %28 {offsets = [0, 0], sizes = [1, 32], strides = [1, 1]} : vector<2x32xf32> to vector<1x32xf32>
    %30 = vector.extract_strided_slice %28 {offsets = [1, 0], sizes = [1, 32], strides = [1, 1]} : vector<2x32xf32> to vector<1x32xf32>
    %cst_22 = arith.constant dense<0.000000e+00> : vector<16xf32>
    %31 = vector.multi_reduction <add>, %26, %cst_22 [1] : vector<16x32xf32> to vector<16xf32>
    %32 = vector.shape_cast %31 : vector<16xf32> to vector<16x1xf32>
    %cst_23 = arith.constant 3.200000e+01 : f32
    %33 = vector.broadcast %cst_23 : f32 to vector<16x1xf32>
    %34 = arith.divf %32, %33 : vector<16x1xf32>
    %35 = vector.broadcast %34 : vector<16x1xf32> to vector<16x32xf32>
    %36 = arith.subf %26, %35 : vector<16x32xf32>
    %37 = arith.mulf %36, %36 : vector<16x32xf32>
    %cst_24 = arith.constant dense<0.000000e+00> : vector<16xf32>
    %38 = vector.multi_reduction <add>, %37, %cst_24 [1] : vector<16x32xf32> to vector<16xf32>
    %39 = vector.shape_cast %38 : vector<16xf32> to vector<16x1xf32>
    %cst_25 = arith.constant 3.200000e+01 : f32
    %40 = vector.broadcast %cst_25 : f32 to vector<16x1xf32>
    %41 = arith.divf %39, %40 : vector<16x1xf32>
    %42 = vector.broadcast %34 : vector<16x1xf32> to vector<16x32xf32>
    %43 = arith.subf %26, %42 : vector<16x32xf32>
    %cst_26 = arith.constant 9.99999996E-13 : f32
    %44 = vector.broadcast %cst_26 : f32 to vector<16x1xf32>
    %45 = arith.addf %41, %44 : vector<16x1xf32>
    %46 = math.rsqrt %45 : vector<16x1xf32>
    %47 = vector.broadcast %46 : vector<16x1xf32> to vector<16x32xf32>
    %48 = arith.mulf %43, %47 : vector<16x32xf32>
    %49 = vector.broadcast %29 : vector<1x32xf32> to vector<16x32xf32>
    %50 = arith.mulf %48, %49 : vector<16x32xf32>
    %51 = vector.broadcast %30 : vector<1x32xf32> to vector<16x32xf32>
    %52 = arith.addf %50, %51 : vector<16x32xf32>
    %c0_27 = arith.constant 0 : index
    %c0_28 = arith.constant 0 : index
    %c0_29 = arith.constant 0 : index
    %53 = vector.load %arg3[%c0_27, %c0_28, %c0_29] : memref<1x2x8xi32, #tpu.memory_space<vmem>>, vector<1x2x8xi32>
    %54 = vector.shape_cast %53 : vector<1x2x8xi32> to vector<2x8xi32>
    %55 = arith.sitofp %54 : vector<2x8xi32> to vector<2x8xf32>
    %cst_30 = arith.constant 1.000000e+00 : f32
    %56 = vector.broadcast %cst_30 : f32 to vector<2x8xf32>
    %57 = arith.subf %56, %55 : vector<2x8xf32>
    %cst_31 = arith.constant -1.000000e+09 : f32
    %58 = vector.broadcast %cst_31 : f32 to vector<2x8xf32>
    %59 = arith.mulf %57, %58 : vector<2x8xf32>
    %60 = vector.shape_cast %59 : vector<2x8xf32> to vector<2x1x8xf32>
    %c0_32 = arith.constant 0 : index
    %c0_33 = arith.constant 0 : index
    %c0_34 = arith.constant 0 : index
    %c0_35 = arith.constant 0 : index
    %61 = vector.load %arg8[%c0_32, %c0_33, %c0_34, %c0_35] : memref<1x2x32x96xf32, #tpu.memory_space<vmem>>, vector<1x1x32x96xf32>
    %62 = vector.shape_cast %61 : vector<1x1x32x96xf32> to vector<32x96xf32>
    %cst_36 = arith.constant dense<0.000000e+00> : vector<16x96xf32>
    %63 = tpu.matmul %52, %62, %cst_36 {dimension_numbers = #tpu.dot_dimension_numbers<[1], [0], [0], [1], [0, 0, 1, 1], [], []>} : vector<16x32xf32>, vector<32x96xf32>, vector<16x96xf32> -> vector<16x96xf32>
    %c0_37 = arith.constant 0 : index
    %c0_38 = arith.constant 0 : index
    %c0_39 = arith.constant 0 : index
    %c0_40 = arith.constant 0 : index
    %64 = vector.load %arg9[%c0_37, %c0_38, %c0_39, %c0_40] : memref<1x2x1x96xf32, #tpu.memory_space<vmem>>, vector<1x1x1x96xf32>
    %65 = vector.shape_cast %64 : vector<1x1x1x96xf32> to vector<1x96xf32>
    %66 = vector.broadcast %65 : vector<1x96xf32> to vector<16x96xf32>
    %67 = arith.addf %63, %66 : vector<16x96xf32>
    %68 = vector.extract_strided_slice %67 {offsets = [0, 0], sizes = [16, 8], strides = [1, 1]} : vector<16x96xf32> to vector<16x8xf32>
    %69 = vector.shape_cast %68 : vector<16x8xf32> to vector<2x8x8xf32>
    %70 = vector.extract_strided_slice %67 {offsets = [0, 32], sizes = [16, 8], strides = [1, 1]} : vector<16x96xf32> to vector<16x8xf32>
    %71 = vector.shape_cast %70 : vector<16x8xf32> to vector<2x8x8xf32>
    %72 = vector.extract_strided_slice %67 {offsets = [0, 64], sizes = [16, 8], strides = [1, 1]} : vector<16x96xf32> to vector<16x8xf32>
    %73 = vector.shape_cast %72 : vector<16x8xf32> to vector<2x8x8xf32>
    "tpu.trace_start"() <{level = 10 : i32, message = "bqd,bkd->bqk"}> : () -> ()
    %cst_41 = arith.constant dense<0.000000e+00> : vector<2x8x8xf32>
    %74 = tpu.matmul %69, %71, %cst_41 {dimension_numbers = #tpu.dot_dimension_numbers<[2], [2], [1], [1], [0, 0, 0, 1, 1, 1], [0], [0]>} : vector<2x8x8xf32>, vector<2x8x8xf32>, vector<2x8x8xf32> -> vector<2x8x8xf32>
    "tpu.trace_stop"() : () -> ()
    %cst_42 = arith.constant 0.353553385 : f32
    %75 = vector.broadcast %cst_42 : f32 to vector<2x8x8xf32>
    %76 = arith.mulf %74, %75 : vector<2x8x8xf32>
    %77 = vector.broadcast %60 : vector<2x1x8xf32> to vector<2x8x8xf32>
    %78 = arith.addf %76, %77 : vector<2x8x8xf32>
    %cst_43 = arith.constant dense<0xFF800000> : vector<2x8xf32>
    %79 = vector.multi_reduction <maximumf>, %78, %cst_43 [2] : vector<2x8x8xf32> to vector<2x8xf32>
    %80 = vector.shape_cast %79 : vector<2x8xf32> to vector<2x8x1xf32>
    %81 = vector.broadcast %80 : vector<2x8x1xf32> to vector<2x8x8xf32>
    %82 = arith.subf %78, %81 : vector<2x8x8xf32>
    %83 = math.exp %82 : vector<2x8x8xf32>
    %cst_44 = arith.constant dense<0.000000e+00> : vector<2x8xf32>
    %84 = vector.multi_reduction <add>, %83, %cst_44 [2] : vector<2x8x8xf32> to vector<2x8xf32>
    %85 = vector.shape_cast %84 : vector<2x8xf32> to vector<2x8x1xf32>
    %86 = tpu.reciprocal %85 {approx = true} : vector<2x8x1xf32> -> vector<2x8x1xf32>
    %87 = vector.broadcast %86 : vector<2x8x1xf32> to vector<2x8x8xf32>
    %88 = arith.mulf %83, %87 : vector<2x8x8xf32>
    "tpu.trace_start"() <{level = 10 : i32, message = "bqk,bkd->bqd"}> : () -> ()
    %cst_45 = arith.constant dense<0.000000e+00> : vector<2x8x8xf32>
    %89 = tpu.matmul %88, %73, %cst_45 {dimension_numbers = #tpu.dot_dimension_numbers<[2], [1], [1], [2], [0, 0, 0, 1, 1, 2], [0], [0]>} : vector<2x8x8xf32>, vector<2x8x8xf32>, vector<2x8x8xf32> -> vector<2x8x8xf32>
    "tpu.trace_stop"() : () -> ()
    %90 = vector.extract_strided_slice %67 {offsets = [0, 8], sizes = [16, 8], strides = [1, 1]} : vector<16x96xf32> to vector<16x8xf32>
    %91 = vector.shape_cast %90 : vector<16x8xf32> to vector<2x8x8xf32>
    %92 = vector.extract_strided_slice %67 {offsets = [0, 40], sizes = [16, 8], strides = [1, 1]} : vector<16x96xf32> to vector<16x8xf32>
    %93 = vector.shape_cast %92 : vector<16x8xf32> to vector<2x8x8xf32>
    %94 = vector.extract_strided_slice %67 {offsets = [0, 72], sizes = [16, 8], strides = [1, 1]} : vector<16x96xf32> to vector<16x8xf32>
    %95 = vector.shape_cast %94 : vector<16x8xf32> to vector<2x8x8xf32>
    "tpu.trace_start"() <{level = 10 : i32, message = "bqd,bkd->bqk"}> : () -> ()
    %cst_46 = arith.constant dense<0.000000e+00> : vector<2x8x8xf32>
    %96 = tpu.matmul %91, %93, %cst_46 {dimension_numbers = #tpu.dot_dimension_numbers<[2], [2], [1], [1], [0, 0, 0, 1, 1, 1], [0], [0]>} : vector<2x8x8xf32>, vector<2x8x8xf32>, vector<2x8x8xf32> -> vector<2x8x8xf32>
    "tpu.trace_stop"() : () -> ()
    %cst_47 = arith.constant 0.353553385 : f32
    %97 = vector.broadcast %cst_47 : f32 to vector<2x8x8xf32>
    %98 = arith.mulf %96, %97 : vector<2x8x8xf32>
    %99 = vector.broadcast %60 : vector<2x1x8xf32> to vector<2x8x8xf32>
    %100 = arith.addf %98, %99 : vector<2x8x8xf32>
    %cst_48 = arith.constant dense<0xFF800000> : vector<2x8xf32>
    %101 = vector.multi_reduction <maximumf>, %100, %cst_48 [2] : vector<2x8x8xf32> to vector<2x8xf32>
    %102 = vector.shape_cast %101 : vector<2x8xf32> to vector<2x8x1xf32>
    %103 = vector.broadcast %102 : vector<2x8x1xf32> to vector<2x8x8xf32>
    %104 = arith.subf %100, %103 : vector<2x8x8xf32>
    %105 = math.exp %104 : vector<2x8x8xf32>
    %cst_49 = arith.constant dense<0.000000e+00> : vector<2x8xf32>
    %106 = vector.multi_reduction <add>, %105, %cst_49 [2] : vector<2x8x8xf32> to vector<2x8xf32>
    %107 = vector.shape_cast %106 : vector<2x8xf32> to vector<2x8x1xf32>
    %108 = tpu.reciprocal %107 {approx = true} : vector<2x8x1xf32> -> vector<2x8x1xf32>
    %109 = vector.broadcast %108 : vector<2x8x1xf32> to vector<2x8x8xf32>
    %110 = arith.mulf %105, %109 : vector<2x8x8xf32>
    "tpu.trace_start"() <{level = 10 : i32, message = "bqk,bkd->bqd"}> : () -> ()
    %cst_50 = arith.constant dense<0.000000e+00> : vector<2x8x8xf32>
    %111 = tpu.matmul %110, %95, %cst_50 {dimension_numbers = #tpu.dot_dimension_numbers<[2], [1], [1], [2], [0, 0, 0, 1, 1, 2], [0], [0]>} : vector<2x8x8xf32>, vector<2x8x8xf32>, vector<2x8x8xf32> -> vector<2x8x8xf32>
    "tpu.trace_stop"() : () -> ()
    %112 = vector.extract_strided_slice %67 {offsets = [0, 16], sizes = [16, 8], strides = [1, 1]} : vector<16x96xf32> to vector<16x8xf32>
    %113 = vector.shape_cast %112 : vector<16x8xf32> to vector<2x8x8xf32>
    %114 = vector.extract_strided_slice %67 {offsets = [0, 48], sizes = [16, 8], strides = [1, 1]} : vector<16x96xf32> to vector<16x8xf32>
    %115 = vector.shape_cast %114 : vector<16x8xf32> to vector<2x8x8xf32>
    %116 = vector.extract_strided_slice %67 {offsets = [0, 80], sizes = [16, 8], strides = [1, 1]} : vector<16x96xf32> to vector<16x8xf32>
    %117 = vector.shape_cast %116 : vector<16x8xf32> to vector<2x8x8xf32>
    "tpu.trace_start"() <{level = 10 : i32, message = "bqd,bkd->bqk"}> : () -> ()
    %cst_51 = arith.constant dense<0.000000e+00> : vector<2x8x8xf32>
    %118 = tpu.matmul %113, %115, %cst_51 {dimension_numbers = #tpu.dot_dimension_numbers<[2], [2], [1], [1], [0, 0, 0, 1, 1, 1], [0], [0]>} : vector<2x8x8xf32>, vector<2x8x8xf32>, vector<2x8x8xf32> -> vector<2x8x8xf32>
    "tpu.trace_stop"() : () -> ()
    %cst_52 = arith.constant 0.353553385 : f32
    %119 = vector.broadcast %cst_52 : f32 to vector<2x8x8xf32>
    %120 = arith.mulf %118, %119 : vector<2x8x8xf32>
    %121 = vector.broadcast %60 : vector<2x1x8xf32> to vector<2x8x8xf32>
    %122 = arith.addf %120, %121 : vector<2x8x8xf32>
    %cst_53 = arith.constant dense<0xFF800000> : vector<2x8xf32>
    %123 = vector.multi_reduction <maximumf>, %122, %cst_53 [2] : vector<2x8x8xf32> to vector<2x8xf32>
    %124 = vector.shape_cast %123 : vector<2x8xf32> to vector<2x8x1xf32>
    %125 = vector.broadcast %124 : vector<2x8x1xf32> to vector<2x8x8xf32>
    %126 = arith.subf %122, %125 : vector<2x8x8xf32>
    %127 = math.exp %126 : vector<2x8x8xf32>
    %cst_54 = arith.constant dense<0.000000e+00> : vector<2x8xf32>
    %128 = vector.multi_reduction <add>, %127, %cst_54 [2] : vector<2x8x8xf32> to vector<2x8xf32>
    %129 = vector.shape_cast %128 : vector<2x8xf32> to vector<2x8x1xf32>
    %130 = tpu.reciprocal %129 {approx = true} : vector<2x8x1xf32> -> vector<2x8x1xf32>
    %131 = vector.broadcast %130 : vector<2x8x1xf32> to vector<2x8x8xf32>
    %132 = arith.mulf %127, %131 : vector<2x8x8xf32>
    "tpu.trace_start"() <{level = 10 : i32, message = "bqk,bkd->bqd"}> : () -> ()
    %cst_55 = arith.constant dense<0.000000e+00> : vector<2x8x8xf32>
    %133 = tpu.matmul %132, %117, %cst_55 {dimension_numbers = #tpu.dot_dimension_numbers<[2], [1], [1], [2], [0, 0, 0, 1, 1, 2], [0], [0]>} : vector<2x8x8xf32>, vector<2x8x8xf32>, vector<2x8x8xf32> -> vector<2x8x8xf32>
    "tpu.trace_stop"() : () -> ()
    %134 = vector.extract_strided_slice %67 {offsets = [0, 24], sizes = [16, 8], strides = [1, 1]} : vector<16x96xf32> to vector<16x8xf32>
    %135 = vector.shape_cast %134 : vector<16x8xf32> to vector<2x8x8xf32>
    %136 = vector.extract_strided_slice %67 {offsets = [0, 56], sizes = [16, 8], strides = [1, 1]} : vector<16x96xf32> to vector<16x8xf32>
    %137 = vector.shape_cast %136 : vector<16x8xf32> to vector<2x8x8xf32>
    %138 = vector.extract_strided_slice %67 {offsets = [0, 88], sizes = [16, 8], strides = [1, 1]} : vector<16x96xf32> to vector<16x8xf32>
    %139 = vector.shape_cast %138 : vector<16x8xf32> to vector<2x8x8xf32>
    "tpu.trace_start"() <{level = 10 : i32, message = "bqd,bkd->bqk"}> : () -> ()
    %cst_56 = arith.constant dense<0.000000e+00> : vector<2x8x8xf32>
    %140 = tpu.matmul %135, %137, %cst_56 {dimension_numbers = #tpu.dot_dimension_numbers<[2], [2], [1], [1], [0, 0, 0, 1, 1, 1], [0], [0]>} : vector<2x8x8xf32>, vector<2x8x8xf32>, vector<2x8x8xf32> -> vector<2x8x8xf32>
    "tpu.trace_stop"() : () -> ()
    %cst_57 = arith.constant 0.353553385 : f32
    %141 = vector.broadcast %cst_57 : f32 to vector<2x8x8xf32>
    %142 = arith.mulf %140, %141 : vector<2x8x8xf32>
    %143 = vector.broadcast %60 : vector<2x1x8xf32> to vector<2x8x8xf32>
    %144 = arith.addf %142, %143 : vector<2x8x8xf32>
    %cst_58 = arith.constant dense<0xFF800000> : vector<2x8xf32>
    %145 = vector.multi_reduction <maximumf>, %144, %cst_58 [2] : vector<2x8x8xf32> to vector<2x8xf32>
    %146 = vector.shape_cast %145 : vector<2x8xf32> to vector<2x8x1xf32>
    %147 = vector.broadcast %146 : vector<2x8x1xf32> to vector<2x8x8xf32>
    %148 = arith.subf %144, %147 : vector<2x8x8xf32>
    %149 = math.exp %148 : vector<2x8x8xf32>
    %cst_59 = arith.constant dense<0.000000e+00> : vector<2x8xf32>
    %150 = vector.multi_reduction <add>, %149, %cst_59 [2] : vector<2x8x8xf32> to vector<2x8xf32>
    %151 = vector.shape_cast %150 : vector<2x8xf32> to vector<2x8x1xf32>
    %152 = tpu.reciprocal %151 {approx = true} : vector<2x8x1xf32> -> vector<2x8x1xf32>
    %153 = vector.broadcast %152 : vector<2x8x1xf32> to vector<2x8x8xf32>
    %154 = arith.mulf %149, %153 : vector<2x8x8xf32>
    "tpu.trace_start"() <{level = 10 : i32, message = "bqk,bkd->bqd"}> : () -> ()
    %cst_60 = arith.constant dense<0.000000e+00> : vector<2x8x8xf32>
    %155 = tpu.matmul %154, %139, %cst_60 {dimension_numbers = #tpu.dot_dimension_numbers<[2], [1], [1], [2], [0, 0, 0, 1, 1, 2], [0], [0]>} : vector<2x8x8xf32>, vector<2x8x8xf32>, vector<2x8x8xf32> -> vector<2x8x8xf32>
    "tpu.trace_stop"() : () -> ()
    %156 = tpu.concatenate %89, %111, %133, %155 in 2 : vector<2x8x8xf32>, vector<2x8x8xf32>, vector<2x8x8xf32>, vector<2x8x8xf32> -> vector<2x8x32xf32>
    %157 = vector.shape_cast %156 : vector<2x8x32xf32> to vector<16x32xf32>
    %c0_61 = arith.constant 0 : index
    %c0_62 = arith.constant 0 : index
    %c0_63 = arith.constant 0 : index
    %c0_64 = arith.constant 0 : index
    %158 = vector.load %arg10[%c0_61, %c0_62, %c0_63, %c0_64] : memref<1x2x32x32xf32, #tpu.memory_space<vmem>>, vector<1x1x32x32xf32>
    %159 = vector.shape_cast %158 : vector<1x1x32x32xf32> to vector<32x32xf32>
    %cst_65 = arith.constant dense<0.000000e+00> : vector<16x32xf32>
    %160 = tpu.matmul %157, %159, %cst_65 {dimension_numbers = #tpu.dot_dimension_numbers<[1], [0], [0], [1], [0, 0, 1, 1], [], []>} : vector<16x32xf32>, vector<32x32xf32>, vector<16x32xf32> -> vector<16x32xf32>
    %c0_66 = arith.constant 0 : index
    %c0_67 = arith.constant 0 : index
    %c0_68 = arith.constant 0 : index
    %c0_69 = arith.constant 0 : index
    %161 = vector.load %arg11[%c0_66, %c0_67, %c0_68, %c0_69] : memref<1x2x1x32xf32, #tpu.memory_space<vmem>>, vector<1x1x1x32xf32>
    %162 = vector.shape_cast %161 : vector<1x1x1x32xf32> to vector<1x32xf32>
    %163 = vector.broadcast %162 : vector<1x32xf32> to vector<16x32xf32>
    %164 = arith.addf %160, %163 : vector<16x32xf32>
    %165 = arith.addf %52, %164 : vector<16x32xf32>
    %c0_70 = arith.constant 0 : index
    %c0_71 = arith.constant 0 : index
    %c0_72 = arith.constant 0 : index
    %c0_73 = arith.constant 0 : index
    %166 = vector.load %arg12[%c0_70, %c0_71, %c0_72, %c0_73] : memref<1x2x2x32xf32, #tpu.memory_space<vmem>>, vector<1x1x2x32xf32>
    %167 = vector.shape_cast %166 : vector<1x1x2x32xf32> to vector<2x32xf32>
    %168 = vector.extract_strided_slice %167 {offsets = [0, 0], sizes = [1, 32], strides = [1, 1]} : vector<2x32xf32> to vector<1x32xf32>
    %169 = vector.extract_strided_slice %167 {offsets = [1, 0], sizes = [1, 32], strides = [1, 1]} : vector<2x32xf32> to vector<1x32xf32>
    %cst_74 = arith.constant dense<0.000000e+00> : vector<16xf32>
    %170 = vector.multi_reduction <add>, %165, %cst_74 [1] : vector<16x32xf32> to vector<16xf32>
    %171 = vector.shape_cast %170 : vector<16xf32> to vector<16x1xf32>
    %cst_75 = arith.constant 3.200000e+01 : f32
    %172 = vector.broadcast %cst_75 : f32 to vector<16x1xf32>
    %173 = arith.divf %171, %172 : vector<16x1xf32>
    %174 = vector.broadcast %173 : vector<16x1xf32> to vector<16x32xf32>
    %175 = arith.subf %165, %174 : vector<16x32xf32>
    %176 = arith.mulf %175, %175 : vector<16x32xf32>
    %cst_76 = arith.constant dense<0.000000e+00> : vector<16xf32>
    %177 = vector.multi_reduction <add>, %176, %cst_76 [1] : vector<16x32xf32> to vector<16xf32>
    %178 = vector.shape_cast %177 : vector<16xf32> to vector<16x1xf32>
    %cst_77 = arith.constant 3.200000e+01 : f32
    %179 = vector.broadcast %cst_77 : f32 to vector<16x1xf32>
    %180 = arith.divf %178, %179 : vector<16x1xf32>
    %181 = vector.broadcast %173 : vector<16x1xf32> to vector<16x32xf32>
    %182 = arith.subf %165, %181 : vector<16x32xf32>
    %cst_78 = arith.constant 9.99999996E-13 : f32
    %183 = vector.broadcast %cst_78 : f32 to vector<16x1xf32>
    %184 = arith.addf %180, %183 : vector<16x1xf32>
    %185 = math.rsqrt %184 : vector<16x1xf32>
    %186 = vector.broadcast %185 : vector<16x1xf32> to vector<16x32xf32>
    %187 = arith.mulf %182, %186 : vector<16x32xf32>
    %188 = vector.broadcast %168 : vector<1x32xf32> to vector<16x32xf32>
    %189 = arith.mulf %187, %188 : vector<16x32xf32>
    %190 = vector.broadcast %169 : vector<1x32xf32> to vector<16x32xf32>
    %191 = arith.addf %189, %190 : vector<16x32xf32>
    %c0_79 = arith.constant 0 : index
    %c0_80 = arith.constant 0 : index
    %c0_81 = arith.constant 0 : index
    %c0_82 = arith.constant 0 : index
    %192 = vector.load %arg13[%c0_79, %c0_80, %c0_81, %c0_82] : memref<1x2x32x64xf32, #tpu.memory_space<vmem>>, vector<1x1x32x64xf32>
    %193 = vector.shape_cast %192 : vector<1x1x32x64xf32> to vector<32x64xf32>
    %cst_83 = arith.constant dense<0.000000e+00> : vector<16x64xf32>
    %194 = tpu.matmul %191, %193, %cst_83 {dimension_numbers = #tpu.dot_dimension_numbers<[1], [0], [0], [1], [0, 0, 1, 1], [], []>} : vector<16x32xf32>, vector<32x64xf32>, vector<16x64xf32> -> vector<16x64xf32>
    %c0_84 = arith.constant 0 : index
    %c0_85 = arith.constant 0 : index
    %c0_86 = arith.constant 0 : index
    %c0_87 = arith.constant 0 : index
    %195 = vector.load %arg14[%c0_84, %c0_85, %c0_86, %c0_87] : memref<1x2x1x64xf32, #tpu.memory_space<vmem>>, vector<1x1x1x64xf32>
    %196 = vector.shape_cast %195 : vector<1x1x1x64xf32> to vector<1x64xf32>
    %197 = vector.broadcast %196 : vector<1x64xf32> to vector<16x64xf32>
    %198 = arith.addf %194, %197 : vector<16x64xf32>
    %cst_88 = arith.constant 5.000000e-01 : f32
    %199 = vector.broadcast %cst_88 : f32 to vector<16x64xf32>
    %200 = arith.mulf %199, %198 : vector<16x64xf32>
    %cst_89 = arith.constant 4.471500e-02 : f32
    %201 = vector.broadcast %cst_89 : f32 to vector<16x64xf32>
    %202 = arith.mulf %201, %198 : vector<16x64xf32>
    %203 = arith.mulf %202, %198 : vector<16x64xf32>
    %204 = arith.mulf %203, %198 : vector<16x64xf32>
    %205 = arith.addf %198, %204 : vector<16x64xf32>
    %cst_90 = arith.constant 0.797884583 : f32
    %206 = vector.broadcast %cst_90 : f32 to vector<16x64xf32>
    %207 = arith.mulf %206, %205 : vector<16x64xf32>
    %208 = math.tanh %207 : vector<16x64xf32>
    %cst_91 = arith.constant 1.000000e+00 : f32
    %209 = vector.broadcast %cst_91 : f32 to vector<16x64xf32>
    %210 = arith.addf %209, %208 : vector<16x64xf32>
    %211 = arith.mulf %200, %210 : vector<16x64xf32>
    %c0_92 = arith.constant 0 : index
    %c0_93 = arith.constant 0 : index
    %c0_94 = arith.constant 0 : index
    %c0_95 = arith.constant 0 : index
    %212 = vector.load %arg15[%c0_92, %c0_93, %c0_94, %c0_95] : memref<1x2x64x32xf32, #tpu.memory_space<vmem>>, vector<1x1x64x32xf32>
    %213 = vector.shape_cast %212 : vector<1x1x64x32xf32> to vector<64x32xf32>
    %cst_96 = arith.constant dense<0.000000e+00> : vector<16x32xf32>
    %214 = tpu.matmul %211, %213, %cst_96 {dimension_numbers = #tpu.dot_dimension_numbers<[1], [0], [0], [1], [0, 0, 1, 1], [], []>} : vector<16x64xf32>, vector<64x32xf32>, vector<16x32xf32> -> vector<16x32xf32>
    %c0_97 = arith.constant 0 : index
    %c0_98 = arith.constant 0 : index
    %c0_99 = arith.constant 0 : index
    %c0_100 = arith.constant 0 : index
    %215 = vector.load %arg16[%c0_97, %c0_98, %c0_99, %c0_100] : memref<1x2x1x32xf32, #tpu.memory_space<vmem>>, vector<1x1x1x32xf32>
    %216 = vector.shape_cast %215 : vector<1x1x1x32xf32> to vector<1x32xf32>
    %217 = vector.broadcast %216 : vector<1x32xf32> to vector<16x32xf32>
    %218 = arith.addf %214, %217 : vector<16x32xf32>
    %219 = arith.addf %191, %218 : vector<16x32xf32>
    %c0_101 = arith.constant 0 : index
    %c0_102 = arith.constant 0 : index
    %c0_103 = arith.constant 0 : index
    %c0_104 = arith.constant 0 : index
    %220 = vector.load %arg17[%c0_101, %c0_102, %c0_103, %c0_104] : memref<1x2x2x32xf32, #tpu.memory_space<vmem>>, vector<1x1x2x32xf32>
    %221 = vector.shape_cast %220 : vector<1x1x2x32xf32> to vector<2x32xf32>
    %222 = vector.extract_strided_slice %221 {offsets = [0, 0], sizes = [1, 32], strides = [1, 1]} : vector<2x32xf32> to vector<1x32xf32>
    %223 = vector.extract_strided_slice %221 {offsets = [1, 0], sizes = [1, 32], strides = [1, 1]} : vector<2x32xf32> to vector<1x32xf32>
    %cst_105 = arith.constant dense<0.000000e+00> : vector<16xf32>
    %224 = vector.multi_reduction <add>, %219, %cst_105 [1] : vector<16x32xf32> to vector<16xf32>
    %225 = vector.shape_cast %224 : vector<16xf32> to vector<16x1xf32>
    %cst_106 = arith.constant 3.200000e+01 : f32
    %226 = vector.broadcast %cst_106 : f32 to vector<16x1xf32>
    %227 = arith.divf %225, %226 : vector<16x1xf32>
    %228 = vector.broadcast %227 : vector<16x1xf32> to vector<16x32xf32>
    %229 = arith.subf %219, %228 : vector<16x32xf32>
    %230 = arith.mulf %229, %229 : vector<16x32xf32>
    %cst_107 = arith.constant dense<0.000000e+00> : vector<16xf32>
    %231 = vector.multi_reduction <add>, %230, %cst_107 [1] : vector<16x32xf32> to vector<16xf32>
    %232 = vector.shape_cast %231 : vector<16xf32> to vector<16x1xf32>
    %cst_108 = arith.constant 3.200000e+01 : f32
    %233 = vector.broadcast %cst_108 : f32 to vector<16x1xf32>
    %234 = arith.divf %232, %233 : vector<16x1xf32>
    %235 = vector.broadcast %227 : vector<16x1xf32> to vector<16x32xf32>
    %236 = arith.subf %219, %235 : vector<16x32xf32>
    %cst_109 = arith.constant 9.99999996E-13 : f32
    %237 = vector.broadcast %cst_109 : f32 to vector<16x1xf32>
    %238 = arith.addf %234, %237 : vector<16x1xf32>
    %239 = math.rsqrt %238 : vector<16x1xf32>
    %240 = vector.broadcast %239 : vector<16x1xf32> to vector<16x32xf32>
    %241 = arith.mulf %236, %240 : vector<16x32xf32>
    %242 = vector.broadcast %222 : vector<1x32xf32> to vector<16x32xf32>
    %243 = arith.mulf %241, %242 : vector<16x32xf32>
    %244 = vector.broadcast %223 : vector<1x32xf32> to vector<16x32xf32>
    %245 = arith.addf %243, %244 : vector<16x32xf32>
    %c0_110 = arith.constant 0 : index
    %c1 = arith.constant 1 : index
    %c0_111 = arith.constant 0 : index
    %c0_112 = arith.constant 0 : index
    %246 = vector.load %arg8[%c0_110, %c1, %c0_111, %c0_112] : memref<1x2x32x96xf32, #tpu.memory_space<vmem>>, vector<1x1x32x96xf32>
    %247 = vector.shape_cast %246 : vector<1x1x32x96xf32> to vector<32x96xf32>
    %cst_113 = arith.constant dense<0.000000e+00> : vector<16x96xf32>
    %248 = tpu.matmul %245, %247, %cst_113 {dimension_numbers = #tpu.dot_dimension_numbers<[1], [0], [0], [1], [0, 0, 1, 1], [], []>} : vector<16x32xf32>, vector<32x96xf32>, vector<16x96xf32> -> vector<16x96xf32>
    %c0_114 = arith.constant 0 : index
    %c1_115 = arith.constant 1 : index
    %c0_116 = arith.constant 0 : index
    %c0_117 = arith.constant 0 : index
    %249 = vector.load %arg9[%c0_114, %c1_115, %c0_116, %c0_117] : memref<1x2x1x96xf32, #tpu.memory_space<vmem>>, vector<1x1x1x96xf32>
    %250 = vector.shape_cast %249 : vector<1x1x1x96xf32> to vector<1x96xf32>
    %251 = vector.broadcast %250 : vector<1x96xf32> to vector<16x96xf32>
    %252 = arith.addf %248, %251 : vector<16x96xf32>
    %253 = vector.extract_strided_slice %252 {offsets = [0, 0], sizes = [16, 8], strides = [1, 1]} : vector<16x96xf32> to vector<16x8xf32>
    %254 = vector.shape_cast %253 : vector<16x8xf32> to vector<2x8x8xf32>
    %255 = vector.extract_strided_slice %252 {offsets = [0, 32], sizes = [16, 8], strides = [1, 1]} : vector<16x96xf32> to vector<16x8xf32>
    %256 = vector.shape_cast %255 : vector<16x8xf32> to vector<2x8x8xf32>
    %257 = vector.extract_strided_slice %252 {offsets = [0, 64], sizes = [16, 8], strides = [1, 1]} : vector<16x96xf32> to vector<16x8xf32>
    %258 = vector.shape_cast %257 : vector<16x8xf32> to vector<2x8x8xf32>
    "tpu.trace_start"() <{level = 10 : i32, message = "bqd,bkd->bqk"}> : () -> ()
    %cst_118 = arith.constant dense<0.000000e+00> : vector<2x8x8xf32>
    %259 = tpu.matmul %254, %256, %cst_118 {dimension_numbers = #tpu.dot_dimension_numbers<[2], [2], [1], [1], [0, 0, 0, 1, 1, 1], [0], [0]>} : vector<2x8x8xf32>, vector<2x8x8xf32>, vector<2x8x8xf32> -> vector<2x8x8xf32>
    "tpu.trace_stop"() : () -> ()
    %cst_119 = arith.constant 0.353553385 : f32
    %260 = vector.broadcast %cst_119 : f32 to vector<2x8x8xf32>
    %261 = arith.mulf %259, %260 : vector<2x8x8xf32>
    %262 = vector.broadcast %60 : vector<2x1x8xf32> to vector<2x8x8xf32>
    %263 = arith.addf %261, %262 : vector<2x8x8xf32>
    %cst_120 = arith.constant dense<0xFF800000> : vector<2x8xf32>
    %264 = vector.multi_reduction <maximumf>, %263, %cst_120 [2] : vector<2x8x8xf32> to vector<2x8xf32>
    %265 = vector.shape_cast %264 : vector<2x8xf32> to vector<2x8x1xf32>
    %266 = vector.broadcast %265 : vector<2x8x1xf32> to vector<2x8x8xf32>
    %267 = arith.subf %263, %266 : vector<2x8x8xf32>
    %268 = math.exp %267 : vector<2x8x8xf32>
    %cst_121 = arith.constant dense<0.000000e+00> : vector<2x8xf32>
    %269 = vector.multi_reduction <add>, %268, %cst_121 [2] : vector<2x8x8xf32> to vector<2x8xf32>
    %270 = vector.shape_cast %269 : vector<2x8xf32> to vector<2x8x1xf32>
    %271 = tpu.reciprocal %270 {approx = true} : vector<2x8x1xf32> -> vector<2x8x1xf32>
    %272 = vector.broadcast %271 : vector<2x8x1xf32> to vector<2x8x8xf32>
    %273 = arith.mulf %268, %272 : vector<2x8x8xf32>
    "tpu.trace_start"() <{level = 10 : i32, message = "bqk,bkd->bqd"}> : () -> ()
    %cst_122 = arith.constant dense<0.000000e+00> : vector<2x8x8xf32>
    %274 = tpu.matmul %273, %258, %cst_122 {dimension_numbers = #tpu.dot_dimension_numbers<[2], [1], [1], [2], [0, 0, 0, 1, 1, 2], [0], [0]>} : vector<2x8x8xf32>, vector<2x8x8xf32>, vector<2x8x8xf32> -> vector<2x8x8xf32>
    "tpu.trace_stop"() : () -> ()
    %275 = vector.extract_strided_slice %252 {offsets = [0, 8], sizes = [16, 8], strides = [1, 1]} : vector<16x96xf32> to vector<16x8xf32>
    %276 = vector.shape_cast %275 : vector<16x8xf32> to vector<2x8x8xf32>
    %277 = vector.extract_strided_slice %252 {offsets = [0, 40], sizes = [16, 8], strides = [1, 1]} : vector<16x96xf32> to vector<16x8xf32>
    %278 = vector.shape_cast %277 : vector<16x8xf32> to vector<2x8x8xf32>
    %279 = vector.extract_strided_slice %252 {offsets = [0, 72], sizes = [16, 8], strides = [1, 1]} : vector<16x96xf32> to vector<16x8xf32>
    %280 = vector.shape_cast %279 : vector<16x8xf32> to vector<2x8x8xf32>
    "tpu.trace_start"() <{level = 10 : i32, message = "bqd,bkd->bqk"}> : () -> ()
    %cst_123 = arith.constant dense<0.000000e+00> : vector<2x8x8xf32>
    %281 = tpu.matmul %276, %278, %cst_123 {dimension_numbers = #tpu.dot_dimension_numbers<[2], [2], [1], [1], [0, 0, 0, 1, 1, 1], [0], [0]>} : vector<2x8x8xf32>, vector<2x8x8xf32>, vector<2x8x8xf32> -> vector<2x8x8xf32>
    "tpu.trace_stop"() : () -> ()
    %cst_124 = arith.constant 0.353553385 : f32
    %282 = vector.broadcast %cst_124 : f32 to vector<2x8x8xf32>
    %283 = arith.mulf %281, %282 : vector<2x8x8xf32>
    %284 = vector.broadcast %60 : vector<2x1x8xf32> to vector<2x8x8xf32>
    %285 = arith.addf %283, %284 : vector<2x8x8xf32>
    %cst_125 = arith.constant dense<0xFF800000> : vector<2x8xf32>
    %286 = vector.multi_reduction <maximumf>, %285, %cst_125 [2] : vector<2x8x8xf32> to vector<2x8xf32>
    %287 = vector.shape_cast %286 : vector<2x8xf32> to vector<2x8x1xf32>
    %288 = vector.broadcast %287 : vector<2x8x1xf32> to vector<2x8x8xf32>
    %289 = arith.subf %285, %288 : vector<2x8x8xf32>
    %290 = math.exp %289 : vector<2x8x8xf32>
    %cst_126 = arith.constant dense<0.000000e+00> : vector<2x8xf32>
    %291 = vector.multi_reduction <add>, %290, %cst_126 [2] : vector<2x8x8xf32> to vector<2x8xf32>
    %292 = vector.shape_cast %291 : vector<2x8xf32> to vector<2x8x1xf32>
    %293 = tpu.reciprocal %292 {approx = true} : vector<2x8x1xf32> -> vector<2x8x1xf32>
    %294 = vector.broadcast %293 : vector<2x8x1xf32> to vector<2x8x8xf32>
    %295 = arith.mulf %290, %294 : vector<2x8x8xf32>
    "tpu.trace_start"() <{level = 10 : i32, message = "bqk,bkd->bqd"}> : () -> ()
    %cst_127 = arith.constant dense<0.000000e+00> : vector<2x8x8xf32>
    %296 = tpu.matmul %295, %280, %cst_127 {dimension_numbers = #tpu.dot_dimension_numbers<[2], [1], [1], [2], [0, 0, 0, 1, 1, 2], [0], [0]>} : vector<2x8x8xf32>, vector<2x8x8xf32>, vector<2x8x8xf32> -> vector<2x8x8xf32>
    "tpu.trace_stop"() : () -> ()
    %297 = vector.extract_strided_slice %252 {offsets = [0, 16], sizes = [16, 8], strides = [1, 1]} : vector<16x96xf32> to vector<16x8xf32>
    %298 = vector.shape_cast %297 : vector<16x8xf32> to vector<2x8x8xf32>
    %299 = vector.extract_strided_slice %252 {offsets = [0, 48], sizes = [16, 8], strides = [1, 1]} : vector<16x96xf32> to vector<16x8xf32>
    %300 = vector.shape_cast %299 : vector<16x8xf32> to vector<2x8x8xf32>
    %301 = vector.extract_strided_slice %252 {offsets = [0, 80], sizes = [16, 8], strides = [1, 1]} : vector<16x96xf32> to vector<16x8xf32>
    %302 = vector.shape_cast %301 : vector<16x8xf32> to vector<2x8x8xf32>
    "tpu.trace_start"() <{level = 10 : i32, message = "bqd,bkd->bqk"}> : () -> ()
    %cst_128 = arith.constant dense<0.000000e+00> : vector<2x8x8xf32>
    %303 = tpu.matmul %298, %300, %cst_128 {dimension_numbers = #tpu.dot_dimension_numbers<[2], [2], [1], [1], [0, 0, 0, 1, 1, 1], [0], [0]>} : vector<2x8x8xf32>, vector<2x8x8xf32>, vector<2x8x8xf32> -> vector<2x8x8xf32>
    "tpu.trace_stop"() : () -> ()
    %cst_129 = arith.constant 0.353553385 : f32
    %304 = vector.broadcast %cst_129 : f32 to vector<2x8x8xf32>
    %305 = arith.mulf %303, %304 : vector<2x8x8xf32>
    %306 = vector.broadcast %60 : vector<2x1x8xf32> to vector<2x8x8xf32>
    %307 = arith.addf %305, %306 : vector<2x8x8xf32>
    %cst_130 = arith.constant dense<0xFF800000> : vector<2x8xf32>
    %308 = vector.multi_reduction <maximumf>, %307, %cst_130 [2] : vector<2x8x8xf32> to vector<2x8xf32>
    %309 = vector.shape_cast %308 : vector<2x8xf32> to vector<2x8x1xf32>
    %310 = vector.broadcast %309 : vector<2x8x1xf32> to vector<2x8x8xf32>
    %311 = arith.subf %307, %310 : vector<2x8x8xf32>
    %312 = math.exp %311 : vector<2x8x8xf32>
    %cst_131 = arith.constant dense<0.000000e+00> : vector<2x8xf32>
    %313 = vector.multi_reduction <add>, %312, %cst_131 [2] : vector<2x8x8xf32> to vector<2x8xf32>
    %314 = vector.shape_cast %313 : vector<2x8xf32> to vector<2x8x1xf32>
    %315 = tpu.reciprocal %314 {approx = true} : vector<2x8x1xf32> -> vector<2x8x1xf32>
    %316 = vector.broadcast %315 : vector<2x8x1xf32> to vector<2x8x8xf32>
    %317 = arith.mulf %312, %316 : vector<2x8x8xf32>
    "tpu.trace_start"() <{level = 10 : i32, message = "bqk,bkd->bqd"}> : () -> ()
    %cst_132 = arith.constant dense<0.000000e+00> : vector<2x8x8xf32>
    %318 = tpu.matmul %317, %302, %cst_132 {dimension_numbers = #tpu.dot_dimension_numbers<[2], [1], [1], [2], [0, 0, 0, 1, 1, 2], [0], [0]>} : vector<2x8x8xf32>, vector<2x8x8xf32>, vector<2x8x8xf32> -> vector<2x8x8xf32>
    "tpu.trace_stop"() : () -> ()
    %319 = vector.extract_strided_slice %252 {offsets = [0, 24], sizes = [16, 8], strides = [1, 1]} : vector<16x96xf32> to vector<16x8xf32>
    %320 = vector.shape_cast %319 : vector<16x8xf32> to vector<2x8x8xf32>
    %321 = vector.extract_strided_slice %252 {offsets = [0, 56], sizes = [16, 8], strides = [1, 1]} : vector<16x96xf32> to vector<16x8xf32>
    %322 = vector.shape_cast %321 : vector<16x8xf32> to vector<2x8x8xf32>
    %323 = vector.extract_strided_slice %252 {offsets = [0, 88], sizes = [16, 8], strides = [1, 1]} : vector<16x96xf32> to vector<16x8xf32>
    %324 = vector.shape_cast %323 : vector<16x8xf32> to vector<2x8x8xf32>
    "tpu.trace_start"() <{level = 10 : i32, message = "bqd,bkd->bqk"}> : () -> ()
    %cst_133 = arith.constant dense<0.000000e+00> : vector<2x8x8xf32>
    %325 = tpu.matmul %320, %322, %cst_133 {dimension_numbers = #tpu.dot_dimension_numbers<[2], [2], [1], [1], [0, 0, 0, 1, 1, 1], [0], [0]>} : vector<2x8x8xf32>, vector<2x8x8xf32>, vector<2x8x8xf32> -> vector<2x8x8xf32>
    "tpu.trace_stop"() : () -> ()
    %cst_134 = arith.constant 0.353553385 : f32
    %326 = vector.broadcast %cst_134 : f32 to vector<2x8x8xf32>
    %327 = arith.mulf %325, %326 : vector<2x8x8xf32>
    %328 = vector.broadcast %60 : vector<2x1x8xf32> to vector<2x8x8xf32>
    %329 = arith.addf %327, %328 : vector<2x8x8xf32>
    %cst_135 = arith.constant dense<0xFF800000> : vector<2x8xf32>
    %330 = vector.multi_reduction <maximumf>, %329, %cst_135 [2] : vector<2x8x8xf32> to vector<2x8xf32>
    %331 = vector.shape_cast %330 : vector<2x8xf32> to vector<2x8x1xf32>
    %332 = vector.broadcast %331 : vector<2x8x1xf32> to vector<2x8x8xf32>
    %333 = arith.subf %329, %332 : vector<2x8x8xf32>
    %334 = math.exp %333 : vector<2x8x8xf32>
    %cst_136 = arith.constant dense<0.000000e+00> : vector<2x8xf32>
    %335 = vector.multi_reduction <add>, %334, %cst_136 [2] : vector<2x8x8xf32> to vector<2x8xf32>
    %336 = vector.shape_cast %335 : vector<2x8xf32> to vector<2x8x1xf32>
    %337 = tpu.reciprocal %336 {approx = true} : vector<2x8x1xf32> -> vector<2x8x1xf32>
    %338 = vector.broadcast %337 : vector<2x8x1xf32> to vector<2x8x8xf32>
    %339 = arith.mulf %334, %338 : vector<2x8x8xf32>
    "tpu.trace_start"() <{level = 10 : i32, message = "bqk,bkd->bqd"}> : () -> ()
    %cst_137 = arith.constant dense<0.000000e+00> : vector<2x8x8xf32>
    %340 = tpu.matmul %339, %324, %cst_137 {dimension_numbers = #tpu.dot_dimension_numbers<[2], [1], [1], [2], [0, 0, 0, 1, 1, 2], [0], [0]>} : vector<2x8x8xf32>, vector<2x8x8xf32>, vector<2x8x8xf32> -> vector<2x8x8xf32>
    "tpu.trace_stop"() : () -> ()
    %341 = tpu.concatenate %274, %296, %318, %340 in 2 : vector<2x8x8xf32>, vector<2x8x8xf32>, vector<2x8x8xf32>, vector<2x8x8xf32> -> vector<2x8x32xf32>
    %342 = vector.shape_cast %341 : vector<2x8x32xf32> to vector<16x32xf32>
    %c0_138 = arith.constant 0 : index
    %c1_139 = arith.constant 1 : index
    %c0_140 = arith.constant 0 : index
    %c0_141 = arith.constant 0 : index
    %343 = vector.load %arg10[%c0_138, %c1_139, %c0_140, %c0_141] : memref<1x2x32x32xf32, #tpu.memory_space<vmem>>, vector<1x1x32x32xf32>
    %344 = vector.shape_cast %343 : vector<1x1x32x32xf32> to vector<32x32xf32>
    %cst_142 = arith.constant dense<0.000000e+00> : vector<16x32xf32>
    %345 = tpu.matmul %342, %344, %cst_142 {dimension_numbers = #tpu.dot_dimension_numbers<[1], [0], [0], [1], [0, 0, 1, 1], [], []>} : vector<16x32xf32>, vector<32x32xf32>, vector<16x32xf32> -> vector<16x32xf32>
    %c0_143 = arith.constant 0 : index
    %c1_144 = arith.constant 1 : index
    %c0_145 = arith.constant 0 : index
    %c0_146 = arith.constant 0 : index
    %346 = vector.load %arg11[%c0_143, %c1_144, %c0_145, %c0_146] : memref<1x2x1x32xf32, #tpu.memory_space<vmem>>, vector<1x1x1x32xf32>
    %347 = vector.shape_cast %346 : vector<1x1x1x32xf32> to vector<1x32xf32>
    %348 = vector.broadcast %347 : vector<1x32xf32> to vector<16x32xf32>
    %349 = arith.addf %345, %348 : vector<16x32xf32>
    %350 = arith.addf %245, %349 : vector<16x32xf32>
    %c0_147 = arith.constant 0 : index
    %c1_148 = arith.constant 1 : index
    %c0_149 = arith.constant 0 : index
    %c0_150 = arith.constant 0 : index
    %351 = vector.load %arg12[%c0_147, %c1_148, %c0_149, %c0_150] : memref<1x2x2x32xf32, #tpu.memory_space<vmem>>, vector<1x1x2x32xf32>
    %352 = vector.shape_cast %351 : vector<1x1x2x32xf32> to vector<2x32xf32>
    %353 = vector.extract_strided_slice %352 {offsets = [0, 0], sizes = [1, 32], strides = [1, 1]} : vector<2x32xf32> to vector<1x32xf32>
    %354 = vector.extract_strided_slice %352 {offsets = [1, 0], sizes = [1, 32], strides = [1, 1]} : vector<2x32xf32> to vector<1x32xf32>
    %cst_151 = arith.constant dense<0.000000e+00> : vector<16xf32>
    %355 = vector.multi_reduction <add>, %350, %cst_151 [1] : vector<16x32xf32> to vector<16xf32>
    %356 = vector.shape_cast %355 : vector<16xf32> to vector<16x1xf32>
    %cst_152 = arith.constant 3.200000e+01 : f32
    %357 = vector.broadcast %cst_152 : f32 to vector<16x1xf32>
    %358 = arith.divf %356, %357 : vector<16x1xf32>
    %359 = vector.broadcast %358 : vector<16x1xf32> to vector<16x32xf32>
    %360 = arith.subf %350, %359 : vector<16x32xf32>
    %361 = arith.mulf %360, %360 : vector<16x32xf32>
    %cst_153 = arith.constant dense<0.000000e+00> : vector<16xf32>
    %362 = vector.multi_reduction <add>, %361, %cst_153 [1] : vector<16x32xf32> to vector<16xf32>
    %363 = vector.shape_cast %362 : vector<16xf32> to vector<16x1xf32>
    %cst_154 = arith.constant 3.200000e+01 : f32
    %364 = vector.broadcast %cst_154 : f32 to vector<16x1xf32>
    %365 = arith.divf %363, %364 : vector<16x1xf32>
    %366 = vector.broadcast %358 : vector<16x1xf32> to vector<16x32xf32>
    %367 = arith.subf %350, %366 : vector<16x32xf32>
    %cst_155 = arith.constant 9.99999996E-13 : f32
    %368 = vector.broadcast %cst_155 : f32 to vector<16x1xf32>
    %369 = arith.addf %365, %368 : vector<16x1xf32>
    %370 = math.rsqrt %369 : vector<16x1xf32>
    %371 = vector.broadcast %370 : vector<16x1xf32> to vector<16x32xf32>
    %372 = arith.mulf %367, %371 : vector<16x32xf32>
    %373 = vector.broadcast %353 : vector<1x32xf32> to vector<16x32xf32>
    %374 = arith.mulf %372, %373 : vector<16x32xf32>
    %375 = vector.broadcast %354 : vector<1x32xf32> to vector<16x32xf32>
    %376 = arith.addf %374, %375 : vector<16x32xf32>
    %c0_156 = arith.constant 0 : index
    %c1_157 = arith.constant 1 : index
    %c0_158 = arith.constant 0 : index
    %c0_159 = arith.constant 0 : index
    %377 = vector.load %arg13[%c0_156, %c1_157, %c0_158, %c0_159] : memref<1x2x32x64xf32, #tpu.memory_space<vmem>>, vector<1x1x32x64xf32>
    %378 = vector.shape_cast %377 : vector<1x1x32x64xf32> to vector<32x64xf32>
    %cst_160 = arith.constant dense<0.000000e+00> : vector<16x64xf32>
    %379 = tpu.matmul %376, %378, %cst_160 {dimension_numbers = #tpu.dot_dimension_numbers<[1], [0], [0], [1], [0, 0, 1, 1], [], []>} : vector<16x32xf32>, vector<32x64xf32>, vector<16x64xf32> -> vector<16x64xf32>
    %c0_161 = arith.constant 0 : index
    %c1_162 = arith.constant 1 : index
    %c0_163 = arith.constant 0 : index
    %c0_164 = arith.constant 0 : index
    %380 = vector.load %arg14[%c0_161, %c1_162, %c0_163, %c0_164] : memref<1x2x1x64xf32, #tpu.memory_space<vmem>>, vector<1x1x1x64xf32>
    %381 = vector.shape_cast %380 : vector<1x1x1x64xf32> to vector<1x64xf32>
    %382 = vector.broadcast %381 : vector<1x64xf32> to vector<16x64xf32>
    %383 = arith.addf %379, %382 : vector<16x64xf32>
    %cst_165 = arith.constant 5.000000e-01 : f32
    %384 = vector.broadcast %cst_165 : f32 to vector<16x64xf32>
    %385 = arith.mulf %384, %383 : vector<16x64xf32>
    %cst_166 = arith.constant 4.471500e-02 : f32
    %386 = vector.broadcast %cst_166 : f32 to vector<16x64xf32>
    %387 = arith.mulf %386, %383 : vector<16x64xf32>
    %388 = arith.mulf %387, %383 : vector<16x64xf32>
    %389 = arith.mulf %388, %383 : vector<16x64xf32>
    %390 = arith.addf %383, %389 : vector<16x64xf32>
    %cst_167 = arith.constant 0.797884583 : f32
    %391 = vector.broadcast %cst_167 : f32 to vector<16x64xf32>
    %392 = arith.mulf %391, %390 : vector<16x64xf32>
    %393 = math.tanh %392 : vector<16x64xf32>
    %cst_168 = arith.constant 1.000000e+00 : f32
    %394 = vector.broadcast %cst_168 : f32 to vector<16x64xf32>
    %395 = arith.addf %394, %393 : vector<16x64xf32>
    %396 = arith.mulf %385, %395 : vector<16x64xf32>
    %c0_169 = arith.constant 0 : index
    %c1_170 = arith.constant 1 : index
    %c0_171 = arith.constant 0 : index
    %c0_172 = arith.constant 0 : index
    %397 = vector.load %arg15[%c0_169, %c1_170, %c0_171, %c0_172] : memref<1x2x64x32xf32, #tpu.memory_space<vmem>>, vector<1x1x64x32xf32>
    %398 = vector.shape_cast %397 : vector<1x1x64x32xf32> to vector<64x32xf32>
    %cst_173 = arith.constant dense<0.000000e+00> : vector<16x32xf32>
    %399 = tpu.matmul %396, %398, %cst_173 {dimension_numbers = #tpu.dot_dimension_numbers<[1], [0], [0], [1], [0, 0, 1, 1], [], []>} : vector<16x64xf32>, vector<64x32xf32>, vector<16x32xf32> -> vector<16x32xf32>
    %c0_174 = arith.constant 0 : index
    %c1_175 = arith.constant 1 : index
    %c0_176 = arith.constant 0 : index
    %c0_177 = arith.constant 0 : index
    %400 = vector.load %arg16[%c0_174, %c1_175, %c0_176, %c0_177] : memref<1x2x1x32xf32, #tpu.memory_space<vmem>>, vector<1x1x1x32xf32>
    %401 = vector.shape_cast %400 : vector<1x1x1x32xf32> to vector<1x32xf32>
    %402 = vector.broadcast %401 : vector<1x32xf32> to vector<16x32xf32>
    %403 = arith.addf %399, %402 : vector<16x32xf32>
    %404 = arith.addf %376, %403 : vector<16x32xf32>
    %c0_178 = arith.constant 0 : index
    %c1_179 = arith.constant 1 : index
    %c0_180 = arith.constant 0 : index
    %c0_181 = arith.constant 0 : index
    %405 = vector.load %arg17[%c0_178, %c1_179, %c0_180, %c0_181] : memref<1x2x2x32xf32, #tpu.memory_space<vmem>>, vector<1x1x2x32xf32>
    %406 = vector.shape_cast %405 : vector<1x1x2x32xf32> to vector<2x32xf32>
    %407 = vector.extract_strided_slice %406 {offsets = [0, 0], sizes = [1, 32], strides = [1, 1]} : vector<2x32xf32> to vector<1x32xf32>
    %408 = vector.extract_strided_slice %406 {offsets = [1, 0], sizes = [1, 32], strides = [1, 1]} : vector<2x32xf32> to vector<1x32xf32>
    %cst_182 = arith.constant dense<0.000000e+00> : vector<16xf32>
    %409 = vector.multi_reduction <add>, %404, %cst_182 [1] : vector<16x32xf32> to vector<16xf32>
    %410 = vector.shape_cast %409 : vector<16xf32> to vector<16x1xf32>
    %cst_183 = arith.constant 3.200000e+01 : f32
    %411 = vector.broadcast %cst_183 : f32 to vector<16x1xf32>
    %412 = arith.divf %410, %411 : vector<16x1xf32>
    %413 = vector.broadcast %412 : vector<16x1xf32> to vector<16x32xf32>
    %414 = arith.subf %404, %413 : vector<16x32xf32>
    %415 = arith.mulf %414, %414 : vector<16x32xf32>
    %cst_184 = arith.constant dense<0.000000e+00> : vector<16xf32>
    %416 = vector.multi_reduction <add>, %415, %cst_184 [1] : vector<16x32xf32> to vector<16xf32>
    %417 = vector.shape_cast %416 : vector<16xf32> to vector<16x1xf32>
    %cst_185 = arith.constant 3.200000e+01 : f32
    %418 = vector.broadcast %cst_185 : f32 to vector<16x1xf32>
    %419 = arith.divf %417, %418 : vector<16x1xf32>
    %420 = vector.broadcast %412 : vector<16x1xf32> to vector<16x32xf32>
    %421 = arith.subf %404, %420 : vector<16x32xf32>
    %cst_186 = arith.constant 9.99999996E-13 : f32
    %422 = vector.broadcast %cst_186 : f32 to vector<16x1xf32>
    %423 = arith.addf %419, %422 : vector<16x1xf32>
    %424 = math.rsqrt %423 : vector<16x1xf32>
    %425 = vector.broadcast %424 : vector<16x1xf32> to vector<16x32xf32>
    %426 = arith.mulf %421, %425 : vector<16x32xf32>
    %427 = vector.broadcast %407 : vector<1x32xf32> to vector<16x32xf32>
    %428 = arith.mulf %426, %427 : vector<16x32xf32>
    %429 = vector.broadcast %408 : vector<1x32xf32> to vector<16x32xf32>
    %430 = arith.addf %428, %429 : vector<16x32xf32>
    %431 = vector.shape_cast %430 : vector<16x32xf32> to vector<2x8x32xf32>
    %432 = vector.extract_strided_slice %431 {offsets = [0, 0, 0], sizes = [2, 1, 32], strides = [1, 1, 1]} : vector<2x8x32xf32> to vector<2x1x32xf32>
    %433 = vector.shape_cast %432 : vector<2x1x32xf32> to vector<2x32xf32>
    %c0_i32 = arith.constant 0 : i32
    %434 = arith.cmpi eq, %arg0, %c0_i32 : i32
    %435 = arith.extui %434 : i1 to i32
    %c0_i32_187 = arith.constant 0 : i32
    %436 = arith.cmpi ne, %435, %c0_i32_187 : i32
    scf.if %436 {
      %c0_196 = arith.constant 0 : index
      %c0_197 = arith.constant 0 : index
      %443 = vector.load %arg19[%c0_196, %c0_197] : memref<1x8xf32, #tpu.memory_space<vmem>>, vector<1x8xf32>
      %444 = vector.shape_cast %443 : vector<1x8xf32> to vector<1x8xf32>
      %445 = vector.broadcast %444 : vector<1x8xf32> to vector<2x8xf32>
      %c0_198 = arith.constant 0 : index
      %c0_199 = arith.constant 0 : index
      %446 = vector.load %arg20[%c0_198, %c0_199] : memref<2x8xf32, #tpu.memory_space<vmem>>, vector<2x8xf32>
      tpu.vector_store %arg20[%c0_198, %c0_199], %445 {strides = array<i32>} : memref<2x8xf32, #tpu.memory_space<vmem>>, vector<2x8xf32>,
    } else {
    }
    %c0_188 = arith.constant 0 : index
    %c0_189 = arith.constant 0 : index
    %437 = vector.load %arg20[%c0_188, %c0_189] : memref<2x8xf32, #tpu.memory_space<vmem>>, vector<2x8xf32>
    %c0_190 = arith.constant 0 : index
    %c0_191 = arith.constant 0 : index
    %c0_192 = arith.constant 0 : index
    %438 = vector.load %arg18[%c0_190, %c0_191, %c0_192] : memref<1x32x8xf32, #tpu.memory_space<vmem>>, vector<1x32x8xf32>
    %439 = vector.shape_cast %438 : vector<1x32x8xf32> to vector<32x8xf32>
    %cst_193 = arith.constant dense<0.000000e+00> : vector<2x8xf32>
    %440 = tpu.matmul %433, %439, %cst_193 {dimension_numbers = #tpu.dot_dimension_numbers<[1], [0], [0], [1], [0, 0, 1, 1], [], []>} : vector<2x32xf32>, vector<32x8xf32>, vector<2x8xf32> -> vector<2x8xf32>
    %441 = arith.addf %437, %440 : vector<2x8xf32>
    %c0_194 = arith.constant 0 : index
    %c0_195 = arith.constant 0 : index
    %442 = vector.load %arg20[%c0_194, %c0_195] : memref<2x8xf32, #tpu.memory_space<vmem>>, vector<2x8xf32>
    tpu.vector_store %arg20[%c0_194, %c0_195], %441 {strides = array<i32>} : memref<2x8xf32, #tpu.memory_space<vmem>>, vector<2x8xf32>,
    return
  }
  func.func @transform_0(%arg0: i32) -> (i32, i32, i32) {
    %c0_i32 = arith.constant 0 : i32
    %c0_i32_0 = arith.constant 0 : i32
    %c0_i32_1 = arith.constant 0 : i32
    return %arg0, %c0_i32, %c0_i32_0 : i32, i32, i32
  }
  func.func @transform_1(%arg0: i32) -> (i32, i32, i32) {
    %c0_i32 = arith.constant 0 : i32
    %c0_i32_0 = arith.constant 0 : i32
    %c0_i32_1 = arith.constant 0 : i32
    return %arg0, %c0_i32, %c0_i32_0 : i32, i32, i32
  }
  func.func @transform_2(%arg0: i32) -> (i32, i32, i32) {
    %c0_i32 = arith.constant 0 : i32
    %c0_i32_0 = arith.constant 0 : i32
    %c0_i32_1 = arith.constant 0 : i32
    return %arg0, %c0_i32, %c0_i32_0 : i32, i32, i32
  }
  func.func @transform_3(%arg0: i32) -> (i32, i32, i32) {
    %c0_i32 = arith.constant 0 : i32
    %c0_i32_0 = arith.constant 0 : i32
    %c0_i32_1 = arith.constant 0 : i32
    return %arg0, %c0_i32, %c0_i32_0 : i32, i32, i32
  }
  func.func @transform_4(%arg0: i32) -> (i32, i32, i32) {
    %c0_i32 = arith.constant 0 : i32
    %c0_i32_0 = arith.constant 0 : i32
    %c0_i32_1 = arith.constant 0 : i32
    return %arg0, %c0_i32, %c0_i32_0 : i32, i32, i32
  }
  func.func @transform_5(%arg0: i32) -> (i32, i32, i32) {
    %c0_i32 = arith.constant 0 : i32
    %c0_i32_0 = arith.constant 0 : i32
    %c0_i32_1 = arith.constant 0 : i32
    return %arg0, %c0_i32, %c0_i32_0 : i32, i32, i32
  }
  func.func @transform_6(%arg0: i32) -> (i32, i32, i32) {
    %c0_i32 = arith.constant 0 : i32
    %c0_i32_0 = arith.constant 0 : i32
    %c0_i32_1 = arith.constant 0 : i32
    return %arg0, %c0_i32, %c0_i32_0 : i32, i32, i32
  }
  func.func @transform_7(%arg0: i32) -> (i32, i32, i32, i32) {
    %c0_i32 = arith.constant 0 : i32
    %c0_i32_0 = arith.constant 0 : i32
    %c0_i32_1 = arith.constant 0 : i32
    %c0_i32_2 = arith.constant 0 : i32
    return %arg0, %c0_i32, %c0_i32_0, %c0_i32_1 : i32, i32, i32, i32
  }
  func.func @transform_8(%arg0: i32) -> (i32, i32, i32, i32) {
    %c0_i32 = arith.constant 0 : i32
    %c0_i32_0 = arith.constant 0 : i32
    %c0_i32_1 = arith.constant 0 : i32
    %c0_i32_2 = arith.constant 0 : i32
    return %arg0, %c0_i32, %c0_i32_0, %c0_i32_1 : i32, i32, i32, i32
  }
  func.func @transform_9(%arg0: i32) -> (i32, i32, i32, i32) {
    %c0_i32 = arith.constant 0 : i32
    %c0_i32_0 = arith.constant 0 : i32
    %c0_i32_1 = arith.constant 0 : i32
    %c0_i32_2 = arith.constant 0 : i32
    return %arg0, %c0_i32, %c0_i32_0, %c0_i32_1 : i32, i32, i32, i32
  }
  func.func @transform_10(%arg0: i32) -> (i32, i32, i32, i32) {
    %c0_i32 = arith.constant 0 : i32
    %c0_i32_0 = arith.constant 0 : i32
    %c0_i32_1 = arith.constant 0 : i32
    %c0_i32_2 = arith.constant 0 : i32
    return %arg0, %c0_i32, %c0_i32_0, %c0_i32_1 : i32, i32, i32, i32
  }
  func.func @transform_11(%arg0: i32) -> (i32, i32, i32, i32) {
    %c0_i32 = arith.constant 0 : i32
    %c0_i32_0 = arith.constant 0 : i32
    %c0_i32_1 = arith.constant 0 : i32
    %c0_i32_2 = arith.constant 0 : i32
    return %arg0, %c0_i32, %c0_i32_0, %c0_i32_1 : i32, i32, i32, i32
  }
  func.func @transform_12(%arg0: i32) -> (i32, i32, i32, i32) {
    %c0_i32 = arith.constant 0 : i32
    %c0_i32_0 = arith.constant 0 : i32
    %c0_i32_1 = arith.constant 0 : i32
    %c0_i32_2 = arith.constant 0 : i32
    return %arg0, %c0_i32, %c0_i32_0, %c0_i32_1 : i32, i32, i32, i32
  }
  func.func @transform_13(%arg0: i32) -> (i32, i32, i32, i32) {
    %c0_i32 = arith.constant 0 : i32
    %c0_i32_0 = arith.constant 0 : i32
    %c0_i32_1 = arith.constant 0 : i32
    %c0_i32_2 = arith.constant 0 : i32
    return %arg0, %c0_i32, %c0_i32_0, %c0_i32_1 : i32, i32, i32, i32
  }
  func.func @transform_14(%arg0: i32) -> (i32, i32, i32, i32) {
    %c0_i32 = arith.constant 0 : i32
    %c0_i32_0 = arith.constant 0 : i32
    %c0_i32_1 = arith.constant 0 : i32
    %c0_i32_2 = arith.constant 0 : i32
    return %arg0, %c0_i32, %c0_i32_0, %c0_i32_1 : i32, i32, i32, i32
  }
  func.func @transform_15(%arg0: i32) -> (i32, i32, i32, i32) {
    %c0_i32 = arith.constant 0 : i32
    %c0_i32_0 = arith.constant 0 : i32
    %c0_i32_1 = arith.constant 0 : i32
    %c0_i32_2 = arith.constant 0 : i32
    return %arg0, %c0_i32, %c0_i32_0, %c0_i32_1 : i32, i32, i32, i32
  }
  func.func @transform_16(%arg0: i32) -> (i32, i32, i32, i32) {
    %c0_i32 = arith.constant 0 : i32
    %c0_i32_0 = arith.constant 0 : i32
    %c0_i32_1 = arith.constant 0 : i32
    %c0_i32_2 = arith.constant 0 : i32
    return %arg0, %c0_i32, %c0_i32_0, %c0_i32_1 : i32, i32, i32, i32
  }
  func.func @transform_17(%arg0: i32) -> (i32, i32, i32) {
    %c0_i32 = arith.constant 0 : i32
    %c0_i32_0 = arith.constant 0 : i32
    %c0_i32_1 = arith.constant 0 : i32
    return %arg0, %c0_i32, %c0_i32_0 : i32, i32, i32
  }
  func.func @transform_18(%arg0: i32) -> (i32, i32) {
    %c0_i32 = arith.constant 0 : i32
    %c0_i32_0 = arith.constant 0 : i32
    %c0_i32_1 = arith.constant 0 : i32
    return %c0_i32, %c0_i32_0 : i32, i32
  }
  func.func @transform_19(%arg0: i32) -> (i32, i32) {
    %c0_i32 = arith.constant 0 : i32
    %c0_i32_0 = arith.constant 0 : i32
    %c0_i32_1 = arith.constant 0 : i32
    return %c0_i32, %c0_i32_0 : i32, i32
  }
}

</mosaic_0001>

<bundles_post_ra>
// kernel: bert_regressor_forward.1
= control target key start
LH: loop header
LB: loop body
LE: loop exit
PB: predicated region body
PF: predicated region fallthrough
CT: control target
= control target key end

     0   :  { %s6880_s0 = inlined_call_operand.vmem [shape: s32[3,16,1], index: 0, kind: input, shape index: {}]   ;;  %s6881_s1 = inlined_call_operand.vmem [shape: s32[3,16,1], index: 1, kind: input, shape index: {}]   ;;  %s6882_s2 = inlined_call_operand.vmem [shape: s32[3,2,8], index: 2, kind: input, shape index: {}]   ;;  %s6883_s3 = inlined_call_operand.vmem [shape: f32[3,100,32], index: 3, kind: input, shape index: {}]   ;;  %s6884_s4 = inlined_call_operand.vmem [shape: f32[3,8,32], index: 4, kind: input, shape index: {}]   ;;  %s6885_s5 = inlined_call_operand.vmem [shape: f32[3,2,32], index: 5, kind: input, shape index: {}]   ;;  %s6886_s6 = inlined_call_operand.vmem [shape: f32[3,2,32], index: 6, kind: input, shape index: {}]   ;;  %s6887_s7 = inlined_call_operand.vmem [shape: f32[3,2,32,96], index: 7, kind: input, shape index: {}]   ;;  %s6888_s8 = inlined_call_operand.vmem [shape: f32[3,2,1,96], index: 8, kind: input, shape index: {}]   ;;  %s6889_s9 = inlined_call_operand.vmem [shape: f32[3,2,32,32], index: 9, kind: input, shape index: {}]   ;;  %s6890_s10 = inlined_call_operand.vmem [shape: f32[3,2,1,32], index: 10, kind: input, shape index: {}]   ;;  %s6891_s11 = inlined_call_operand.vmem [shape: f32[3,2,2,32], index: 11, kind: input, shape index: {}]   ;;  %s6892_s12 = inlined_call_operand.vmem [shape: f32[3,2,32,64], index: 12, kind: input, shape index: {}]   ;;  %s6893_s13 = inlined_call_operand.vmem [shape: f32[3,2,1,64], index: 13, kind: input, shape index: {}]   ;;  %s6894_s14 = inlined_call_operand.vmem [shape: f32[3,2,64,32], index: 14, kind: input, shape index: {}]   ;;  %s6895_s15 = inlined_call_operand.vmem [shape: f32[3,2,1,32], index: 15, kind: input, shape index: {}]   ;;  %s6896_s16 = inlined_call_operand.vmem [shape: f32[3,2,2,32], index: 16, kind: input, shape index: {}]   ;;  %s6897_s17 = inlined_call_operand.vmem [shape: f32[3,32,8], index: 17, kind: input, shape index: {}]   ;;  %s6898_s18 = inlined_call_operand.vmem [shape: f32[1,8], index: 18, kind: input, shape index: {}]   ;;  %s6899_s19 = inlined_call_operand.hbm [shape: f32[2,8], index: 19, kind: output, shape index: {}]  }
   0x1   :  { %6928 = sst [smem:[#allocation6_spill]] %s6880_s0 }
   0x2   :  { %6929 = sst [smem:[#allocation7_spill]] %s6881_s1 }
   0x3   :  { %6930 = sst [smem:[#allocation8_spill]] %s6882_s2 }
   0x4   :  { %6931 = sst [smem:[#allocation9_spill]] %s6883_s3 }
   0x5   :  { %6932 = sst [smem:[#allocation10_spill]] %s6898_s18 }
   0x6   :  { %6933 = sst [smem:[#allocation11_spill]] %s6899_s19 }
   0x7   :  { %24 = vsyncpa [#allocation3], 0  ;;  %s6234_s0 = smov 0  }
   0x8 LB: > { %6934 = sst [smem:[#allocation5_spill]] %s6112_s0  ;;  %s6240_s30 = sadd.s32 4294967295, %s6112_s0   ;;  %s6112_s0 = sphi %s6234_s0, %s30_s0  }
   0x9   : > { %p5235_p0 = scmp.ge.s32.totalorder %s6112_s0, 1  ;;  %p695_p1 = scmp.lt.s32.totalorder %s6112_s0, 4 }
   0xb   : > { %p696_p2 = pnand %p5235_p0, %p695_p1 }
   0xc   : > { %p823_p3 = scmp.lt.s32.totalorder (!%p696_p2), %s6240_s30, 2  ;;  %v6114_v0 = vmov (!%p696_p2), 0   ;;  %s6935_s2 = sld [smem:[#allocation7_spill]] (!%p696_p2)  ;;  %vm953_vm0 = vcmask (!%p696_p2), 1041408   ;;  %v905_v9 = vlaneseq (!%p696_p2)  ;;  %vm946_vm1 = vcmask (!%p696_p2), 15360  }
   0xd   : > { %699 = sbr.rel (%p696_p2) target bundleno = 9207 (0x23f7), region = 96  ;;  %5982 = vset.pattern.permute.xlu0 (!%p696_p2), %v6114_v0  ;;  %5983 = vset.pattern.permute.xlu1 (!%p696_p2), %v6114_v0  ;;  %s6936_s26 = sld [smem:[#allocation6_spill]] (!%p696_p2)  ;;  %v6115_v13 = vmov (!%p696_p2), 0.0   ;;  %vm1032_vm5 = vcmask (!%p696_p2), 818176   ;;  %vm1039_vm6 = vcmask (!%p696_p2), 1043456   ;;  %vm1121_vm8 = vcmask (!%p696_p2), 261120  }
   0xe   : > { %v906_v10 = vand.u32 (!%p696_p2), 127, %v905_v9  ;;  %v1150_v0 = vshrl.u32 (!%p696_p2), %v905_v9, 7  ;;  %vm6116_vm9 = vmmov (!%p696_p2), 0   ;;  %vm1283_vm10 = vcmask (!%p696_p2), 64512   ;;  %s6938_s29 = sld [smem:[#allocation8_spill]] (!%p696_p2)  ;;  %p5367_p4 = scmp.ne.s32.totalorder (!%p696_p2), %s6240_s30, 0 }
   0xf   : > { %vm2651_vm11 = vcmask (!%p696_p2), 130048   ;;  %vm2654_vm12 = vcmask (!%p696_p2), 195584   ;;  %vm2915_vm13 = vcmask (!%p696_p2), 523264  }
  0x14   : > { %s6246_s20 = scalar_select %p823_p3, %s6240_s30, 2 }
  0x15   : > { %vm4895_vm14 = vcmask (!%p5367_p4), 58368  }
  0x16   : > { %s5374_s21 = sshll.u32 %s6246_s20, 4  ;;  %s5382_s24 = sshll.u32 %s6246_s20, 5 }
  0x17   : > { %s832_s23 = scalar_lea.vmem %s6935_s2, %s5374_s21  ;;  %s827_s27 = scalar_lea.vmem %s6936_s26, %s5374_s21 }
  0x18   : > { %v919_v1 = vld [vmem:[%s832_s23] sm:$0xff]  ;;  %s6259_s0 = scalar_lea.vmem %s6897_s17, %s5382_s24  ;;  %s6262_s19 = sshll.u32 %s6246_s20, 1  ;;  %v920_v3 = vld [vmem:[%s832_s23 + $0x8] sm:$0xff] }
  0x19   : > { %922 = vperm.xlu0 %5982, %v919_v1   ;;  %v907_v2 = vld [vmem:[%s827_s27] sm:$0xff]  ;;  %s849_s2 = scalar_lea.vmem %s6885_s5, %s6262_s19  ;;  %s5947_s18 = smul.u32 104, %s6246_s20  ;;  %v908_v4 = vld [vmem:[%s827_s27 + $0x8] sm:$0xff] }
  0x1a   : > { %910 = vperm.xlu1 %5983, %v907_v2   ;;  %v945_v5 = vld [vmem:[%s849_s2] sm:$0x3]  ;;  %s6937_s24 = sld [smem:[#allocation9_spill]]  ;;  %s6306_s28 = sshll.u32 %s6246_s20, 6  ;;  %v6324_v2 = vsub.s32 0, %v1150_v0 }
  0x1b   : > { %5526 = vmatprep.subr.msk.mxu0 %vm953_vm0, %v945_v5  ;;  %s6312_s22 = scalar_lea.vmem %s6887_s7, %s6306_s28  ;;  %s853_s25 = scalar_lea.vmem %s6886_s6, %s6262_s19 }
  0x1c   : > { %5527 = vmatpush3.msk.msra.mxu0 %vm953_vm0, %v945_v5  ;;  %v1188_v53 = vld [vmem:[%s6312_s22] sm:$0xff]  ;;  %v1189_v54 = vld [vmem:[%s6312_s22 + $0x8] sm:$0xff]  ;;  %v1190_v55 = vld [vmem:[%s6312_s22 + $0x10] sm:$0xff]  ;;  %s6117_s23 = smov 96   ;;  %s836_s1 = scalar_lea.vmem %s6938_s29, %s6262_s19 }
  0x1d   : > { %925 = vperm.xlu0 %5982, %v920_v3   ;;  %v5859_v56 = vpack.c.bf16 %v1189_v54, %v1188_v53  ;;  %v1191_v57 = vld [vmem:[%s6312_s22 + $0x18] sm:$0xff]  ;;  %v1120_v3 = vld [vmem:[%s853_s25] sm:$0x3]  ;;  %s6926_s2 = smov 64   ;;  %s6924_s21 = smov 88  }
  0x1e   : > { %913 = vperm.xlu1 %5983, %v908_v4   ;;  %v5863_v58 = vpack.c.bf16 %v1191_v57, %v1190_v55  ;;  %v6326_v4 = vsub.s32 1, %v1150_v0  ;;  %v1152_v5 = vrot.slane %v1120_v3, %v6324_v2  ;;  %s6922_s25 = smov 120   ;;  %s6910_s26 = smov 112  }
  0x1f   : > { %5860 = vmatprep.subr.bf16.mxu1 %v5859_v56  ;;  %s6904_s29 = smov 72  }
  0x20   : > { %s6272_s3 = scalar_lea.vmem %s6937_s24, %s5947_s18  ;;  %s5242_s18 = sshll.u32 %s6246_s20, 3  ;;  %5862 = vmatpush3.bf16.msra.mxu1 %v5859_v56 }
  0x21   : > { %v932_v6 = vld [vmem:[%s6272_s3] sm:$0xff]  ;;  %v933_v7 = vld [vmem:[%s6272_s3 + $0x8] sm:$0xff]  ;;  %v934_v15 = vld [vmem:[%s6272_s3 + $0x10] sm:$0xff]  ;;  %s845_s27 = scalar_lea.vmem %s6884_s4, %s5242_s18  ;;  %5864 = vmatprep.subr.bf16.mxu1 %v5863_v58  ;;  %s6346_s18 = scalar_lea.vmem %s6888_s8, %s6262_s19 }
  0x22   : > { %v5835_v8 = vpack.c.bf16 %v933_v7, %v932_v6  ;;  %v935_v16 = vld [vmem:[%s6272_s3 + $0x18] sm:$0xff]  ;;  %v936_v21 = vld [vmem:[%s6272_s3 + $0x20] sm:$0xff]  ;;  %v937_v22 = vld [vmem:[%s6272_s3 + $0x28] sm:$0xff]  ;;  %s6920_s24 = smov 56  }
  0x23   : > { %v5839_v18 = vpack.c.bf16 %v935_v16, %v934_v15  ;;  %v5843_v23 = vpack.c.bf16 %v937_v22, %v936_v21  ;;  %v938_v24 = vld [vmem:[%s6272_s3 + $0x30] sm:$0xff]  ;;  %v939_v25 = vld [vmem:[%s6272_s3 + $0x38] sm:$0xff]  ;;  %v940_v27 = vld [vmem:[%s6272_s3 + $0x40] sm:$0xff] }
  0x24   : > { %5836 = vmatprep.subr.bf16.mxu0 %v5835_v8  ;;  %v5847_v26 = vpack.c.bf16 %v939_v25, %v938_v24  ;;  %v941_v28 = vld [vmem:[%s6272_s3 + $0x48] sm:$0xff]  ;;  %v942_v30 = vld [vmem:[%s6272_s3 + $0x50] sm:$0xff]  ;;  %v943_v31 = vld [vmem:[%s6272_s3 + $0x58] sm:$0xff]  ;;  %5866 = vmatpush3.bf16.msra.mxu1 %v5863_v58  ;;  %v6118_v24 = vmov 1966171168  }
  0x25   : > { %v5851_v29 = vpack.c.bf16 %v941_v28, %v940_v27  ;;  %v5855_v32 = vpack.c.bf16 %v943_v31, %v942_v30  ;;  %v944_v34 = vld [vmem:[%s6272_s3 + $0x60] sm:$0xf]  ;;  %5571 = vmatprep.subr.mxu1 %v6115_v13  ;;  %v1167_v25 = vunpack.c.l.s4 %v6118_v24  ;;  %s6918_s3 = smov 80  }
  0x26   : > { %v931_v36 = vld [vmem:[%s845_s27] sm:$0xff]  ;;  %s6906_s27 = smov 48  }
  0x27   : > { %v5269_v16 = vld [vmem:[%s6346_s18] ss:$0 sm:$0xff]  ;;  %v1168_v27 = vunpack.c.0.s8 %v1167_v25 }
  0x98   : > { %v923_v11 = vpop.permute.xlu0 %922 }
  0x99   : > { %vm927_vm2 = vcmp.eq.s32.totalorder %v923_v11, %v906_v10  ;;  %v911_v12 = vpop.permute.xlu1 %910 }
  0x9a   : > { %v929_v14 = vsel %vm927_vm2, 1.0, %v6115_v13  ;;  %vm915_vm3 = vcmp.eq.s32.totalorder %v911_v12, %v906_v10 }
  0x9b   : > { %5528 = vmatprep.mubr.msk.f32.mxu0 %vm946_vm1, %v929_v14  ;;  %v917_v19 = vsel %vm915_vm3, 1.0, %v6115_v13 }
  0x9c   : > { %v926_v17 = vpop.permute.xlu0 %925 }
  0x9d   : > { %vm928_vm4 = vcmp.eq.s32.totalorder %v926_v17, %v906_v10  ;;  %v914_v33 = vpop.permute.xlu1 %913 }
  0x9e   : > { %v930_v20 = vsel %vm928_vm4, 1.0, %v6115_v13  ;;  %vm916_vm7 = vcmp.eq.s32.totalorder %v914_v33, %v906_v10 }
  0x9f   : > { %5529 = vmatmul.mubr.msk.f32.vlgmr.msra.gmra.mrb[0].mxu0 %vm946_vm1, %v930_v20  ;;  %v918_v35 = vsel %vm916_vm7, 1.0, %v6115_v13 }
  0xa0   : > { %5838 = vmatpush3.bf16.msra.mxu0 %v5835_v8  ;;  %5557 = vmatprep.mubr.msk.f32.mxu0 %vm1032_vm5, %v917_v19  ;;  %v1158_v8 = vrot.slane %v1120_v3, %v6326_v4 }
  0xa1   : > { %5840 = vmatprep.subr.bf16.mxu0 %v5839_v18 }
  0xa4   : > { %5842 = vmatpush3.bf16.msra.mxu0 %v5839_v18 }
  0xa5   : > { %5844 = vmatprep.subr.bf16.mxu0 %v5843_v23 }
  0xa8   : > { %5846 = vmatpush3.bf16.msra.mxu0 %v5843_v23  ;;  %v1161_v23 = vld [vmem:[%s836_s1] sm:$0x3]  ;;  %s6902_s1 = smov 104  }
  0xa9   : > { %5848 = vmatprep.subr.bf16.mxu0 %v5847_v26 }
  0xac   : > { %5850 = vmatpush3.bf16.msra.mxu0 %v5847_v26  ;;  %v1162_v26 = vcvt.s32.f32 %v1161_v23 }
  0xad   : > { %5852 = vmatprep.subr.bf16.mxu0 %v5851_v29 }
  0xae   : > { %v1163_v28 = vsub.f32 1.0, %v1162_v26 }
  0xb0   : > { %5854 = vmatpush3.bf16.msra.mxu0 %v5851_v29  ;;  %v1171_v29 = vsub.s32 %v1168_v27, %v1150_v0  ;;  %v1164_v30 = vmul.f32 -1e+09, %v1163_v28 }
  0xb1   : > { %5856 = vmatprep.subr.bf16.mxu0 %v5855_v32 }
  0xb2   : > { %v1172_v31 = vrot.slane %v1164_v30, %v1171_v29 }
  0xb4   : > { %5858 = vmatpush3.bf16.msra.mxu0 %v5855_v32  ;;  %v1173_v32 = vcombine.high %v1172_v31, %v1172_v31  ;;  %v1180_v33 = vrot.slane %v1172_v31, %v1171_v29 }
  0xb5   : > { %5555 = vmatprep.subr.msk.mxu0 %vm1039_vm6, %v944_v34 }
  0xb8   : > { %5556 = vmatpush3.msk.msra.mxu0 %vm1039_vm6, %v944_v34  ;;  %v1187_v34 = vrot.slane %v1173_v32, %v1171_v29 }
  0xb9   : > { %5558 = vmatmul.mubr.msk.f32.vlgmr.msra.gmra.mrb[0].mxu0 %vm1032_vm5, %v918_v35  ;;  %5596 = vmatprep.subr.mxu0 %v6115_v13  ;;  %v6374_v35 = vrot.slane %v1180_v33, %v6324_v2 }
  0xba   : > { %5598 = vmatprep.mubr.msk.f32.mxu0 %vm6116_vm9, %v6115_v13 }
 0x18c   : > { %v5559_v37 = vpop.f32.mrb[0].mxu0 }
 0x18d   : > { %v1119_v38 = vadd.f32 %v5559_v37, %v931_v36  ;;  %v1109_v39 = vpop.f32.mrb[1].mxu0 }
 0x18e   : > { %v1118_v40 = vadd.f32 %v1109_v39, %v931_v36 }
 0x18f   : > { %v1125_v41 = vsel %vm1121_vm8, %v1119_v38, 0.0 }
 0x190   : > { %1126 = vadd.xlane.f32.xlu1 %v1125_v41  ;;  %v1122_v42 = vsel %vm1121_vm8, %v1118_v40, 0.0 }
 0x191   : > { %1123 = vadd.xlane.f32.xlu0 %v1122_v42 }
 0x21d   : > { %v1127_v43 = vpop.xlane.xlu1 %1126 }
 0x21e   : > { %v1130_v44 = vmul.f32 0.03125, %v1127_v43  ;;  %v1124_v45 = vpop.xlane.xlu0 %1123 }
 0x21f   : > { %v1129_v46 = vmul.f32 0.03125, %v1124_v45 }
 0x220   : > { %v1132_v47 = vsub.f32 %v1119_v38, %v1130_v44 }
 0x221   : > { %v1131_v48 = vsub.f32 %v1118_v40, %v1129_v46  ;;  %v6378_v40 = vrot.slane %v1187_v34, %v6324_v2 }
 0x222   : > { %v1134_v51 = vmul.f32 %v1132_v47, %v1132_v47 }
 0x223   : > { %v1133_v49 = vmul.f32 %v1131_v48, %v1131_v48 }
 0x224   : > { %v1138_v52 = vsel %vm1121_vm8, %v1134_v51, 0.0 }
 0x225   : > { %v1135_v50 = vsel %vm1121_vm8, %v1133_v49, 0.0 }
 0x226   : > { %1136 = vadd.xlane.f32.xlu0 %v1135_v50 }
 0x22a   : > { %1139 = vadd.xlane.f32.xlu0 %v1138_v52 }
 0x2b3   : > { %v1137_v59 = vpop.xlane.xlu0 %1136 }
 0x2b4   : > { %v1141_v60 = vmul.f32 0.03125, %v1137_v59 }
 0x2b6   : > { %v1143_v61 = vadd.f32 1e-12, %v1141_v60 }
 0x2b7   : > { %v1140_v62 = vpop.xlane.xlu0 %1139 }
 0x2b8   : > { %5984 = vrsqrt.f32 %v1143_v61  ;;  %v1142_v63 = vmul.f32 0.03125, %v1140_v62 }
 0x2ba   : > { %v1144_v1 = vadd.f32 1e-12, %v1142_v63 }
 0x2bc   : > { %5986 = vrsqrt.f32 %v1144_v1 }
 0x2c2   : > { %v5985_v6 = vpop.eup %5984 }
 0x2c3   : > { %v1147_v7 = vmul.f32 %v5985_v6, %v1131_v48 }
 0x2c5   : > { %v1153_v10 = vmul.f32 %v1152_v5, %v1147_v7 }
 0x2c6   : > { %v5987_v9 = vpop.eup %5986 }
 0x2c7   : > { %v1148_v11 = vmul.f32 %v5987_v9, %v1132_v47  ;;  %v6330_v12 = vadd.f32 %v1158_v8, %v1153_v10 }
 0x2c9   : > { %v1154_v14 = vmul.f32 %v1152_v5, %v1148_v11  ;;  %5568 = vmatprep.mubr.msk.f32.mxu1 %vm1121_vm8, %v6330_v12 }
 0x2cb   : > { %v6334_v15 = vadd.f32 %v1158_v8, %v1154_v14 }
 0x2cd   : > { %5569 = vmatmul.mubr.msk.f32.vlgmr.msra.gmra.mrb[0].mxu1 %vm1121_vm8, %v6334_v15 }
 0x2ce   : > { %5573 = vmatprep.mubr.msk.f32.mxu1 %vm6116_vm9, %v6115_v13 }
 0x3a0   : > { %v5570_v17 = vpop.f32.mrb[0].mxu1 }
 0x3a1   : > { %v6349_v18 = vadd.f32 %v5570_v17, %v5269_v16  ;;  %v1271_v19 = vpop.f32.mrb[1].mxu1 }
 0x3a2   : > { %v6351_v20 = vadd.f32 %v5269_v16, %v1271_v19 }
 0x3a3   : > { %1359 = vrot.lane.b32.xlu0 %v6349_v18, %s6117_s23 }
 0x3a4   : > { %1281 = vrot.lane.b32.xlu1 %v6351_v20, %s6117_s23 }
 0x415   : > { %v1360_v22 = vpop.permute.xlu0 %1359 }
 0x416   : > { %v1282_v21 = vpop.permute.xlu1 %1281 }
 0x417   : > { %5572 = vmatpush3.xpose.msk.msra.mxu1 %vm1283_vm10, %v1282_v21 }
 0x418   : > { %5576 = vmatprep.subr.mxu1 %v6115_v13 }
 0x41a   : > { %5574 = vmatmul.mubr.msk.f32.vlgmr.msra.gmra.mrb[2].mxu1 %vm1283_vm10, %v6351_v20 }
 0x41b   : > { %5577 = vmatpush3.xpose.msk.msra.mxu1 %vm1283_vm10, %v1360_v22  ;;  %5578 = vmatprep.mubr.msk.f32.mxu1 %vm6116_vm9, %v6115_v13 }
 0x41c   : > { %5581 = vmatprep.subr.mxu1 %v6115_v13 }
 0x41e   : > { %5579 = vmatmul.mubr.msk.f32.vlgmr.msra.gmra.mrb[4].mxu1 %vm1283_vm10, %v6349_v18 }
 0x41f   : > { %5583 = vmatprep.mubr.msk.f32.mxu1 %vm6116_vm9, %v6115_v13 }
 0x4ed   : > { %v1354_v36 = vpop.f32.mrb[2].mxu1 }
 0x4ee   : > { %v1435_v37 = vmul.f32 0.35355338, %v1354_v36  ;;  %v5575_v38 = vpop.f32.mrb[3].mxu1 }
 0x4f0   : > { %v1447_v39 = vadd.f32 %v6374_v35, %v1435_v37 }
 0x4f1   : > { %v1431_v41 = vpop.f32.mrb[4].mxu1 }
 0x4f2   : > { %v1436_v42 = vmul.f32 0.35355338, %v1431_v41  ;;  %v5580_v43 = vpop.f32.mrb[5].mxu1  ;;  %v1449_v44 = vsel %vm1283_vm10, %v1447_v39, -inf }
 0x4f3   : > { %1450 = vmax.xlane.f32.xlu1 %v1449_v44 }
 0x4f4   : > { %v1448_v45 = vadd.f32 %v6378_v40, %v1436_v42 }
 0x4f6   : > { %v1452_v46 = vsel %vm1283_vm10, %v1448_v45, -inf }
 0x4f7   : > { %1453 = vmax.xlane.f32.xlu0 %v1452_v46 }
 0x504   : > { %1471 = vrot.lane.b32.xlu1 %v6351_v20, %s6926_s2 }
 0x508   : > { %1625 = vrot.lane.b32.xlu1 %v6351_v20, %s6924_s21 }
 0x50d   : > { %1547 = vrot.lane.b32.xlu0 %v6349_v18, %s6926_s2  ;;  %s6604_s2 = scalar_lea.vmem %s6895_s15, %s6262_s19 }
 0x580   : > { %v1451_v47 = vpop.xlane.xlu1 %1450 }
 0x581   : > { %v1455_v48 = vsub.f32 %v1447_v39, %v1451_v47 }
 0x583   : > { %v1457_v49 = vmul.f32 1.442695, %v1455_v48 }
 0x584   : > { %v1472_v50 = vpop.permute.xlu1 %1471  ;;  %v1454_v51 = vpop.xlane.xlu0 %1453 }
 0x585   : > { %5988 = vpow2.f32 %v1457_v49  ;;  %v1456_v52 = vsub.f32 %v1448_v45, %v1454_v51  ;;  %5582 = vmatpush3.msra.mxu1 %v1472_v50 }
 0x586   : > { %5586 = vmatprep.subr.mxu1 %v6115_v13 }
 0x587   : > { %v1459_v53 = vmul.f32 1.442695, %v1456_v52 }
 0x588   : > { %v1626_v58 = vpop.permute.xlu1 %1625  ;;  %v1548_v59 = vpop.permute.xlu0 %1547 }
 0x589   : > { %5990 = vpow2.f32 %v1459_v53 }
 0x58f   : > { %v5989_v54 = vpop.eup %5988 }
 0x590   : > { %v1461_v55 = vsel %vm1283_vm10, %v5989_v54, 0.0 }
 0x591   : > { %1462 = vadd.xlane.f32.xlu1 %v1461_v55 }
 0x593   : > { %v5991_v56 = vpop.eup %5990 }
 0x594   : > { %v1464_v57 = vsel %vm1283_vm10, %v5991_v56, 0.0 }
 0x595   : > { %1465 = vadd.xlane.f32.xlu0 %v1464_v57 }
 0x5a2   : > { %1703 = vrot.lane.b32.xlu1 %v6349_v18, %s6924_s21 }
 0x5a6   : > { %1701 = vrot.lane.b32.xlu1 %v6349_v18, %s6922_s25 }
 0x5ab   : > { %1623 = vrot.lane.b32.xlu0 %v6351_v20, %s6922_s25  ;;  %s6945_s25 = smov 48  }
 0x61e   : > { %v1463_v60 = vpop.xlane.xlu1 %1462 }
 0x61f   : > { %5992 = vrcp.f32 %v1463_v60 }
 0x622   : > { %v1704_v61 = vpop.permute.xlu1 %1703  ;;  %v1466_v62 = vpop.xlane.xlu0 %1465 }
 0x623   : > { %5994 = vrcp.f32 %v1466_v62  ;;  %5597 = vmatpush3.xpose.msk.msra.mxu0 %vm1283_vm10, %v1704_v61 }
 0x624   : > { %5606 = vmatprep.subr.mxu0 %v6115_v13 }
 0x626   : > { %v1702_v63 = vpop.permute.xlu1 %1701  ;;  %v1624_v6 = vpop.permute.xlu0 %1623 }
 0x627   : > { %5599 = vmatmul.mubr.msk.f32.vlgmr.msra.gmra.mrb[2].mxu0 %vm1283_vm10, %v1702_v63 }
 0x628   : > { %5608 = vmatprep.mubr.msk.f32.mxu0 %vm6116_vm9, %v6115_v13 }
 0x629   : > { %v5993_v0 = vpop.eup %5992 }
 0x62a   : > { %v1469_v1 = vmul.f32 %v5993_v0, %v5989_v54 }
 0x62c   : > { %5584 = vmatmul.mubr.msk.f32.vlgmr.msra.gmra.mrb[6].mxu1 %vm1283_vm10, %v1469_v1 }
 0x62d   : > { %v5995_v3 = vpop.eup %5994  ;;  %5587 = vmatpush3.msra.mxu1 %v1548_v59  ;;  %5588 = vmatprep.mubr.msk.f32.mxu1 %vm6116_vm9, %v6115_v13 }
 0x62e   : > { %v1470_v5 = vmul.f32 %v5995_v3, %v5991_v56  ;;  %5591 = vmatprep.subr.mxu1 %v6115_v13 }
 0x630   : > { %5589 = vmatmul.mubr.msk.f32.vlgmr.msra.gmra.mrb[8].mxu1 %vm1283_vm10, %v1470_v5 }
 0x631   : > { %5593 = vmatprep.mubr.msk.f32.mxu1 %vm6116_vm9, %v6115_v13 }
 0x634   : > { %5592 = vmatpush3.xpose.msk.msra.mxu1 %vm1283_vm10, %v1626_v58 }
 0x635   : > { %5601 = vmatprep.subr.mxu1 %v6115_v13 }
 0x637   : > { %5594 = vmatmul.mubr.msk.f32.vlgmr.msra.gmra.mrb[10].mxu1 %vm1283_vm10, %v1624_v6 }
 0x638   : > { %5603 = vmatprep.mubr.msk.f32.mxu1 %vm6116_vm9, %v6115_v13 }
 0x6fa   : > { %v1775_v7 = vpop.f32.mrb[2].mxu0 }
 0x6fb   : > { %v1780_v8 = vmul.f32 0.35355338, %v1775_v7  ;;  %v5600_v10 = vpop.f32.mrb[3].mxu0 }
 0x6fd   : > { %v1782_v9 = vadd.f32 %v1780_v8, %v6378_v40 }
 0x6ff   : > { %v6416_v11 = vpop.f32.mrb[6].mxu1  ;;  %v1786_v14 = vsel %vm1283_vm10, %v1782_v9, -inf }
 0x700   : > { %1787 = vmax.xlane.f32.xlu1 %v1786_v14  ;;  %v5585_v16 = vpop.f32.mrb[7].mxu1 }
 0x703   : > { %v6419_v17 = vpop.f32.mrb[8].mxu1 }
 0x704   : > { %v5590_v19 = vpop.f32.mrb[9].mxu1 }
 0x70a   : > { %v1697_v21 = vpop.f32.mrb[10].mxu1 }
 0x70b   : > { %v1779_v22 = vmul.f32 0.35355338, %v1697_v21  ;;  %v5595_v23 = vpop.f32.mrb[11].mxu1 }
 0x70d   : > { %v1781_v24 = vadd.f32 %v1779_v22, %v6374_v35 }
 0x70f   : > { %v1783_v25 = vsel %vm1283_vm10, %v1781_v24, -inf }
 0x710   : > { %1784 = vmax.xlane.f32.xlu0 %v1783_v25 }
 0x711   : > { %1805 = vrot.lane.b32.xlu1 %v6351_v20, %s6920_s24 }
 0x715   : > { %1959 = vrot.lane.b32.xlu1 %v6351_v20, %s6918_s3 }
 0x719   : > { %2037 = vrot.lane.b32.xlu1 %v6349_v18, %s6918_s3  ;;  %s6552_s3 = scalar_lea.vmem %s6892_s12, %s6306_s28 }
 0x71d   : > { %2035 = vrot.lane.b32.xlu1 %v6349_v18, %s6910_s26 }
 0x78d   : > { %v1788_v26 = vpop.xlane.xlu1 %1787 }
 0x78e   : > { %v1790_v27 = vsub.f32 %v1782_v9, %v1788_v26 }
 0x790   : > { %v1793_v28 = vmul.f32 1.442695, %v1790_v27 }
 0x791   : > { %v1806_v29 = vpop.permute.xlu1 %1805 }
 0x792   : > { %5996 = vpow2.f32 %v1793_v28  ;;  %5602 = vmatpush3.msra.mxu1 %v1806_v29 }
 0x793   : > { %5611 = vmatprep.subr.mxu1 %v6115_v13 }
 0x795   : > { %v1960_v41 = vpop.permute.xlu1 %1959 }
 0x799   : > { %v2038_v43 = vpop.permute.xlu1 %2037 }
 0x79c   : > { %v5997_v30 = vpop.eup %5996 }
 0x79d   : > { %v1798_v31 = vsel %vm1283_vm10, %v5997_v30, 0.0  ;;  %v1785_v32 = vpop.xlane.xlu0 %1784  ;;  %v2036_v45 = vpop.permute.xlu1 %2035 }
 0x79e   : > { %1799 = vadd.xlane.f32.xlu0 %v1798_v31  ;;  %v1789_v33 = vsub.f32 %v1781_v24, %v1785_v32 }
 0x7a0   : > { %v1791_v34 = vmul.f32 1.442695, %v1789_v33 }
 0x7a2   : > { %5998 = vpow2.f32 %v1791_v34 }
 0x7ac   : > { %v5999_v36 = vpop.eup %5998 }
 0x7ad   : > { %v1795_v37 = vsel %vm1283_vm10, %v5999_v36, 0.0 }
 0x7b4   : > { %1881 = vrot.lane.b32.xlu0 %v6349_v18, %s6920_s24 }
 0x7d3   : > { %1796 = vadd.xlane.f32.xlu0 %v1795_v37 }
 0x7e9   : > { %1957 = vrot.lane.b32.xlu0 %v6351_v20, %s6910_s26  ;;  %s5380_s26 = sshll.u32 %s6246_s20, 7 }
 0x7ea   : > { %s6578_s21 = scalar_lea.vmem %s6894_s14, %s5380_s26  ;;  %s6943_s26 = smov 80  }
 0x82b   : > { %v1800_v38 = vpop.xlane.xlu0 %1799 }
 0x82c   : > { %6000 = vrcp.f32 %v1800_v38 }
 0x82f   : > { %v1882_v39 = vpop.permute.xlu0 %1881 }
 0x830   : > { %5607 = vmatpush3.msra.mxu0 %v1882_v39 }
 0x831   : > { %5616 = vmatprep.subr.mxu0 %v6115_v13 }
 0x836   : > { %v6001_v42 = vpop.eup %6000 }
 0x837   : > { %v1804_v44 = vmul.f32 %v6001_v42, %v5997_v30 }
 0x839   : > { %5609 = vmatmul.mubr.msk.f32.vlgmr.msra.gmra.mrb[4].mxu0 %vm1283_vm10, %v1804_v44 }
 0x83a   : > { %5617 = vmatpush3.xpose.msk.msra.mxu0 %vm1283_vm10, %v2038_v43  ;;  %5618 = vmatprep.mubr.msk.f32.mxu0 %vm6116_vm9, %v6115_v13 }
 0x83b   : > { %5626 = vmatprep.subr.mxu0 %v6115_v13 }
 0x83d   : > { %5619 = vmatmul.mubr.msk.f32.vlgmr.msra.gmra.mrb[6].mxu0 %vm1283_vm10, %v2036_v45 }
 0x83e   : > { %5628 = vmatprep.mubr.msk.f32.mxu0 %vm6116_vm9, %v6115_v13 }
 0x860   : > { %v1797_v46 = vpop.xlane.xlu0 %1796 }
 0x861   : > { %6002 = vrcp.f32 %v1797_v46 }
 0x864   : > { %v1958_v49 = vpop.permute.xlu0 %1957 }
 0x86b   : > { %v6003_v47 = vpop.eup %6002 }
 0x86c   : > { %v1803_v48 = vmul.f32 %v6003_v47, %v5999_v36 }
 0x86e   : > { %5604 = vmatmul.mubr.msk.f32.vlgmr.msra.gmra.mrb[12].mxu1 %vm1283_vm10, %v1803_v48 }
 0x86f   : > { %5612 = vmatpush3.xpose.msk.msra.mxu1 %vm1283_vm10, %v1960_v41  ;;  %5613 = vmatprep.mubr.msk.f32.mxu1 %vm6116_vm9, %v6115_v13 }
 0x870   : > { %5621 = vmatprep.subr.mxu1 %v6115_v13 }
 0x872   : > { %5614 = vmatmul.mubr.msk.f32.vlgmr.msra.gmra.mrb[14].mxu1 %vm1283_vm10, %v1958_v49 }
 0x873   : > { %5623 = vmatprep.mubr.msk.f32.mxu1 %vm6116_vm9, %v6115_v13 }
 0x90c   : > { %v6455_v50 = vpop.f32.mrb[4].mxu0 }
 0x90d   : > { %v5610_v51 = vpop.f32.mrb[5].mxu0 }
 0x910   : > { %v2109_v52 = vpop.f32.mrb[6].mxu0 }
 0x911   : > { %v2114_v53 = vmul.f32 0.35355338, %v2109_v52  ;;  %v5620_v54 = vpop.f32.mrb[7].mxu0 }
 0x913   : > { %v2116_v55 = vadd.f32 %v2114_v53, %v6378_v40 }
 0x915   : > { %v2120_v56 = vsel %vm1283_vm10, %v2116_v55, -inf }
 0x916   : > { %2121 = vmax.xlane.f32.xlu1 %v2120_v56 }
 0x927   : > { %2139 = vrot.lane.b32.xlu1 %v6351_v20, %s6906_s27 }
 0x92b   : > { %2293 = vrot.lane.b32.xlu1 %v6351_v20, %s6904_s29 }
 0x92f   : > { %2371 = vrot.lane.b32.xlu1 %v6349_v18, %s6904_s29  ;;  %s6908_s29 = smov 8  }
 0x933   : > { %2369 = vrot.lane.b32.xlu1 %v6349_v18, %s6902_s1 }
 0x941   : > { %v6467_v57 = vpop.f32.mrb[12].mxu1 }
 0x942   : > { %v5605_v58 = vpop.f32.mrb[13].mxu1 }
 0x945   : > { %v2031_v59 = vpop.f32.mrb[14].mxu1 }
 0x946   : > { %v2113_v60 = vmul.f32 0.35355338, %v2031_v59  ;;  %v5615_v61 = vpop.f32.mrb[15].mxu1 }
 0x948   : > { %v2115_v62 = vadd.f32 %v2113_v60, %v6374_v35 }
 0x94a   : > { %v2117_v63 = vsel %vm1283_vm10, %v2115_v62, -inf }
 0x94b   : > { %2118 = vmax.xlane.f32.xlu0 %v2117_v63 }
 0x9a3   : > { %v2122_v0 = vpop.xlane.xlu1 %2121 }
 0x9a4   : > { %v2124_v1 = vsub.f32 %v2116_v55, %v2122_v0 }
 0x9a6   : > { %v2127_v3 = vmul.f32 1.442695, %v2124_v1 }
 0x9a7   : > { %v2140_v5 = vpop.permute.xlu1 %2139 }
 0x9a8   : > { %6004 = vpow2.f32 %v2127_v3  ;;  %5622 = vmatpush3.msra.mxu1 %v2140_v5 }
 0x9a9   : > { %5631 = vmatprep.subr.mxu1 %v6115_v13 }
 0x9ab   : > { %v2294_v22 = vpop.permute.xlu1 %2293 }
 0x9af   : > { %v2372_v24 = vpop.permute.xlu1 %2371 }
 0x9b2   : > { %v6005_v6 = vpop.eup %6004 }
 0x9b3   : > { %v2132_v7 = vsel %vm1283_vm10, %v6005_v6, 0.0  ;;  %v2370_v26 = vpop.permute.xlu1 %2369 }
 0x9b4   : > { %2133 = vadd.xlane.f32.xlu0 %v2132_v7 }
 0x9ca   : > { %2215 = vrot.lane.b32.xlu0 %v6349_v18, %s6906_s27  ;;  %s6914_s27 = smov 16  }
 0x9d8   : > { %v2119_v8 = vpop.xlane.xlu0 %2118 }
 0x9d9   : > { %v2123_v10 = vsub.f32 %v2115_v62, %v2119_v8 }
 0x9db   : > { %v2125_v9 = vmul.f32 1.442695, %v2123_v10 }
 0x9dd   : > { %6006 = vpow2.f32 %v2125_v9 }
 0x9e7   : > { %v6007_v14 = vpop.eup %6006 }
 0x9e8   : > { %v2129_v16 = vsel %vm1283_vm10, %v6007_v14, 0.0 }
 0x9e9   : > { %2130 = vadd.xlane.f32.xlu0 %v2129_v16 }
 0x9ff   : > { %2291 = vrot.lane.b32.xlu0 %v6351_v20, %s6902_s1  ;;  %s6912_s1 = smov 40  }
 0xa41   : > { %v2134_v19 = vpop.xlane.xlu0 %2133 }
 0xa42   : > { %6008 = vrcp.f32 %v2134_v19 }
 0xa45   : > { %v2216_v21 = vpop.permute.xlu0 %2215 }
 0xa46   : > { %5627 = vmatpush3.msra.mxu0 %v2216_v21 }
 0xa47   : > { %5636 = vmatprep.subr.mxu0 %v6115_v13 }
 0xa4c   : > { %v6009_v23 = vpop.eup %6008 }
 0xa4d   : > { %v2138_v25 = vmul.f32 %v6009_v23, %v6005_v6 }
 0xa4f   : > { %5629 = vmatmul.mubr.msk.f32.vlgmr.msra.gmra.mrb[8].mxu0 %vm1283_vm10, %v2138_v25 }
 0xa50   : > { %5637 = vmatpush3.xpose.msk.msra.mxu0 %vm1283_vm10, %v2372_v24  ;;  %5638 = vmatprep.mubr.msk.f32.mxu0 %vm6116_vm9, %v6115_v13 }
 0xa51   : > { %5646 = vmatprep.subr.mxu0 %v6115_v13 }
 0xa53   : > { %5639 = vmatmul.mubr.msk.f32.vlgmr.msra.gmra.mrb[10].mxu0 %vm1283_vm10, %v2370_v26 }
 0xa54   : > { %5648 = vmatprep.mubr.msk.f32.mxu0 %vm6116_vm9, %v6115_v13 }
 0xa76   : > { %v2131_v27 = vpop.xlane.xlu0 %2130 }
 0xa77   : > { %6010 = vrcp.f32 %v2131_v27 }
 0xa7a   : > { %v2292_v30 = vpop.permute.xlu0 %2291 }
 0xa81   : > { %v6011_v28 = vpop.eup %6010 }
 0xa82   : > { %v2137_v29 = vmul.f32 %v6011_v28, %v6007_v14 }
 0xa84   : > { %5624 = vmatmul.mubr.msk.f32.vlgmr.msra.gmra.mrb[16].mxu1 %vm1283_vm10, %v2137_v29 }
 0xa85   : > { %5632 = vmatpush3.xpose.msk.msra.mxu1 %vm1283_vm10, %v2294_v22  ;;  %5633 = vmatprep.mubr.msk.f32.mxu1 %vm6116_vm9, %v6115_v13 }
 0xa86   : > { %5641 = vmatprep.subr.mxu1 %v6115_v13 }
 0xa88   : > { %5634 = vmatmul.mubr.msk.f32.vlgmr.msra.gmra.mrb[18].mxu1 %vm1283_vm10, %v2292_v30 }
 0xa89   : > { %5643 = vmatprep.mubr.msk.f32.mxu1 %vm6116_vm9, %v6115_v13 }
 0xb22   : > { %v2287_v31 = vpop.f32.mrb[8].mxu0 }
 0xb23   : > { %v5630_v32 = vpop.f32.mrb[9].mxu0 }
 0xb26   : > { %v2443_v33 = vpop.f32.mrb[10].mxu0 }
 0xb27   : > { %v2448_v34 = vmul.f32 0.35355338, %v2443_v33  ;;  %v5640_v36 = vpop.f32.mrb[11].mxu0 }
 0xb29   : > { %v2450_v37 = vadd.f32 %v2448_v34, %v6378_v40 }
 0xb2b   : > { %v2454_v38 = vsel %vm1283_vm10, %v2450_v37, -inf }
 0xb2c   : > { %2455 = vmax.xlane.f32.xlu1 %v2454_v38 }
 0xb3d   : > { %2473 = vrot.lane.b32.xlu1 %v6351_v20, %s6912_s1 }
 0xb41   : > { %2627 = vrot.lane.b32.xlu1 %v6467_v57, %s6908_s29 }
 0xb45   : > { %2629 = vrot.lane.b32.xlu1 %v6455_v50, %s6908_s29  ;;  %s6593_s29 = scalar_lea.vmem %s6893_s13, %s6262_s19 }
 0xb49   : > { %2637 = vrot.lane.b32.xlu1 %v2287_v31, %s6914_s27 }
 0xb57   : > { %v2211_v39 = vpop.f32.mrb[16].mxu1 }
 0xb58   : > { %v5625_v41 = vpop.f32.mrb[17].mxu1 }
 0xb5b   : > { %v2365_v42 = vpop.f32.mrb[18].mxu1 }
 0xb5c   : > { %v2447_v43 = vmul.f32 0.35355338, %v2365_v42  ;;  %v5635_v44 = vpop.f32.mrb[19].mxu1 }
 0xb5e   : > { %v2449_v45 = vadd.f32 %v2447_v43, %v6374_v35 }
 0xb60   : > { %v2451_v46 = vsel %vm1283_vm10, %v2449_v45, -inf }
 0xb61   : > { %2452 = vmax.xlane.f32.xlu0 %v2451_v46 }
 0xbb9   : > { %v2456_v20 = vpop.xlane.xlu1 %2455 }
 0xbba   : > { %v2458_v47 = vsub.f32 %v2450_v37, %v2456_v20 }
 0xbbc   : > { %v2461_v48 = vmul.f32 1.442695, %v2458_v47  ;;  %v2791_v47 = vld [vmem:[%s6552_s3 + $0x8] sm:$0xff] }
 0xbbd   : > { %v2474_v49 = vpop.permute.xlu1 %2473 }
 0xbbe   : > { %6012 = vpow2.f32 %v2461_v48  ;;  %5642 = vmatpush3.msra.mxu1 %v2474_v49  ;;  %v2792_v49 = vld [vmem:[%s6552_s3 + $0x10] sm:$0xff] }
 0xbc1   : > { %v2628_v14 = vpop.permute.xlu1 %2627 }
 0xbc2   : > { %v2649_v22 = vsel %vm1283_vm10, %v6416_v11, %v2628_v14 }
 0xbc5   : > { %v2630_v16 = vpop.permute.xlu1 %2629 }
 0xbc6   : > { %v2650_v24 = vsel %vm1283_vm10, %v6419_v17, %v2630_v16  ;;  %v2904_v16 = vld [vmem:[%s6578_s21 + $0x20] sm:$0xff] }
 0xbc8   : > { %v6013_v50 = vpop.eup %6012 }
 0xbc9   : > { %v2466_v51 = vsel %vm1283_vm10, %v6013_v50, 0.0  ;;  %v2638_v19 = vpop.permute.xlu1 %2637 }
 0xbca   : > { %2467 = vadd.xlane.f32.xlu0 %v2466_v51  ;;  %v2653_v27 = vsel %vm2651_vm11, %v2650_v24, %v2638_v19  ;;  %v2905_v19 = vld [vmem:[%s6578_s21 + $0x28] sm:$0xff] }
 0xbee   : > { %v2453_v52 = vpop.xlane.xlu0 %2452 }
 0xbef   : > { %v2457_v53 = vsub.f32 %v2449_v45, %v2453_v52 }
 0xbf1   : > { %v2459_v54 = vmul.f32 1.442695, %v2457_v53 }
 0xbf3   : > { %6014 = vpow2.f32 %v2459_v54 }
 0xbfd   : > { %v6015_v55 = vpop.eup %6014 }
 0xbfe   : > { %v2463_v56 = vsel %vm1283_vm10, %v6015_v55, 0.0 }
 0xbff   : > { %2464 = vadd.xlane.f32.xlu0 %v2463_v56 }
 0xc15   : > { %2549 = vrot.lane.b32.xlu0 %v6349_v18, %s6912_s1  ;;  %s6517_s1 = scalar_lea.vmem %s6889_s9, %s6306_s28  ;;  %s5378_s28 = sshll.u32 %s6246_s20, 2 }
 0xc16   : > { %v2657_v18 = vld [vmem:[%s6517_s1] sm:$0xff]  ;;  %v2658_v0 = vld [vmem:[%s6517_s1 + $0x8] sm:$0xff]  ;;  %v2659_v1 = vld [vmem:[%s6517_s1 + $0x10] sm:$0xff]  ;;  %s6564_s24 = scalar_lea.vmem %s6891_s11, %s5378_s28  ;;  %s6939_s20 = smov 64  }
 0xc17   : > { %v5867_v3 = vpack.c.bf16 %v2658_v0, %v2657_v18  ;;  %v2660_v5 = vld [vmem:[%s6517_s1 + $0x18] sm:$0xff] }
 0xc18   : > { %v5871_v6 = vpack.c.bf16 %v2660_v5, %v2659_v1 }
 0xc19   : > { %2635 = vrot.lane.b32.xlu0 %v2211_v39, %s6914_s27  ;;  %5868 = vmatprep.subr.bf16.mxu1 %v5867_v3  ;;  %s6916_s27 = smov 24  }
 0xc57   : > { %v2468_v57 = vpop.xlane.xlu0 %2467 }
 0xc58   : > { %6016 = vrcp.f32 %v2468_v57 }
 0xc62   : > { %v6017_v59 = vpop.eup %6016 }
 0xc63   : > { %v2472_v60 = vmul.f32 %v6017_v59, %v6013_v50  ;;  %v2793_v50 = vld [vmem:[%s6552_s3 + $0x18] sm:$0xff] }
 0xc64   : > { %v5879_v51 = vpack.c.bf16 %v2793_v50, %v2792_v49 }
 0xc8c   : > { %v2465_v58 = vpop.xlane.xlu0 %2464 }
 0xc8d   : > { %6018 = vrcp.f32 %v2465_v58  ;;  %v2751_v58 = vld [vmem:[%s6564_s24] sm:$0x3] }
 0xc8e   : > { %v2781_v59 = vrot.slane %v2751_v58, %v6324_v2 }
 0xc90   : > { %v2550_v61 = vpop.permute.xlu0 %2549 }
 0xc91   : > { %5647 = vmatpush3.msra.mxu0 %v2550_v61 }
 0xc92   : > { %5649 = vmatmul.mubr.msk.f32.vlgmr.msra.gmra.mrb[12].mxu0 %vm1283_vm10, %v2472_v60 }
 0xc94   : > { %v2636_v21 = vpop.permute.xlu0 %2635 }
 0xc95   : > { %v2652_v25 = vsel %vm2651_vm11, %v2649_v22, %v2636_v21  ;;  %v5891_v21 = vpack.c.bf16 %v2905_v19, %v2904_v16  ;;  %v2906_v22 = vld [vmem:[%s6578_s21 + $0x30] sm:$0xff] }
 0xc97   : > { %v6019_v62 = vpop.eup %6018 }
 0xc98   : > { %v2471_v63 = vmul.f32 %v6019_v62, %v6015_v55  ;;  %v2787_v62 = vrot.slane %v2751_v58, %v6326_v4 }
 0xc9a   : > { %5644 = vmatmul.mubr.msk.f32.vlgmr.msra.gmra.mrb[20].mxu1 %vm1283_vm10, %v2471_v63 }
 0xc9b   : > { %5870 = vmatpush3.bf16.msra.mxu1 %v5867_v3 }
 0xc9c   : > { %5872 = vmatprep.subr.bf16.mxu1 %v5871_v6 }
 0xc9f   : > { %5874 = vmatpush3.bf16.msra.mxu1 %v5871_v6  ;;  %v2900_v6 = vld [vmem:[%s6578_s21] sm:$0xff] }
 0xd65   : > { %v2621_v7 = vpop.f32.mrb[12].mxu0 }
 0xd66   : > { %2645 = vrot.lane.b32.xlu1 %v2621_v7, %s6916_s27  ;;  %v5650_v8 = vpop.f32.mrb[13].mxu0  ;;  %v2901_v7 = vld [vmem:[%s6578_s21 + $0x8] sm:$0xff] }
 0xd67   : > { %v5883_v8 = vpack.c.bf16 %v2901_v7, %v2900_v6 }
 0xd69   : > { %5884 = vmatprep.subr.bf16.mxu1 %v5883_v8 }
 0xd6d   : > { %v2545_v10 = vpop.f32.mrb[20].mxu1 }
 0xd6e   : > { %2643 = vrot.lane.b32.xlu0 %v2545_v10, %s6916_s27  ;;  %v5645_v9 = vpop.f32.mrb[21].mxu1  ;;  %s6539_s27 = scalar_lea.vmem %s6890_s10, %s6262_s19  ;;  %v2902_v10 = vld [vmem:[%s6578_s21 + $0x10] sm:$0xff]  ;;  %s6944_s19 = smov 112  }
 0xd6f   : > { %v5296_v11 = vld [vmem:[%s6539_s27] ss:$0 sm:$0xff]  ;;  %v2903_v9 = vld [vmem:[%s6578_s21 + $0x18] sm:$0xff] }
 0xd70   : > { %v5887_v14 = vpack.c.bf16 %v2903_v9, %v2902_v10 }
 0xdd8   : > { %v2646_v23 = vpop.permute.xlu1 %2645 }
 0xdd9   : > { %v2656_v29 = vsel %vm2654_vm12, %v2653_v27, %v2646_v23  ;;  %v2907_v23 = vld [vmem:[%s6578_s21 + $0x38] sm:$0xff] }
 0xdda   : > { %v5895_v24 = vpack.c.bf16 %v2907_v23, %v2906_v22 }
 0xde0   : > { %v2644_v26 = vpop.permute.xlu0 %2643 }
 0xde1   : > { %v2655_v28 = vsel %vm2654_vm12, %v2652_v25, %v2644_v26  ;;  %v5299_v25 = vld [vmem:[%s6593_s29] ss:$0 sm:$0xff] }
 0xde2   : > { %5659 = vmatprep.mubr.msk.f32.mxu1 %vm1121_vm8, %v2655_v28 }
 0xde3   : > { %5660 = vmatmul.mubr.msk.f32.vlgmr.msra.gmra.mrb[22].mxu1 %vm1121_vm8, %v2656_v29 }
 0xde4   : > { %5886 = vmatpush3.bf16.msra.mxu1 %v5883_v8 }
 0xde5   : > { %5888 = vmatprep.subr.bf16.mxu1 %v5887_v14 }
 0xde8   : > { %5890 = vmatpush3.bf16.msra.mxu1 %v5887_v14 }
 0xde9   : > { %5892 = vmatprep.subr.bf16.mxu1 %v5891_v21 }
 0xdec   : > { %5894 = vmatpush3.bf16.msra.mxu1 %v5891_v21 }
 0xded   : > { %5896 = vmatprep.subr.bf16.mxu1 %v5895_v24 }
 0xdf0   : > { %5898 = vmatpush3.bf16.msra.mxu1 %v5895_v24 }
 0xdf1   : > { %5713 = vmatprep.subr.mxu1 %v6115_v13 }
 0xeb6   : > { %v5661_v17 = vpop.f32.mrb[22].mxu1 }
 0xeb7   : > { %v2746_v30 = vadd.f32 %v5661_v17, %v5296_v11  ;;  %v2740_v31 = vpop.f32.mrb[23].mxu1 }
 0xeb8   : > { %v2741_v32 = vadd.f32 %v5296_v11, %v2740_v31 }
 0xeb9   : > { %v2750_v33 = vadd.f32 %v2746_v30, %v6334_v15  ;;  %v2790_v15 = vld [vmem:[%s6552_s3] sm:$0xff] }
 0xeba   : > { %v2749_v34 = vadd.f32 %v2741_v32, %v6330_v12  ;;  %v5875_v48 = vpack.c.bf16 %v2791_v47, %v2790_v15 }
 0xebb   : > { %v2755_v36 = vsel %vm1121_vm8, %v2750_v33, 0.0 }
 0xebc   : > { %2756 = vadd.xlane.f32.xlu1 %v2755_v36  ;;  %v2752_v37 = vsel %vm1121_vm8, %v2749_v34, 0.0  ;;  %5876 = vmatprep.subr.bf16.mxu0 %v5875_v48 }
 0xebd   : > { %2753 = vadd.xlane.f32.xlu0 %v2752_v37  ;;  %5878 = vmatpush3.bf16.msra.mxu0 %v5875_v48 }
 0xebe   : > { %5880 = vmatprep.subr.bf16.mxu0 %v5879_v51 }
 0xec1   : > { %5882 = vmatpush3.bf16.msra.mxu0 %v5879_v51 }
 0xf49   : > { %v2757_v38 = vpop.xlane.xlu1 %2756 }
 0xf4a   : > { %v2759_v39 = vmul.f32 0.03125, %v2757_v38  ;;  %v2754_v41 = vpop.xlane.xlu0 %2753 }
 0xf4b   : > { %v2758_v42 = vmul.f32 0.03125, %v2754_v41 }
 0xf4c   : > { %v2761_v43 = vsub.f32 %v2750_v33, %v2759_v39 }
 0xf4d   : > { %v2760_v44 = vsub.f32 %v2749_v34, %v2758_v42 }
 0xf4e   : > { %v2763_v20 = vmul.f32 %v2761_v43, %v2761_v43 }
 0xf4f   : > { %v2762_v45 = vmul.f32 %v2760_v44, %v2760_v44 }
 0xf50   : > { %v2767_v12 = vsel %vm1121_vm8, %v2763_v20, 0.0 }
 0xf51   : > { %v2764_v46 = vsel %vm1121_vm8, %v2762_v45, 0.0 }
 0xf52   : > { %2765 = vadd.xlane.f32.xlu0 %v2764_v46 }
 0xf56   : > { %2768 = vadd.xlane.f32.xlu0 %v2767_v12  ;;  %v5302_v12 = vld [vmem:[%s6604_s2] ss:$0 sm:$0xff] }
 0xfdf   : > { %v2766_v52 = vpop.xlane.xlu0 %2765 }
 0xfe0   : > { %v2770_v53 = vmul.f32 0.03125, %v2766_v52 }
 0xfe2   : > { %v2772_v54 = vadd.f32 1e-12, %v2770_v53 }
 0xfe3   : > { %v2769_v55 = vpop.xlane.xlu0 %2768 }
 0xfe4   : > { %6020 = vrsqrt.f32 %v2772_v54  ;;  %v2771_v56 = vmul.f32 0.03125, %v2769_v55 }
 0xfe6   : > { %v2773_v57 = vadd.f32 1e-12, %v2771_v56 }
 0xfe8   : > { %6022 = vrsqrt.f32 %v2773_v57 }
 0xfee   : > { %v6021_v60 = vpop.eup %6020 }
 0xfef   : > { %v2776_v61 = vmul.f32 %v6021_v60, %v2760_v44 }
 0xff1   : > { %v2782_v63 = vmul.f32 %v2781_v59, %v2776_v61 }
 0xff2   : > { %v6023_v18 = vpop.eup %6022 }
 0xff3   : > { %v2777_v0 = vmul.f32 %v6023_v18, %v2761_v43  ;;  %v6569_v1 = vadd.f32 %v2787_v62, %v2782_v63  ;;  %v5305_v18 = vld [vmem:[%s6312_s22 + $0x20] sm:$0xff] }
 0xff5   : > { %v2783_v3 = vmul.f32 %v2781_v59, %v2777_v0  ;;  %5670 = vmatprep.mubr.msk.f32.mxu0 %vm1121_vm8, %v6569_v1  ;;  %v5306_v0 = vld [vmem:[%s6312_s22 + $0x28] sm:$0xff] }
 0xff7   : > { %v2789_v5 = vadd.f32 %v2787_v62, %v2783_v3  ;;  %v5307_v3 = vld [vmem:[%s6312_s22 + $0x30] sm:$0xff] }
 0xff9   : > { %5671 = vmatmul.mubr.msk.f32.vlgmr.msra.gmra.mrb[14].mxu0 %vm1121_vm8, %v2789_v5 }
0x10cc   : > { %v5672_v26 = vpop.f32.mrb[14].mxu0 }
0x10cd   : > { %v2879_v27 = vadd.f32 %v5672_v26, %v5299_v25  ;;  %v2873_v28 = vpop.f32.mrb[15].mxu0 }
0x10ce   : > { %v2874_v29 = vadd.f32 %v5299_v25, %v2873_v28 }
0x10cf   : > { %v2885_v11 = vmul.f32 0.044715, %v2879_v27  ;;  %v2883_v45 = vmul.f32 0.5, %v2879_v27 }
0x10d0   : > { %v2884_v17 = vmul.f32 0.044715, %v2874_v29  ;;  %v2882_v43 = vmul.f32 0.5, %v2874_v29 }
0x10d1   : > { %v2887_v30 = vmul.f32 %v2885_v11, %v2879_v27 }
0x10d2   : > { %v2886_v31 = vmul.f32 %v2884_v17, %v2874_v29  ;;  %v5310_v17 = vld [vmem:[%s6346_s18 + $0x1] ss:$0 sm:$0xff]  ;;  %s6940_s18 = smov 88  }
0x10d3   : > { %v2889_v32 = vmul.f32 %v2887_v30, %v2879_v27 }
0x10d4   : > { %v2888_v33 = vmul.f32 %v2886_v31, %v2874_v29 }
0x10d5   : > { %v2891_v34 = vadd.f32 %v2889_v32, %v2879_v27 }
0x10d6   : > { %v2890_v36 = vadd.f32 %v2888_v33, %v2874_v29 }
0x10d7   : > { %v2893_v37 = vmul.f32 0.7978846, %v2891_v34 }
0x10d8   : > { %v2892_v38 = vmul.f32 0.7978846, %v2890_v36 }
0x10d9   : > { %6024 = vtanh.f32 %v2893_v37 }
0x10da   : > { %6026 = vtanh.f32 %v2892_v38 }
0x10e3   : > { %v6025_v39 = vpop.eup %6024 }
0x10e4   : > { %v6027_v41 = vpop.eup %6026  ;;  %v2897_v42 = vadd.f32 1.0, %v6025_v39 }
0x10e5   : > { %v2896_v44 = vadd.f32 1.0, %v6027_v41 }
0x10e6   : > { %v2899_v20 = vmul.f32 %v2897_v42, %v2883_v45 }
0x10e7   : > { %v2898_v46 = vmul.f32 %v2896_v44, %v2882_v43 }
0x10e9   : > { %5689 = vmatprep.mubr.msk.f32.mxu1 %vm2915_vm13, %v2898_v46 }
0x10ea   : > { %5690 = vmatmul.mubr.msk.f32.vlgmr.msra.gmra.mrb[24].mxu1 %vm2915_vm13, %v2899_v20 }
0x10eb   : > { %5715 = vmatprep.mubr.msk.f32.mxu1 %vm6116_vm9, %v6115_v13 }
0x11bd   : > { %v5691_v15 = vpop.f32.mrb[24].mxu1 }
0x11be   : > { %v2994_v47 = vadd.f32 %v5691_v15, %v5302_v12  ;;  %v2988_v48 = vpop.f32.mrb[25].mxu1 }
0x11bf   : > { %v2989_v49 = vadd.f32 %v5302_v12, %v2988_v48 }
0x11c0   : > { %v2998_v50 = vadd.f32 %v2994_v47, %v2789_v5  ;;  %v5308_v5 = vld [vmem:[%s6312_s22 + $0x38] sm:$0xff]  ;;  %s6622_s22 = scalar_lea.vmem %s6896_s16, %s5378_s28  ;;  %s6942_s28 = smov 56  }
0x11c1   : > { %v2997_v51 = vadd.f32 %v2989_v49, %v6569_v1  ;;  %v5899_v1 = vpack.c.bf16 %v5306_v0, %v5305_v18  ;;  %v5903_v6 = vpack.c.bf16 %v5308_v5, %v5307_v3  ;;  %v2999_v19 = vld [vmem:[%s6622_s22] sm:$0x3] }
0x11c2   : > { %v3003_v52 = vsel %vm1121_vm8, %v2998_v50, 0.0  ;;  %v3029_v21 = vrot.slane %v2999_v19, %v6324_v2  ;;  %v3035_v26 = vrot.slane %v2999_v19, %v6326_v4 }
0x11c3   : > { %3004 = vadd.xlane.f32.xlu0 %v3003_v52  ;;  %v3000_v53 = vsel %vm1121_vm8, %v2997_v51, 0.0  ;;  %5900 = vmatprep.subr.bf16.mxu0 %v5899_v1 }
0x11c4   : > { %3001 = vadd.xlane.f32.xlu1 %v3000_v53  ;;  %5902 = vmatpush3.bf16.msra.mxu0 %v5899_v1 }
0x11c5   : > { %5904 = vmatprep.subr.bf16.mxu0 %v5903_v6 }
0x11c8   : > { %5906 = vmatpush3.bf16.msra.mxu0 %v5903_v6 }
0x11c9   : > { %5703 = vmatprep.subr.mxu0 %v6115_v13 }
0x1250   : > { %v3005_v54 = vpop.xlane.xlu0 %3004 }
0x1251   : > { %v3007_v55 = vmul.f32 0.03125, %v3005_v54  ;;  %v3002_v56 = vpop.xlane.xlu1 %3001 }
0x1252   : > { %v3006_v57 = vmul.f32 0.03125, %v3002_v56 }
0x1253   : > { %v3009_v58 = vsub.f32 %v2998_v50, %v3007_v55 }
0x1254   : > { %v3008_v59 = vsub.f32 %v2997_v51, %v3006_v57 }
0x1255   : > { %v3011_v60 = vmul.f32 %v3009_v58, %v3009_v58 }
0x1256   : > { %v3010_v61 = vmul.f32 %v3008_v59, %v3008_v59 }
0x1257   : > { %v3015_v62 = vsel %vm1121_vm8, %v3011_v60, 0.0 }
0x1258   : > { %3016 = vadd.xlane.f32.xlu0 %v3015_v62  ;;  %v3012_v63 = vsel %vm1121_vm8, %v3010_v61, 0.0 }
0x1259   : > { %3013 = vadd.xlane.f32.xlu1 %v3012_v63 }
0x12e5   : > { %v3017_v7 = vpop.xlane.xlu0 %3016 }
0x12e6   : > { %v3019_v8 = vmul.f32 0.03125, %v3017_v7  ;;  %v3014_v10 = vpop.xlane.xlu1 %3013 }
0x12e7   : > { %v3018_v9 = vmul.f32 0.03125, %v3014_v10 }
0x12e8   : > { %v3021_v14 = vadd.f32 1e-12, %v3019_v8 }
0x12e9   : > { %v3020_v16 = vadd.f32 1e-12, %v3018_v9 }
0x12ea   : > { %6028 = vrsqrt.f32 %v3021_v14 }
0x12eb   : > { %6030 = vrsqrt.f32 %v3020_v16 }
0x12f4   : > { %v6029_v22 = vpop.eup %6028 }
0x12f5   : > { %v6031_v23 = vpop.eup %6030  ;;  %v3025_v24 = vmul.f32 %v6029_v22, %v3009_v58 }
0x12f6   : > { %v3024_v25 = vmul.f32 %v6031_v23, %v3008_v59 }
0x12f7   : > { %v3031_v27 = vmul.f32 %v3029_v21, %v3025_v24 }
0x12f8   : > { %v3030_v28 = vmul.f32 %v3029_v21, %v3024_v25 }
0x12f9   : > { %v6629_v11 = vadd.f32 %v3035_v26, %v3031_v27 }
0x12fa   : > { %v6627_v29 = vadd.f32 %v3035_v26, %v3030_v28 }
0x12fc   : > { %5700 = vmatprep.mubr.msk.f32.mxu0 %vm1121_vm8, %v6627_v29 }
0x12fd   : > { %5701 = vmatmul.mubr.msk.f32.vlgmr.msra.gmra.mrb[16].mxu0 %vm1121_vm8, %v6629_v11 }
0x12fe   : > { %5705 = vmatprep.mubr.msk.f32.mxu0 %vm6116_vm9, %v6115_v13 }
0x13d0   : > { %v5702_v30 = vpop.f32.mrb[16].mxu0 }
0x13d1   : > { %v6638_v31 = vadd.f32 %v5702_v30, %v5310_v17  ;;  %v3123_v32 = vpop.f32.mrb[17].mxu0 }
0x13d2   : > { %v6640_v33 = vadd.f32 %v5310_v17, %v3123_v32 }
0x13d3   : > { %3210 = vrot.lane.b32.xlu0 %v6638_v31, %s6117_s23 }
0x13d4   : > { %3133 = vrot.lane.b32.xlu1 %v6640_v33, %s6117_s23  ;;  %s6941_s23 = smov 120  }
0x1445   : > { %v3211_v36 = vpop.permute.xlu0 %3210 }
0x1446   : > { %v3134_v34 = vpop.permute.xlu1 %3133 }
0x1447   : > { %5704 = vmatpush3.xpose.msk.msra.mxu0 %vm1283_vm10, %v3134_v34 }
0x1448   : > { %5708 = vmatprep.subr.mxu0 %v6115_v13 }
0x144a   : > { %5706 = vmatmul.mubr.msk.f32.vlgmr.msra.gmra.mrb[18].mxu0 %vm1283_vm10, %v6640_v33 }
0x144b   : > { %5709 = vmatpush3.xpose.msk.msra.mxu0 %vm1283_vm10, %v3211_v36  ;;  %5710 = vmatprep.mubr.msk.f32.mxu0 %vm6116_vm9, %v6115_v13 }
0x144c   : > { %5718 = vmatprep.subr.mxu0 %v6115_v13 }
0x144e   : > { %5711 = vmatmul.mubr.msk.f32.vlgmr.msra.gmra.mrb[20].mxu0 %vm1283_vm10, %v6638_v31 }
0x144f   : > { %5720 = vmatprep.mubr.msk.f32.mxu0 %vm6116_vm9, %v6115_v13 }
0x151d   : > { %v3205_v37 = vpop.f32.mrb[18].mxu0 }
0x151e   : > { %v3286_v38 = vmul.f32 0.35355338, %v3205_v37  ;;  %v5707_v39 = vpop.f32.mrb[19].mxu0 }
0x1520   : > { %v3288_v41 = vadd.f32 %v3286_v38, %v6374_v35 }
0x1521   : > { %v3282_v42 = vpop.f32.mrb[20].mxu0 }
0x1522   : > { %v3287_v43 = vmul.f32 0.35355338, %v3282_v42  ;;  %v5712_v44 = vpop.f32.mrb[21].mxu0  ;;  %v3290_v45 = vsel %vm1283_vm10, %v3288_v41, -inf }
0x1523   : > { %3291 = vmax.xlane.f32.xlu1 %v3290_v45 }
0x1524   : > { %v3289_v46 = vadd.f32 %v3287_v43, %v6378_v40 }
0x1526   : > { %v3293_v20 = vsel %vm1283_vm10, %v3289_v46, -inf }
0x1527   : > { %3294 = vmax.xlane.f32.xlu0 %v3293_v20 }
0x1534   : > { %3312 = vrot.lane.b32.xlu1 %v6640_v33, %s6939_s20 }
0x1538   : > { %3466 = vrot.lane.b32.xlu1 %v6640_v33, %s6940_s18 }
0x153c   : > { %3544 = vrot.lane.b32.xlu1 %v6638_v31, %s6940_s18  ;;  %s6947_s18 = smov 104  }
0x153d   : > { %3388 = vrot.lane.b32.xlu0 %v6638_v31, %s6939_s20  ;;  %s6946_s20 = smov 72  }
0x15b0   : > { %v3292_v12 = vpop.xlane.xlu1 %3291 }
0x15b1   : > { %v3296_v15 = vsub.f32 %v3288_v41, %v3292_v12 }
0x15b3   : > { %v3298_v47 = vmul.f32 1.442695, %v3296_v15 }
0x15b4   : > { %v3313_v48 = vpop.permute.xlu1 %3312  ;;  %v3295_v49 = vpop.xlane.xlu0 %3294 }
0x15b5   : > { %6032 = vpow2.f32 %v3298_v47  ;;  %v3297_v50 = vsub.f32 %v3289_v46, %v3295_v49  ;;  %5714 = vmatpush3.msra.mxu1 %v3313_v48 }
0x15b6   : > { %5723 = vmatprep.subr.mxu1 %v6115_v13 }
0x15b7   : > { %v3300_v51 = vmul.f32 1.442695, %v3297_v50 }
0x15b8   : > { %v3389_v52 = vpop.permute.xlu0 %3388  ;;  %v3467_v57 = vpop.permute.xlu1 %3466 }
0x15b9   : > { %6034 = vpow2.f32 %v3300_v51  ;;  %5719 = vmatpush3.msra.mxu0 %v3389_v52 }
0x15ba   : > { %5728 = vmatprep.subr.mxu0 %v6115_v13 }
0x15bc   : > { %v3545_v58 = vpop.permute.xlu1 %3544 }
0x15bf   : > { %v6033_v53 = vpop.eup %6032 }
0x15c0   : > { %v3302_v54 = vsel %vm1283_vm10, %v6033_v53, 0.0 }
0x15c1   : > { %3303 = vadd.xlane.f32.xlu1 %v3302_v54 }
0x15c3   : > { %v6035_v55 = vpop.eup %6034 }
0x15c4   : > { %v3305_v56 = vsel %vm1283_vm10, %v6035_v55, 0.0 }
0x15c5   : > { %3306 = vadd.xlane.f32.xlu0 %v3305_v56 }
0x15d2   : > { %3542 = vrot.lane.b32.xlu1 %v6638_v31, %s6941_s23 }
0x15db   : > { %3464 = vrot.lane.b32.xlu0 %v6640_v33, %s6941_s23  ;;  %s6948_s23 = smov 40  }
0x164e   : > { %v3304_v59 = vpop.xlane.xlu1 %3303 }
0x164f   : > { %6036 = vrcp.f32 %v3304_v59 }
0x1652   : > { %v3307_v60 = vpop.xlane.xlu0 %3306  ;;  %v3543_v1 = vpop.permute.xlu1 %3542 }
0x1653   : > { %6038 = vrcp.f32 %v3307_v60 }
0x1656   : > { %v3465_v0 = vpop.permute.xlu0 %3464 }
0x1659   : > { %v6037_v61 = vpop.eup %6036 }
0x165a   : > { %v3310_v62 = vmul.f32 %v6037_v61, %v6033_v53 }
0x165c   : > { %5716 = vmatmul.mubr.msk.f32.vlgmr.msra.gmra.mrb[26].mxu1 %vm1283_vm10, %v3310_v62 }
0x165d   : > { %v6039_v63 = vpop.eup %6038  ;;  %5724 = vmatpush3.xpose.msk.msra.mxu1 %vm1283_vm10, %v3467_v57  ;;  %5725 = vmatprep.mubr.msk.f32.mxu1 %vm6116_vm9, %v6115_v13 }
0x165e   : > { %v3311_v18 = vmul.f32 %v6039_v63, %v6035_v55  ;;  %5733 = vmatprep.subr.mxu1 %v6115_v13 }
0x1660   : > { %5721 = vmatmul.mubr.msk.f32.vlgmr.msra.gmra.mrb[22].mxu0 %vm1283_vm10, %v3311_v18  ;;  %5726 = vmatmul.mubr.msk.f32.vlgmr.msra.gmra.mrb[28].mxu1 %vm1283_vm10, %v3465_v0 }
0x1661   : > { %5729 = vmatpush3.xpose.msk.msra.mxu0 %vm1283_vm10, %v3545_v58  ;;  %5730 = vmatprep.mubr.msk.f32.mxu0 %vm6116_vm9, %v6115_v13 }
0x1662   : > { %5738 = vmatprep.subr.mxu0 %v6115_v13  ;;  %5735 = vmatprep.mubr.msk.f32.mxu1 %vm6116_vm9, %v6115_v13 }
0x1664   : > { %5731 = vmatmul.mubr.msk.f32.vlgmr.msra.gmra.mrb[24].mxu0 %vm1283_vm10, %v3543_v1 }
0x1665   : > { %5740 = vmatprep.mubr.msk.f32.mxu0 %vm6116_vm9, %v6115_v13 }
0x172f   : > { %v6694_v3 = vpop.f32.mrb[26].mxu1 }
0x1730   : > { %v5717_v5 = vpop.f32.mrb[27].mxu1 }
0x1733   : > { %v6696_v6 = vpop.f32.mrb[22].mxu0  ;;  %v3538_v7 = vpop.f32.mrb[28].mxu1 }
0x1734   : > { %v3620_v8 = vmul.f32 0.35355338, %v3538_v7  ;;  %v5722_v10 = vpop.f32.mrb[23].mxu0  ;;  %v5727_v9 = vpop.f32.mrb[29].mxu1 }
0x1736   : > { %v3622_v14 = vadd.f32 %v3620_v8, %v6374_v35 }
0x1737   : > { %v3616_v16 = vpop.f32.mrb[24].mxu0 }
0x1738   : > { %v3621_v19 = vmul.f32 0.35355338, %v3616_v16  ;;  %v5732_v21 = vpop.f32.mrb[25].mxu0  ;;  %v3624_v22 = vsel %vm1283_vm10, %v3622_v14, -inf }
0x1739   : > { %3625 = vmax.xlane.f32.xlu0 %v3624_v22 }
0x173a   : > { %v3623_v23 = vadd.f32 %v3621_v19, %v6378_v40 }
0x173c   : > { %v3627_v24 = vsel %vm1283_vm10, %v3623_v23, -inf }
0x173d   : > { %3628 = vmax.xlane.f32.xlu1 %v3627_v24 }
0x174e   : > { %3646 = vrot.lane.b32.xlu1 %v6640_v33, %s6942_s28 }
0x174f   : > { %3722 = vrot.lane.b32.xlu0 %v6638_v31, %s6942_s28  ;;  %s6949_s28 = smov 8  }
0x1752   : > { %3800 = vrot.lane.b32.xlu1 %v6640_v33, %s6943_s26 }
0x1756   : > { %3878 = vrot.lane.b32.xlu1 %v6638_v31, %s6943_s26  ;;  %s6950_s26 = smov 16  }
0x175a   : > { %3876 = vrot.lane.b32.xlu1 %v6638_v31, %s6944_s19 }
0x17c6   : > { %v3626_v25 = vpop.xlane.xlu0 %3625 }
0x17c7   : > { %v3630_v26 = vsub.f32 %v3622_v14, %v3626_v25 }
0x17c9   : > { %v3632_v27 = vmul.f32 1.442695, %v3630_v26 }
0x17ca   : > { %v3723_v28 = vpop.permute.xlu0 %3722  ;;  %v3629_v17 = vpop.xlane.xlu1 %3628 }
0x17cb   : > { %6040 = vpow2.f32 %v3632_v27  ;;  %v3631_v30 = vsub.f32 %v3623_v23, %v3629_v17  ;;  %5739 = vmatpush3.msra.mxu0 %v3723_v28 }
0x17cc   : > { %5748 = vmatprep.subr.mxu0 %v6115_v13 }
0x17cd   : > { %v3634_v32 = vmul.f32 1.442695, %v3631_v30 }
0x17ce   : > { %v3647_v34 = vpop.permute.xlu1 %3646 }
0x17cf   : > { %6042 = vpow2.f32 %v3634_v32  ;;  %5734 = vmatpush3.msra.mxu1 %v3647_v34 }
0x17d0   : > { %5743 = vmatprep.subr.mxu1 %v6115_v13 }
0x17d2   : > { %v3801_v43 = vpop.permute.xlu1 %3800 }
0x17d5   : > { %v6041_v36 = vpop.eup %6040 }
0x17d6   : > { %v3636_v37 = vsel %vm1283_vm10, %v6041_v36, 0.0  ;;  %v3879_v20 = vpop.permute.xlu1 %3878 }
0x17d7   : > { %3637 = vadd.xlane.f32.xlu0 %v3636_v37 }
0x17d9   : > { %v6043_v38 = vpop.eup %6042 }
0x17da   : > { %v3639_v39 = vsel %vm1283_vm10, %v6043_v38, 0.0  ;;  %v3877_v47 = vpop.permute.xlu1 %3876 }
0x17db   : > { %3640 = vadd.xlane.f32.xlu0 %v3639_v39 }
0x17f1   : > { %3798 = vrot.lane.b32.xlu0 %v6640_v33, %s6944_s19  ;;  %s6951_s19 = smov 24  }
0x1864   : > { %v3638_v41 = vpop.xlane.xlu0 %3637 }
0x1865   : > { %6044 = vrcp.f32 %v3638_v41 }
0x1868   : > { %v3641_v42 = vpop.xlane.xlu0 %3640 }
0x1869   : > { %6046 = vrcp.f32 %v3641_v42 }
0x186c   : > { %v3799_v15 = vpop.permute.xlu0 %3798 }
0x186f   : > { %v6045_v44 = vpop.eup %6044 }
0x1870   : > { %v3644_v45 = vmul.f32 %v6045_v44, %v6041_v36 }
0x1872   : > { %5736 = vmatmul.mubr.msk.f32.vlgmr.msra.gmra.mrb[30].mxu1 %vm1283_vm10, %v3644_v45 }
0x1873   : > { %v6047_v46 = vpop.eup %6046  ;;  %5744 = vmatpush3.xpose.msk.msra.mxu1 %vm1283_vm10, %v3801_v43  ;;  %5745 = vmatprep.mubr.msk.f32.mxu1 %vm6116_vm9, %v6115_v13 }
0x1874   : > { %v3645_v12 = vmul.f32 %v6047_v46, %v6043_v38  ;;  %5753 = vmatprep.subr.mxu1 %v6115_v13 }
0x1876   : > { %5741 = vmatmul.mubr.msk.f32.vlgmr.msra.gmra.mrb[26].mxu0 %vm1283_vm10, %v3645_v12  ;;  %5746 = vmatmul.mubr.msk.f32.vlgmr.msra.gmra.mrb[32].mxu1 %vm1283_vm10, %v3799_v15 }
0x1877   : > { %5749 = vmatpush3.xpose.msk.msra.mxu0 %vm1283_vm10, %v3879_v20  ;;  %5750 = vmatprep.mubr.msk.f32.mxu0 %vm6116_vm9, %v6115_v13 }
0x1878   : > { %5758 = vmatprep.subr.mxu0 %v6115_v13  ;;  %5755 = vmatprep.mubr.msk.f32.mxu1 %vm6116_vm9, %v6115_v13 }
0x187a   : > { %5751 = vmatmul.mubr.msk.f32.vlgmr.msra.gmra.mrb[28].mxu0 %vm1283_vm10, %v3877_v47 }
0x187b   : > { %5760 = vmatprep.mubr.msk.f32.mxu0 %vm6116_vm9, %v6115_v13 }
0x1945   : > { %v6734_v48 = vpop.f32.mrb[30].mxu1 }
0x1946   : > { %v5737_v49 = vpop.f32.mrb[31].mxu1 }
0x1949   : > { %v6736_v50 = vpop.f32.mrb[26].mxu0  ;;  %v3872_v51 = vpop.f32.mrb[32].mxu1 }
0x194a   : > { %v3954_v52 = vmul.f32 0.35355338, %v3872_v51  ;;  %v5742_v53 = vpop.f32.mrb[27].mxu0  ;;  %v5747_v54 = vpop.f32.mrb[33].mxu1 }
0x194c   : > { %v3956_v55 = vadd.f32 %v3954_v52, %v6374_v35 }
0x194d   : > { %v3950_v56 = vpop.f32.mrb[28].mxu0 }
0x194e   : > { %v3955_v57 = vmul.f32 0.35355338, %v3950_v56  ;;  %v5752_v58 = vpop.f32.mrb[29].mxu0  ;;  %v3958_v59 = vsel %vm1283_vm10, %v3956_v55, -inf }
0x194f   : > { %3959 = vmax.xlane.f32.xlu0 %v3958_v59 }
0x1950   : > { %v3957_v60 = vadd.f32 %v3955_v57, %v6378_v40 }
0x1952   : > { %v3961_v61 = vsel %vm1283_vm10, %v3957_v60, -inf }
0x1953   : > { %3962 = vmax.xlane.f32.xlu1 %v3961_v61 }
0x1964   : > { %3980 = vrot.lane.b32.xlu1 %v6640_v33, %s6945_s25 }
0x1965   : > { %4056 = vrot.lane.b32.xlu0 %v6638_v31, %s6945_s25 }
0x1968   : > { %4134 = vrot.lane.b32.xlu1 %v6640_v33, %s6946_s20 }
0x196c   : > { %4212 = vrot.lane.b32.xlu1 %v6638_v31, %s6946_s20 }
0x1970   : > { %4210 = vrot.lane.b32.xlu1 %v6638_v31, %s6947_s18 }
0x19dc   : > { %v3960_v62 = vpop.xlane.xlu0 %3959 }
0x19dd   : > { %v3964_v63 = vsub.f32 %v3956_v55, %v3960_v62  ;;  %v5339_v62 = vld [vmem:[%s6517_s1 + $0x30] sm:$0xff] }
0x19df   : > { %v3966_v18 = vmul.f32 1.442695, %v3964_v63  ;;  %v5340_v63 = vld [vmem:[%s6517_s1 + $0x38] sm:$0xff] }
0x19e0   : > { %v4057_v0 = vpop.permute.xlu0 %4056  ;;  %v3963_v1 = vpop.xlane.xlu1 %3962 }
0x19e1   : > { %6048 = vpow2.f32 %v3966_v18  ;;  %v3965_v5 = vsub.f32 %v3957_v60, %v3963_v1  ;;  %5759 = vmatpush3.msra.mxu0 %v4057_v0  ;;  %v5337_v60 = vld [vmem:[%s6517_s1 + $0x20] sm:$0xff]  ;;  %v5911_v18 = vpack.c.bf16 %v5340_v63, %v5339_v62  ;;  %v5355_v63 = vld [vmem:[%s6578_s21 + $0x48] sm:$0xff] }
0x19e2   : > { %5768 = vmatprep.subr.mxu0 %v6115_v13  ;;  %v5354_v62 = vld [vmem:[%s6578_s21 + $0x40] sm:$0xff] }
0x19e3   : > { %v3968_v7 = vmul.f32 1.442695, %v3965_v5 }
0x19e4   : > { %v3981_v8 = vpop.permute.xlu1 %3980 }
0x19e5   : > { %6050 = vpow2.f32 %v3968_v7  ;;  %5754 = vmatpush3.msra.mxu1 %v3981_v8 }
0x19e6   : > { %5763 = vmatprep.subr.mxu1 %v6115_v13 }
0x19e8   : > { %v4135_v22 = vpop.permute.xlu1 %4134 }
0x19eb   : > { %v6049_v10 = vpop.eup %6048 }
0x19ec   : > { %v3970_v9 = vsel %vm1283_vm10, %v6049_v10, 0.0  ;;  %v4213_v26 = vpop.permute.xlu1 %4212 }
0x19ed   : > { %3971 = vadd.xlane.f32.xlu0 %v3970_v9 }
0x19ef   : > { %v6051_v14 = vpop.eup %6050 }
0x19f0   : > { %v3973_v16 = vsel %vm1283_vm10, %v6051_v14, 0.0  ;;  %v4211_v17 = vpop.permute.xlu1 %4210 }
0x19f1   : > { %3974 = vadd.xlane.f32.xlu0 %v3973_v16 }
0x1a07   : > { %4132 = vrot.lane.b32.xlu0 %v6640_v33, %s6947_s18 }
0x1a7a   : > { %v3972_v19 = vpop.xlane.xlu0 %3971 }
0x1a7b   : > { %6052 = vrcp.f32 %v3972_v19 }
0x1a7e   : > { %v3975_v21 = vpop.xlane.xlu0 %3974 }
0x1a7f   : > { %6054 = vrcp.f32 %v3975_v21 }
0x1a82   : > { %v4133_v28 = vpop.permute.xlu0 %4132 }
0x1a85   : > { %v6053_v23 = vpop.eup %6052 }
0x1a86   : > { %v3978_v24 = vmul.f32 %v6053_v23, %v6049_v10 }
0x1a88   : > { %5756 = vmatmul.mubr.msk.f32.vlgmr.msra.gmra.mrb[34].mxu1 %vm1283_vm10, %v3978_v24 }
0x1a89   : > { %v6055_v25 = vpop.eup %6054  ;;  %5764 = vmatpush3.xpose.msk.msra.mxu1 %vm1283_vm10, %v4135_v22  ;;  %5765 = vmatprep.mubr.msk.f32.mxu1 %vm6116_vm9, %v6115_v13 }
0x1a8a   : > { %v3979_v27 = vmul.f32 %v6055_v25, %v6051_v14  ;;  %5773 = vmatprep.subr.mxu1 %v6115_v13 }
0x1a8c   : > { %5761 = vmatmul.mubr.msk.f32.vlgmr.msra.gmra.mrb[30].mxu0 %vm1283_vm10, %v3979_v27  ;;  %5766 = vmatmul.mubr.msk.f32.vlgmr.msra.gmra.mrb[36].mxu1 %vm1283_vm10, %v4133_v28  ;;  %v5342_v27 = vld [vmem:[%s6539_s27 + $0x1] ss:$0 sm:$0xff] }
0x1a8d   : > { %5769 = vmatpush3.xpose.msk.msra.mxu0 %vm1283_vm10, %v4213_v26  ;;  %5770 = vmatprep.mubr.msk.f32.mxu0 %vm6116_vm9, %v6115_v13 }
0x1a8e   : > { %5778 = vmatprep.subr.mxu0 %v6115_v13  ;;  %5775 = vmatprep.mubr.msk.f32.mxu1 %vm6116_vm9, %v6115_v13 }
0x1a90   : > { %5771 = vmatmul.mubr.msk.f32.vlgmr.msra.gmra.mrb[32].mxu0 %vm1283_vm10, %v4211_v17 }
0x1a91   : > { %5780 = vmatprep.mubr.msk.f32.mxu0 %vm6116_vm9, %v6115_v13 }
0x1b5b   : > { %v4052_v30 = vpop.f32.mrb[34].mxu1 }
0x1b5c   : > { %v5757_v32 = vpop.f32.mrb[35].mxu1 }
0x1b5f   : > { %v4128_v34 = vpop.f32.mrb[30].mxu0  ;;  %v4206_v36 = vpop.f32.mrb[36].mxu1 }
0x1b60   : > { %v4288_v37 = vmul.f32 0.35355338, %v4206_v36  ;;  %v5762_v38 = vpop.f32.mrb[31].mxu0  ;;  %v5767_v39 = vpop.f32.mrb[37].mxu1 }
0x1b62   : > { %v4290_v41 = vadd.f32 %v4288_v37, %v6374_v35 }
0x1b63   : > { %v4284_v42 = vpop.f32.mrb[32].mxu0 }
0x1b64   : > { %v4289_v43 = vmul.f32 0.35355338, %v4284_v42  ;;  %v5772_v44 = vpop.f32.mrb[33].mxu0  ;;  %v4292_v45 = vsel %vm1283_vm10, %v4290_v41, -inf }
0x1b65   : > { %4293 = vmax.xlane.f32.xlu0 %v4292_v45 }
0x1b66   : > { %v4291_v46 = vadd.f32 %v4289_v43, %v6378_v40 }
0x1b68   : > { %v4295_v20 = vsel %vm1283_vm10, %v4291_v46, -inf }
0x1b69   : > { %4296 = vmax.xlane.f32.xlu1 %v4295_v20  ;;  %v5347_v20 = vld [vmem:[%s6552_s3 + $0x28] sm:$0xff] }
0x1b7a   : > { %4314 = vrot.lane.b32.xlu1 %v6640_v33, %s6948_s23 }
0x1b7e   : > { %4468 = vrot.lane.b32.xlu1 %v6734_v48, %s6949_s28 }
0x1b82   : > { %4470 = vrot.lane.b32.xlu1 %v6736_v50, %s6949_s28 }
0x1b86   : > { %4478 = vrot.lane.b32.xlu1 %v4128_v34, %s6950_s26 }
0x1bf2   : > { %v4294_v35 = vpop.xlane.xlu0 %4293 }
0x1bf3   : > { %v4298_v12 = vsub.f32 %v4290_v41, %v4294_v35 }
0x1bf5   : > { %v4300_v15 = vmul.f32 1.442695, %v4298_v12  ;;  %v5348_v12 = vld [vmem:[%s6552_s3 + $0x30] sm:$0xff] }
0x1bf6   : > { %v4297_v47 = vpop.xlane.xlu1 %4296 }
0x1bf7   : > { %6056 = vpow2.f32 %v4300_v15  ;;  %v4299_v40 = vsub.f32 %v4291_v46, %v4297_v47  ;;  %v5346_v46 = vld [vmem:[%s6552_s3 + $0x20] sm:$0xff]  ;;  %v5349_v15 = vld [vmem:[%s6552_s3 + $0x38] sm:$0xff] }
0x1bf8   : > { %v5915_v35 = vpack.c.bf16 %v5347_v20, %v5346_v46  ;;  %v5919_v47 = vpack.c.bf16 %v5349_v15, %v5348_v12 }
0x1bf9   : > { %v4302_v49 = vmul.f32 1.442695, %v4299_v40 }
0x1bfa   : > { %v4315_v51 = vpop.permute.xlu1 %4314 }
0x1bfb   : > { %6058 = vpow2.f32 %v4302_v49  ;;  %5774 = vmatpush3.msra.mxu1 %v4315_v51 }
0x1bfe   : > { %v4469_v8 = vpop.permute.xlu1 %4468 }
0x1bff   : > { %v4490_v14 = vsel %vm1283_vm10, %v6694_v3, %v4469_v8  ;;  %v5359_v8 = vld [vmem:[%s6578_s21 + $0x68] sm:$0xff] }
0x1c01   : > { %v6057_v52 = vpop.eup %6056 }
0x1c02   : > { %v4304_v33 = vsel %vm1283_vm10, %v6057_v52, 0.0  ;;  %v4471_v10 = vpop.permute.xlu1 %4470 }
0x1c03   : > { %4305 = vadd.xlane.f32.xlu0 %v4304_v33  ;;  %v4491_v23 = vsel %vm1283_vm10, %v6696_v6, %v4471_v10 }
0x1c05   : > { %v6059_v48 = vpop.eup %6058 }
0x1c06   : > { %v4307_v53 = vsel %vm1283_vm10, %v6059_v48, 0.0  ;;  %v4479_v16 = vpop.permute.xlu1 %4478 }
0x1c07   : > { %4308 = vadd.xlane.f32.xlu0 %v4307_v53  ;;  %v4493_v24 = vsel %vm2651_vm11, %v4491_v23, %v4479_v16  ;;  %v5345_v53 = vld [vmem:[%s6564_s24 + $0x2] sm:$0x3]  ;;  %s6952_s24 = sld [smem:[#allocation10_spill]] (!%p5367_p4) }
0x1c1d   : > { %4390 = vrot.lane.b32.xlu0 %v6638_v31, %s6948_s23  ;;  %v5338_v31 = vld [vmem:[%s6517_s1 + $0x28] sm:$0xff] }
0x1c1e   : > { %v5907_v61 = vpack.c.bf16 %v5338_v31, %v5337_v60 }
0x1c20   : > { %5908 = vmatprep.subr.bf16.mxu1 %v5907_v61 }
0x1c21   : > { %4476 = vrot.lane.b32.xlu0 %v4052_v30, %s6950_s26 }
0x1c90   : > { %v4306_v50 = vpop.xlane.xlu0 %4305 }
0x1c91   : > { %6060 = vrcp.f32 %v4306_v50  ;;  %v4623_v50 = vrot.slane %v5345_v53, %v6324_v2 }
0x1c94   : > { %v4309_v54 = vpop.xlane.xlu0 %4308 }
0x1c95   : > { %6062 = vrcp.f32 %v4309_v54 }
0x1c98   : > { %v4391_v55 = vpop.permute.xlu0 %4390 }
0x1c99   : > { %5779 = vmatpush3.msra.mxu0 %v4391_v55 }
0x1c9a   : > { %5916 = vmatprep.subr.bf16.mxu0 %v5915_v35 }
0x1c9b   : > { %v6061_v56 = vpop.eup %6060 }
0x1c9c   : > { %v4312_v57 = vmul.f32 %v6061_v56, %v6057_v52  ;;  %v4477_v9 = vpop.permute.xlu0 %4476  ;;  %v4629_v56 = vrot.slane %v5345_v53, %v6326_v4 }
0x1c9d   : > { %v4492_v19 = vsel %vm2651_vm11, %v4490_v14, %v4477_v9  ;;  %v5360_v9 = vld [vmem:[%s6578_s21 + $0x70] sm:$0xff]  ;;  %v5361_v14 = vld [vmem:[%s6578_s21 + $0x78] sm:$0xff] }
0x1c9e   : > { %5776 = vmatmul.mubr.msk.f32.vlgmr.msra.gmra.mrb[38].mxu1 %vm1283_vm10, %v4312_v57  ;;  %v5935_v16 = vpack.c.bf16 %v5361_v14, %v5360_v9  ;;  %v5368_v14 = vld [vmem:[%s6952_s24] ss:$0 sm:$0xff] (!%p5367_p4) }
0x1c9f   : > { %v6063_v58 = vpop.eup %6062  ;;  %5910 = vmatpush3.bf16.msra.mxu1 %v5907_v61  ;;  %4896 = vst.msk [vmem:[#allocation2] sm:$0x3] (!%p5367_p4), %vm4895_vm14, %v5368_v14 }
0x1ca0   : > { %v4313_v59 = vmul.f32 %v6063_v58, %v6059_v48  ;;  %5912 = vmatprep.subr.bf16.mxu1 %v5911_v18 }
0x1ca2   : > { %5781 = vmatmul.mubr.msk.f32.vlgmr.msra.gmra.mrb[34].mxu0 %vm1283_vm10, %v4313_v59 }
0x1ca3   : > { %5914 = vmatpush3.bf16.msra.mxu1 %v5911_v18  ;;  %5918 = vmatpush3.bf16.msra.mxu0 %v5915_v35  ;;  %v5923_v18 = vpack.c.bf16 %v5355_v63, %v5354_v62 }
0x1ca4   : > { %5920 = vmatprep.subr.bf16.mxu0 %v5919_v47 }
0x1ca5   : > { %5924 = vmatprep.subr.bf16.mxu1 %v5923_v18 }
0x1ca7   : > { %5922 = vmatpush3.bf16.msra.mxu0 %v5919_v47 }
0x1d71   : > { %v4386_v0 = vpop.f32.mrb[38].mxu1 }
0x1d72   : > { %4484 = vrot.lane.b32.xlu0 %v4386_v0, %s6951_s19  ;;  %v5777_v1 = vpop.f32.mrb[39].mxu1  ;;  %v5356_v0 = vld [vmem:[%s6578_s21 + $0x50] sm:$0xff] }
0x1d73   : > { %v5357_v1 = vld [vmem:[%s6578_s21 + $0x58] sm:$0xff] }
0x1d75   : > { %v4462_v5 = vpop.f32.mrb[34].mxu0 }
0x1d76   : > { %4486 = vrot.lane.b32.xlu1 %v4462_v5, %s6951_s19  ;;  %v5782_v7 = vpop.f32.mrb[35].mxu0  ;;  %v5927_v5 = vpack.c.bf16 %v5357_v1, %v5356_v0 }
0x1d77   : > { %v5358_v7 = vld [vmem:[%s6578_s21 + $0x60] sm:$0xff] }
0x1d78   : > { %v5931_v10 = vpack.c.bf16 %v5359_v8, %v5358_v7 }
0x1de4   : > { %v4485_v21 = vpop.permute.xlu0 %4484 }
0x1de5   : > { %v4494_v22 = vsel %vm2654_vm12, %v4492_v19, %v4485_v21  ;;  %v5351_v19 = vld [vmem:[%s6593_s29 + $0x1] ss:$0 sm:$0xff] }
0x1de6   : > { %5791 = vmatprep.mubr.msk.f32.mxu1 %vm1121_vm8, %v4494_v22 }
0x1de8   : > { %v4487_v25 = vpop.permute.xlu1 %4486 }
0x1de9   : > { %v4495_v26 = vsel %vm2654_vm12, %v4493_v24, %v4487_v25 }
0x1dea   : > { %5792 = vmatmul.mubr.msk.f32.vlgmr.msra.gmra.mrb[40].mxu1 %vm1121_vm8, %v4495_v26 }
0x1deb   : > { %5926 = vmatpush3.bf16.msra.mxu1 %v5923_v18 }
0x1dec   : > { %5928 = vmatprep.subr.bf16.mxu1 %v5927_v5 }
0x1def   : > { %5930 = vmatpush3.bf16.msra.mxu1 %v5927_v5 }
0x1df0   : > { %5932 = vmatprep.subr.bf16.mxu1 %v5931_v10 }
0x1df3   : > { %5934 = vmatpush3.bf16.msra.mxu1 %v5931_v10 }
0x1df4   : > { %5936 = vmatprep.subr.bf16.mxu1 %v5935_v16 }
0x1df7   : > { %5938 = vmatpush3.bf16.msra.mxu1 %v5935_v16 }
0x1ebd   : > { %v5793_v3 = vpop.f32.mrb[40].mxu1 }
0x1ebe   : > { %v4587_v28 = vadd.f32 %v5793_v3, %v5342_v27  ;;  %v4581_v17 = vpop.f32.mrb[41].mxu1 }
0x1ebf   : > { %v4582_v30 = vadd.f32 %v5342_v27, %v4581_v17 }
0x1ec0   : > { %v4591_v32 = vadd.f32 %v4587_v28, %v6629_v11 }
0x1ec1   : > { %v4590_v34 = vadd.f32 %v4582_v30, %v6627_v29 }
0x1ec2   : > { %v4597_v36 = vsel %vm1121_vm8, %v4591_v32, 0.0 }
0x1ec3   : > { %4598 = vadd.xlane.f32.xlu1 %v4597_v36  ;;  %v4594_v6 = vsel %vm1121_vm8, %v4590_v34, 0.0 }
0x1ec4   : > { %4595 = vadd.xlane.f32.xlu0 %v4594_v6 }
0x1f50   : > { %v4599_v37 = vpop.xlane.xlu1 %4598 }
0x1f51   : > { %v4601_v38 = vmul.f32 0.03125, %v4599_v37  ;;  %v4596_v39 = vpop.xlane.xlu0 %4595 }
0x1f52   : > { %v4600_v41 = vmul.f32 0.03125, %v4596_v39 }
0x1f53   : > { %v4603_v42 = vsub.f32 %v4591_v32, %v4601_v38 }
0x1f54   : > { %v4602_v43 = vsub.f32 %v4590_v34, %v4600_v41 }
0x1f55   : > { %v4605_v29 = vmul.f32 %v4603_v42, %v4603_v42 }
0x1f56   : > { %v4604_v44 = vmul.f32 %v4602_v43, %v4602_v43 }
0x1f57   : > { %v4609_v45 = vsel %vm1121_vm8, %v4605_v29, 0.0 }
0x1f58   : > { %v4606_v11 = vsel %vm1121_vm8, %v4604_v44, 0.0 }
0x1f59   : > { %4607 = vadd.xlane.f32.xlu0 %v4606_v11  ;;  %v5363_v11 = vld [vmem:[%s6604_s2 + $0x1] ss:$0 sm:$0xff] }
0x1f5d   : > { %4610 = vadd.xlane.f32.xlu0 %v4609_v45 }
0x1fe6   : > { %v4608_v40 = vpop.xlane.xlu0 %4607 }
0x1fe7   : > { %v4612_v49 = vmul.f32 0.03125, %v4608_v40 }
0x1fe9   : > { %v4614_v51 = vadd.f32 1e-12, %v4612_v49 }
0x1fea   : > { %v4611_v52 = vpop.xlane.xlu0 %4610 }
0x1feb   : > { %6064 = vrsqrt.f32 %v4614_v51  ;;  %v4613_v33 = vmul.f32 0.03125, %v4611_v52 }
0x1fed   : > { %v4615_v48 = vadd.f32 1e-12, %v4613_v33 }
0x1fef   : > { %6066 = vrsqrt.f32 %v4615_v48 }
0x1ff5   : > { %v6065_v54 = vpop.eup %6064 }
0x1ff6   : > { %v4618_v55 = vmul.f32 %v6065_v54, %v4602_v43 }
0x1ff8   : > { %v4624_v57 = vmul.f32 %v4623_v50, %v4618_v55 }
0x1ff9   : > { %v6067_v58 = vpop.eup %6066 }
0x1ffa   : > { %v4619_v59 = vmul.f32 %v6067_v58, %v4603_v42  ;;  %v4630_v60 = vadd.f32 %v4629_v56, %v4624_v57 }
0x1ffc   : > { %v4625_v31 = vmul.f32 %v4623_v50, %v4619_v59  ;;  %5802 = vmatprep.mubr.msk.f32.mxu0 %vm1121_vm8, %v4630_v60 }
0x1ffe   : > { %v4631_v61 = vadd.f32 %v4629_v56, %v4625_v31 }
0x2000   : > { %5803 = vmatmul.mubr.msk.f32.vlgmr.msra.gmra.mrb[36].mxu0 %vm1121_vm8, %v4631_v61 }
0x20d3   : > { %v5804_v21 = vpop.f32.mrb[36].mxu0 }
0x20d4   : > { %v4723_v22 = vadd.f32 %v5804_v21, %v5351_v19  ;;  %v4717_v23 = vpop.f32.mrb[37].mxu0 }
0x20d5   : > { %v4718_v24 = vadd.f32 %v5351_v19, %v4717_v23 }
0x20d6   : > { %v4729_v25 = vmul.f32 0.044715, %v4723_v22  ;;  %v4727_v42 = vmul.f32 0.5, %v4723_v22 }
0x20d7   : > { %v4728_v26 = vmul.f32 0.044715, %v4718_v24  ;;  %v4726_v39 = vmul.f32 0.5, %v4718_v24 }
0x20d8   : > { %v4731_v27 = vmul.f32 %v4729_v25, %v4723_v22 }
0x20d9   : > { %v4730_v3 = vmul.f32 %v4728_v26, %v4718_v24 }
0x20da   : > { %v4733_v28 = vmul.f32 %v4731_v27, %v4723_v22 }
0x20db   : > { %v4732_v17 = vmul.f32 %v4730_v3, %v4718_v24 }
0x20dc   : > { %v4735_v30 = vadd.f32 %v4733_v28, %v4723_v22 }
0x20dd   : > { %v4734_v32 = vadd.f32 %v4732_v17, %v4718_v24 }
0x20de   : > { %v4737_v34 = vmul.f32 0.7978846, %v4735_v30 }
0x20df   : > { %v4736_v36 = vmul.f32 0.7978846, %v4734_v32 }
0x20e0   : > { %6068 = vtanh.f32 %v4737_v34 }
0x20e1   : > { %6070 = vtanh.f32 %v4736_v36 }
0x20ea   : > { %v6069_v6 = vpop.eup %6068 }
0x20eb   : > { %v6071_v37 = vpop.eup %6070  ;;  %v4741_v38 = vadd.f32 1.0, %v6069_v6 }
0x20ec   : > { %v4740_v41 = vadd.f32 1.0, %v6071_v37 }
0x20ed   : > { %v4743_v44 = vmul.f32 %v4741_v38, %v4727_v42 }
0x20ee   : > { %v4742_v43 = vmul.f32 %v4740_v41, %v4726_v39 }
0x20f0   : > { %5821 = vmatprep.mubr.msk.f32.mxu1 %vm2915_vm13, %v4742_v43 }
0x20f1   : > { %5822 = vmatmul.mubr.msk.f32.vlgmr.msra.gmra.mrb[42].mxu1 %vm2915_vm13, %v4743_v44 }
0x21c4   : > { %v5823_v29 = vpop.f32.mrb[42].mxu1 }
0x21c5   : > { %v4839_v45 = vadd.f32 %v5823_v29, %v5363_v11  ;;  %v4833_v46 = vpop.f32.mrb[43].mxu1 }
0x21c6   : > { %v4834_v20 = vadd.f32 %v5363_v11, %v4833_v46 }
0x21c7   : > { %v4843_v35 = vadd.f32 %v4839_v45, %v4631_v61  ;;  %v5366_v61 = vld [vmem:[%s6622_s22 + $0x2] sm:$0x3] }
0x21c8   : > { %v4842_v12 = vadd.f32 %v4834_v20, %v4630_v60  ;;  %v4875_v62 = vrot.slane %v5366_v61, %v6324_v2  ;;  %v4881_v0 = vrot.slane %v5366_v61, %v6326_v4 }
0x21c9   : > { %v4849_v15 = vsel %vm1121_vm8, %v4843_v35, 0.0 }
0x21ca   : > { %4850 = vadd.xlane.f32.xlu0 %v4849_v15  ;;  %v4846_v47 = vsel %vm1121_vm8, %v4842_v12, 0.0 }
0x21cb   : > { %4847 = vadd.xlane.f32.xlu1 %v4846_v47 }
0x2257   : > { %v4851_v40 = vpop.xlane.xlu0 %4850 }
0x2258   : > { %v4853_v49 = vmul.f32 0.03125, %v4851_v40  ;;  %v4848_v51 = vpop.xlane.xlu1 %4847 }
0x2259   : > { %v4852_v52 = vmul.f32 0.03125, %v4848_v51 }
0x225a   : > { %v4855_v33 = vsub.f32 %v4843_v35, %v4853_v49 }
0x225b   : > { %v4854_v48 = vsub.f32 %v4842_v12, %v4852_v52 }
0x225c   : > { %v4857_v53 = vmul.f32 %v4855_v33, %v4855_v33 }
0x225d   : > { %v4856_v50 = vmul.f32 %v4854_v48, %v4854_v48 }
0x225e   : > { %v4861_v54 = vsel %vm1121_vm8, %v4857_v53, 0.0 }
0x225f   : > { %4862 = vadd.xlane.f32.xlu0 %v4861_v54  ;;  %v4858_v55 = vsel %vm1121_vm8, %v4856_v50, 0.0 }
0x2260   : > { %4859 = vadd.xlane.f32.xlu1 %v4858_v55 }
0x22ec   : > { %v4863_v56 = vpop.xlane.xlu0 %4862 }
0x22ed   : > { %v4865_v57 = vmul.f32 0.03125, %v4863_v56  ;;  %v4860_v58 = vpop.xlane.xlu1 %4859 }
0x22ee   : > { %v4864_v59 = vmul.f32 0.03125, %v4860_v58 }
0x22ef   : > { %v4867_v60 = vadd.f32 1e-12, %v4865_v57 }
0x22f0   : > { %v4866_v31 = vadd.f32 1e-12, %v4864_v59 }
0x22f1   : > { %6072 = vrsqrt.f32 %v4867_v60 }
0x22f2   : > { %6074 = vrsqrt.f32 %v4866_v31 }
0x22fb   : > { %v6073_v63 = vpop.eup %6072  ;;  %4887 = sbr.rel (%p5367_p4) target bundleno = 8962 (0x2302), region = 100 }
0x22fc   : > { %v6075_v18 = vpop.eup %6074  ;;  %v4871_v1 = vmul.f32 %v6073_v63, %v4855_v33 }
0x22fd   : > { %v4870_v5 = vmul.f32 %v6075_v18, %v4854_v48 }
0x22fe   : > { %v4877_v7 = vmul.f32 %v4875_v62, %v4871_v1 }
0x22ff   : > { %v4876_v8 = vmul.f32 %v4875_v62, %v4870_v5 }
0x2300   : > { %v4883_v10 = vadd.f32 %v4881_v0, %v4877_v7 }
0x2301   : > { %v4882_v9 = vadd.f32 %v4881_v0, %v4876_v8 }
0x2302 PF: > { %v4898_v2 = vld [vmem:[%s6259_s0] sm:$0xff]  ;;  %v4899_v4 = vld [vmem:[%s6259_s0 + $0x8] sm:$0xff]  ;;  %v4900_v16 = vld [vmem:[%s6259_s0 + $0x10] sm:$0xff]  ;;  %5832 = vmatprep.mubr.msk.f32.mxu0 %vm6116_vm9, %v6115_v13  ;;  %v6132_v19 = vmov 0.0|0.0   ;;  %v4904_v24 = vrot.slane %v4883_v10, 7  ;;  %vm4905_vm15 = vcmask 1041409  }
0x2303   : > { %5939 = vmatprep.subr.bf16.mxu0 %v6132_v19  ;;  %v5940_v21 = vpack.c.bf16 %v4899_v4, %v4898_v2  ;;  %v4901_v22 = vld [vmem:[%s6259_s0 + $0x18] sm:$0xff]  ;;  %v4897_v26 = vld [vmem:[#allocation2] sm:$0x3]  ;;  %s6133_s3 = smov [#allocation2]   ;;  %vm4980_vm0 = vcmask 58368   ;;  %p5952_p5 = scmp.eq.s32.totalorder %s6240_s30, 2 }
0x2304   : > { %v5943_v23 = vpack.c.bf16 %v4901_v22, %v4900_v16  ;;  %v4906_v25 = vsel %vm4905_vm15, %v4904_v24, %v4882_v9  ;;  %s4989_s27 = sshll.u32 %s6133_s3, 4  ;;  %s4990_s27 = int_to_ptr.vmem [resolvable:$true] %s4989_s27 }
0x2305   : > { %5941 = vmatpush3.bf16.msra.mxu0 %v5940_v21  ;;  %s6076_s0 = scalar_lea.vmem %s4990_s27, 32  ;;  %p6083_p9 = scmp.lt.s32.totalorder %s4990_s27, %s4990_s27 }
0x2306   : > { %5942 = vmatprep.subr.bf16.mxu0 %v6132_v19  ;;  %p6077_p6 = scmp.ne.s32.totalorder %s4990_s27, %s6076_s0  ;;  %p6084_p10 = scmp.lt.s32.totalorder %s6076_s0, %s6076_s0 }
0x2308   : > { %p6078_p7 = pnand %p6077_p6, %p5952_p5  ;;  %p6085_p11 = por %p6084_p10, %p6083_p9 }
0x2309   : > { %5944 = vmatpush3.bf16.msra.mxu0 %v5943_v23 }
0x230a   : > { %p6079_p8 = pneg %p6078_p7 }
0x230c   : > { %5833 = vmatmul.mubr.msk.f32.vlgmr.msra.gmra.mrb[38].mxu0 %vm1121_vm8, %v4906_v25  ;;  %p6086_p12 = pnand %p6085_p11, %p6079_p8 }
0x23df   : > { %v4975_v27 = vpop.f32.mrb[38].mxu0 }
0x23e0   : > { %v4979_v13 = vadd.f32 %v4975_v27, %v4897_v26  ;;  %v5834_v3 = vpop.f32.mrb[39].mxu0 }
0x23e2   : > { %4981 = vst.msk [vmem:[#allocation2] sm:$0x3] %vm4980_vm0, %v4979_v13 }
0x23e3   : > { %6089 = shalt.err (!%p6086_p12)
}
0x23e4   : > { %s6953_s22 = sld [smem:[#allocation11_spill]] }
0x23ea   : > { %s6090_s25 = scalar_lea.hbm %s6953_s22, 32 }
0x23eb   : > { %p6091_p13 = scmp.ne.s32.totalorder %s6953_s22, %s6090_s25  ;;  %p6096_p2 = scmp.lt.u32.totalorder %s6090_s25, %s6953_s22 }
0x23ed   : > { %p6092_p0 = pnand %p6091_p13, %p5952_p5 }
0x23ef   : > { %p6093_p1 = pneg %p6092_p0 }
0x23f1   : > { %p6098_p3 = pnand %p6096_p2, %p6093_p1 }
0x23f3   : > { %6101 = shalt.err (!%p6098_p3)
}
0x23f4   : > { %5949 = dma.vmem_to_hbm [thread:$0]  (%p5952_p5), %s4990_s27, 32, %s6953_s22, [#allocation3]  }
0x23f5   : > { %6107 = dma.done.wait (%p5952_p5), [#allocation3], 32  }
0x23f6   : > { %6109 = vsyncadd (%p5952_p5), [#allocation3], 4294967264 }
0x23f7 PF: > { %s6954_s2 = sld [smem:[#allocation5_spill]] }
0x23fd   : > { %s30_s0 = sadd.s32 1, %s6954_s2  }
0x23fe   : > { %p27_p4 = scmp.ge.s32.totalorder %s30_s0, 5  }
0x2400   :  { %29 = sbr.rel (!%p27_p4) target bundleno = 8 (0x8), region = 188 }
0x2407   :  { %5002 = vsyncpa [#allocation3], 1 }
0x2408   :  { %5004 = vsyncpa [#allocation3 + $0x1], 1 }

</bundles_post_ra>
